<compile_context>
chip_gen: v5e
topology: v5e:2x2
jax: 0.10.0
libtpu: 0.0.40
codegen_flags: <defaults>
</compile_context>

<pallas_src>
import functools

import jax
import jax.numpy as jnp
from jax.experimental import pallas as pl
from jax.experimental.pallas import tpu as pltpu


def _round_up(x, m):
    return ((x + m - 1) // m) * m


_VMEM_LIMIT = 32 * 1024 * 1024  # explicit scoped-VMEM limit (safe on v5e/v6e/v7x)


# ----------------------------------------------------------------------------
# Pallas kernels
# ----------------------------------------------------------------------------
def _matmul_bias_act_kernel(x_ref, w_ref, bias_ref, o_ref, *, act):
    """o = act(x @ w + bias); BN scale is pre-folded into w by the wrapper."""
    acc = jnp.dot(x_ref[...], w_ref[...], preferred_element_type=jnp.float32)
    acc = acc + bias_ref[...]
    if act == "relu":
        acc = jnp.maximum(acc, 0.0)
    elif act == "sigmoid":
        acc = jax.nn.sigmoid(acc)
    o_ref[...] = acc.astype(o_ref.dtype)


def matmul_bias_act(x, w, bias, act="none", out_dtype=jnp.float32, tm=256):
    """Tiled (M-grid) fused matmul + bias + activation.

    x: (M, K) bf16/f32, w: (K, N), bias: (1, N) f32.
    N is padded to a multiple of 128 (lane-dense stores, full MXU columns);
    M is padded to the tile.  Both paddings are sliced off on return.
    """
    M, K = x.shape
    K2, N = w.shape
    assert K == K2

    Np = _round_up(N, 128)
    if Np != N:
        w = jnp.pad(w, ((0, 0), (0, Np - N)))
        bias = jnp.pad(bias, ((0, 0), (0, Np - N)))

    # M tile: multiple of 16 (bf16 sublane packing), capped at tm.
    tm_eff = min(tm, _round_up(M, 16))
    Mp = _round_up(M, tm_eff)
    if Mp != M:
        x = jnp.pad(x, ((0, Mp - M), (0, 0)))

    kernel = functools.partial(_matmul_bias_act_kernel, act=act)
    out = pl.pallas_call(
        kernel,
        out_shape=jax.ShapeDtypeStruct((Mp, Np), out_dtype),
        grid=(Mp // tm_eff,),
        in_specs=[
            pl.BlockSpec((tm_eff, K), lambda i: (i, 0)),   # streamed over M
            pl.BlockSpec((K, Np), lambda i: (0, 0)),       # weights VMEM-resident
            pl.BlockSpec((1, Np), lambda i: (0, 0)),       # bias VMEM-resident
        ],
        out_specs=pl.BlockSpec((tm_eff, Np), lambda i: (i, 0)),
        compiler_params=pltpu.CompilerParams(
            dimension_semantics=("parallel",),
            vmem_limit_bytes=_VMEM_LIMIT,
        ),
    )(x, w, bias)
    return out[:M, :N]


def _mul_add_kernel(feat_ref, att_ref, add_ref, o_ref):
    """out = feat * atten + add (atten / add broadcast over rows if size-1)."""
    f = feat_ref[...].astype(jnp.float32)
    a = att_ref[...].astype(jnp.float32)
    b = add_ref[...].astype(jnp.float32)
    o_ref[...] = (f * a + b).astype(o_ref.dtype)


def arm_mul_add(feat, att, add, out_dtype=jnp.float32, tr=256):
    """Fused ARM attention multiply + residual add.

    feat: (N, H, W, C); att: (N, C) broadcast over H*W;
    add:  (N, C) broadcast  OR  (N, H, W, C) full tensor.
    Returns (N, H, W, C) in out_dtype, tiled over rows.
    """
    N, H, W, C = feat.shape
    HW = H * W
    f2 = feat.reshape(N, HW, C)

    tr_eff = min(tr, _round_up(HW, 16))
    HWp = _round_up(HW, tr_eff)
    if HWp != HW:
        f2 = jnp.pad(f2, ((0, 0), (0, HWp - HW), (0, 0)))

    a3 = att.reshape(N, 1, C)

    if add.ndim == 2:                                   # broadcast add (gp path)
        add3 = add.reshape(N, 1, C)
        add_spec = pl.BlockSpec((1, 1, C), lambda b, r: (b, 0, 0))
    else:                                               # full-tensor add
        add3 = add.reshape(N, HW, C)
        if HWp != HW:
            add3 = jnp.pad(add3, ((0, 0), (0, HWp - HW), (0, 0)))
        add_spec = pl.BlockSpec((1, tr_eff, C), lambda b, r: (b, r, 0))

    out = pl.pallas_call(
        _mul_add_kernel,
        out_shape=jax.ShapeDtypeStruct((N, HWp, C), out_dtype),
        grid=(N, HWp // tr_eff),
        in_specs=[
            pl.BlockSpec((1, tr_eff, C), lambda b, r: (b, r, 0)),
            pl.BlockSpec((1, 1, C), lambda b, r: (b, 0, 0)),
            add_spec,
        ],
        out_specs=pl.BlockSpec((1, tr_eff, C), lambda b, r: (b, r, 0)),
        compiler_params=pltpu.CompilerParams(
            dimension_semantics=("parallel", "parallel"),
            vmem_limit_bytes=_VMEM_LIMIT,
        ),
    )(f2, a3, add3)
    return out[:, :HW, :].reshape(N, H, W, C)


# ----------------------------------------------------------------------------
# JAX glue: im2col, maxpool, bilinear resize (align_corners=True, no gather)
# ----------------------------------------------------------------------------
def _im2col(x, kh, kw, stride, pad):
    """x: (N,H,W,C) NHWC -> bf16 patches (N*Ho*Wo, kh*kw*C), (kh,kw,cin) order."""
    x = x.astype(jnp.bfloat16)
    N, H, W, C = x.shape
    xp = jnp.pad(x, ((0, 0), (pad, pad), (pad, pad), (0, 0)))
    Ho = (H + 2 * pad - kh) // stride + 1
    Wo = (W + 2 * pad - kw) // stride + 1
    cols = []
    for i in range(kh):
        for j in range(kw):
            cols.append(xp[:, i:i + stride * Ho:stride, j:j + stride * Wo:stride, :])
    patches = jnp.concatenate(cols, axis=-1)          # (N, Ho, Wo, kh*kw*C)
    return patches.reshape(N * Ho * Wo, kh * kw * C), (N, Ho, Wo)


def conv_block(x, w_torch, bn_scale, bn_bias, stride=1, padding=1, act="relu",
               out_dtype=jnp.bfloat16):
    """ConvBlock: Conv2d(bias=False) + BatchNorm2d(eval, folded) + ReLU.
       w_torch layout (Cout, Cin, KH, KW); x is NHWC."""
    Cout, Cin, KH, KW = w_torch.shape
    w2 = jnp.transpose(w_torch, (2, 3, 1, 0)).reshape(KH * KW * Cin, Cout)
    w2 = (w2 * bn_scale).astype(jnp.bfloat16)         # fold BN scale into weights
    patches, (N, Ho, Wo) = _im2col(x, KH, KW, stride, padding)
    out = matmul_bias_act(patches, w2, bn_bias, act=act, out_dtype=out_dtype)
    return out.reshape(N, Ho, Wo, Cout)


def max_pool_3x3_s2(x):
    """PyTorch ResNet stem maxpool: kernel 3, stride 2, padding 1 (NHWC)."""
    init = jnp.array(-jnp.inf, dtype=x.dtype)
    return jax.lax.reduce_window(
        x, init, jax.lax.max,
        window_dimensions=(1, 3, 3, 1),
        window_strides=(1, 2, 2, 1),
        padding=((0, 0), (1, 1), (1, 1), (0, 0)),
    )


def _interp_matrix(out_size, in_size):
    """(out_size, in_size) align_corners=True linear-interpolation matrix."""
    if out_size == 1 or in_size == 1:
        c = jnp.zeros((out_size,), jnp.float32)
    else:
        c = jnp.arange(out_size, dtype=jnp.float32) * ((in_size - 1) / (out_size - 1))
    i0 = jnp.floor(c).astype(jnp.int32)
    i1 = jnp.minimum(i0 + 1, in_size - 1)
    w = c - i0.astype(jnp.float32)
    m = ((1.0 - w)[:, None] * jax.nn.one_hot(i0, in_size, dtype=jnp.float32)
         + w[:, None] * jax.nn.one_hot(i1, in_size, dtype=jnp.float32))
    return m


def bilinear_resize_ac(x, out_h, out_w):
    """F.interpolate(mode='bilinear', align_corners=True) on NHWC input,
       expressed as two small matmuls (no gather/scatter HLO)."""
    N, H, W, C = x.shape
    my = _interp_matrix(out_h, H)                      # (out_h, H)
    mx = _interp_matrix(out_w, W)                      # (out_w, W)
    xf = x.astype(jnp.float32)
    y = jnp.einsum("oh,nhwc->nowc", my, xf)
    y = jnp.einsum("pw,nowc->nopc", mx, y)
    return y


# ----------------------------------------------------------------------------
# Parameter construction (deterministic, synthetic — no checkpoint loading)
# ----------------------------------------------------------------------------
def _make_bn(key, c):
    k1, k2, k3, k4 = jax.random.split(key, 4)
    gamma = 1.0 + 0.1 * jax.random.normal(k1, (c,), jnp.float32)
    beta = 0.1 * jax.random.normal(k2, (c,), jnp.float32)
    mean = 0.1 * jax.random.normal(k3, (c,), jnp.float32)
    var = jnp.abs(1.0 + 0.1 * jax.random.normal(k4, (c,), jnp.float32))
    scale = gamma / jnp.sqrt(var + 1e-5)               # folded eval-mode BatchNorm
    bias = beta - mean * scale
    return scale.reshape(1, c), bias.reshape(1, c)


def _make_conv(key, cout, cin, k):
    return 0.1 * jax.random.normal(key, (cout, cin, k, k), jnp.float32)


def _make_conv_block_params(key, cin, cout, k=3):
    kw, kb = jax.random.split(key)
    s, b = _make_bn(kb, cout)
    return {"w": _make_conv(kw, cout, cin, k), "s": s, "b": b}


def _make_arm_params(key, cin, cout):
    k1, k2, k3 = jax.random.split(key, 3)
    s, b = _make_bn(k3, cout)
    return {
        "conv": _make_conv_block_params(k1, cin, cout, 3),
        "atten_w": _make_conv(k2, cout, cout, 1),      # (Cout, Cin=Cout, 1, 1)
        "atten_s": s,
        "atten_b": b,
    }


def make_params(key, in_channels_16, in_channels_32, conv_head8_in_channels):
    keys = jax.random.split(key, 12)
    # TODO(synk): `backbone` is an external module in the PyTorch code; a small
    # synthetic conv backbone (stem + maxpool + 4 "layers") with the same
    # downsampling schedule is built here from the same Pallas ConvBlocks.
    backbone = {
        "conv1": _make_conv_block_params(keys[0], 3, 16, 3),                                # /2
        "layer1": _make_conv_block_params(keys[1], 16, 16, 3),                              # /4
        "layer2": _make_conv_block_params(keys[2], 16, conv_head8_in_channels, 3),          # /8
        "layer3": _make_conv_block_params(keys[3], conv_head8_in_channels, in_channels_16, 3),  # /16
        "layer4": _make_conv_block_params(keys[4], in_channels_16, in_channels_32, 3),      # /32
    }
    return {
        "backbone": backbone,
        "arm16": _make_arm_params(keys[5], in_channels_16, 128),
        "arm32": _make_arm_params(keys[6], in_channels_32, 128),
        "conv_gp": _make_conv_block_params(keys[7], in_channels_32, 128, 1),
        "conv_head8": _make_conv_block_params(keys[8], conv_head8_in_channels, 128, 3),
        "conv_head16": _make_conv_block_params(keys[9], 128, 128, 3),
        "conv_head32": _make_conv_block_params(keys[10], 128, 128, 3),
    }


# ----------------------------------------------------------------------------
# Module forward passes
# ----------------------------------------------------------------------------
def arm_feat_and_atten(x, p):
    """AttentionRefinementModule up to (but not including) feat * atten.

    Returns the conv feature map (bf16) and the sigmoid attention (N, C) f32.
    The multiply is fused with the downstream residual add in `arm_mul_add`.
    """
    feat = conv_block(x, p["conv"]["w"], p["conv"]["s"], p["conv"]["b"],
                      stride=1, padding=1, act="relu", out_dtype=jnp.bfloat16)
    pooled = jnp.mean(feat.astype(jnp.float32), axis=(1, 2))      # (N, C) avg pool
    C = p["atten_w"].shape[0]
    # torch 1x1 conv weight (Cout, Cin, 1, 1) -> (Cin, Cout); fold BN scale in.
    w_att = jnp.transpose(p["atten_w"].reshape(C, C), (1, 0))
    w_att = (w_att * p["atten_s"]).astype(jnp.bfloat16)
    att = matmul_bias_act(pooled.astype(jnp.bfloat16), w_att, p["atten_b"],
                          act="sigmoid", out_dtype=jnp.float32)   # (N, C)
    return feat, att


def backbone_forward(x, p):
    x = conv_block(x, p["conv1"]["w"], p["conv1"]["s"], p["conv1"]["b"],
                   stride=2, padding=1, act="relu")               # conv1+bn1+relu
    x = max_pool_3x3_s2(x)                                        # maxpool
    feat4 = conv_block(x, p["layer1"]["w"], p["layer1"]["s"], p["layer1"]["b"], 1, 1)
    feat8 = conv_block(feat4, p["layer2"]["w"], p["layer2"]["s"], p["layer2"]["b"], 2, 1)
    feat16 = conv_block(feat8, p["layer3"]["w"], p["layer3"]["s"], p["layer3"]["b"], 2, 1)
    feat32 = conv_block(feat16, p["layer4"]["w"], p["layer4"]["s"], p["layer4"]["b"], 2, 1)
    return feat4, feat8, feat16, feat32


def context_path_forward(x_nchw, params):
    # layout: NCHW (PyTorch) -> NHWC internal -> NCHW outputs
    x = jnp.transpose(x_nchw, (0, 2, 3, 1)).astype(jnp.float32)

    _, feat8, feat16, feat32 = backbone_forward(x, params["backbone"])

    feat16_conv, att16 = arm_feat_and_atten(feat16, params["arm16"])
    feat32_conv, att32 = arm_feat_and_atten(feat32, params["arm32"])

    # feat32_gp = conv_gp(avg_pool(feat32)); upsampling a 1x1 map with
    # align_corners=True is a pure broadcast over H32 x W32.
    N, H32, W32, C32 = feat32.shape
    gp = jnp.mean(feat32.astype(jnp.float32), axis=(1, 2))        # (N, C32)
    gp_w = params["conv_gp"]["w"]                                 # (128, C32, 1, 1)
    gp_w2 = jnp.transpose(gp_w, (2, 3, 1, 0)).reshape(C32, 128)
    gp_w2 = (gp_w2 * params["conv_gp"]["s"]).astype(jnp.bfloat16)
    gp_out = matmul_bias_act(gp.astype(jnp.bfloat16), gp_w2,
                             params["conv_gp"]["b"], act="relu",
                             out_dtype=jnp.float32)               # (N, 128)

    # feat32_sum = feat32_conv * att32 + broadcast(gp)   (fused Pallas kernel)
    feat32_sum = arm_mul_add(feat32_conv, att32, gp_out, out_dtype=jnp.float32)

    feat32_up = bilinear_resize_ac(feat32_sum, feat16.shape[1], feat16.shape[2])

    # feat16_sum = feat16_conv * att16 + feat32_up       (fused Pallas kernel)
    feat16_sum = arm_mul_add(feat16_conv, att16, feat32_up, out_dtype=jnp.float32)

    # NOTE: the PyTorch forward computes feat16_up = interpolate(feat16_sum)
    # but never uses it; skipped here (outputs are identical).

    feat8_out = conv_block(feat8, params["conv_head8"]["w"],
                           params["conv_head8"]["s"], params["conv_head8"]["b"],
                           1, 1, out_dtype=jnp.float32)
    feat16_out = conv_block(feat16_sum, params["conv_head16"]["w"],
                            params["conv_head16"]["s"], params["conv_head16"]["b"],
                            1, 1, out_dtype=jnp.float32)
    feat32_out = conv_block(feat32_sum, params["conv_head32"]["w"],
                            params["conv_head32"]["s"], params["conv_head32"]["b"],
                            1, 1, out_dtype=jnp.float32)

    to_nchw = lambda t: jnp.transpose(t, (0, 3, 1, 2))
    return to_nchw(feat8_out), to_nchw(feat16_out), to_nchw(feat32_out)


# ----------------------------------------------------------------------------
# Main
# ----------------------------------------------------------------------------
if __name__ == "__main__":
    key = jax.random.PRNGKey(0)
    k_param, k_x = jax.random.split(key)

    in_channels_16 = 48
    in_channels_32 = 64
    conv_head8_in_channels = 32

    params = make_params(k_param, in_channels_16, in_channels_32,
                         conv_head8_in_channels)

    # Small input: batch=2, 3 channels, 64x64 (-> feat8 8x8, feat16 4x4, feat32 2x2)
    x = jax.random.normal(k_x, (2, 3, 64, 64), jnp.float32)

    fwd = jax.jit(context_path_forward)
    feat8_out, feat16_out, feat32_out = fwd(x, params)
    jax.block_until_ready((feat8_out, feat16_out, feat32_out))

    assert feat8_out.shape == (2, 128, 8, 8)
    assert feat16_out.shape == (2, 128, 4, 4)
    assert feat32_out.shape == (2, 128, 2, 2)
    assert all(bool(jnp.isfinite(t).all()) for t in (feat8_out, feat16_out, feat32_out))

    print("KERNEL_OK")
</pallas_src>

<mosaic_0001>
module attributes {stable_mosaic.version = 11 : i64} {
  func.func @_matmul_bias_act_kernel(%arg0: i32, %arg1: memref<256x27xbf16, #tpu.memory_space<vmem>>, %arg2: memref<27x128xbf16, #tpu.memory_space<vmem>>, %arg3: memref<1x128xf32, #tpu.memory_space<vmem>>, %arg4: memref<256x128xbf16, #tpu.memory_space<vmem>>) attributes {dimension_semantics = [#tpu.dimension_semantics<parallel>], iteration_bounds = array<i64: 8>, scalar_prefetch = 0 : i64, scratch_operands = 0 : i64, tpu.core_type = #tpu.core_type<tc>, window_params = [{transform_indices = @transform_0, window_bounds = array<i64: 256, 27>}, {pipeline_mode = #tpu.pipeline_mode<synchronous>, transform_indices = @transform_1, window_bounds = array<i64: 27, 128>}, {pipeline_mode = #tpu.pipeline_mode<synchronous>, transform_indices = @transform_2, window_bounds = array<i64: 1, 128>}, {transform_indices = @transform_3, window_bounds = array<i64: 256, 128>}]} {
    %c0 = arith.constant 0 : index
    %c0_0 = arith.constant 0 : index
    %0 = vector.load %arg1[%c0, %c0_0] : memref<256x27xbf16, #tpu.memory_space<vmem>>, vector<256x27xbf16>
    %c0_1 = arith.constant 0 : index
    %c0_2 = arith.constant 0 : index
    %1 = vector.load %arg2[%c0_1, %c0_2] : memref<27x128xbf16, #tpu.memory_space<vmem>>, vector<27x128xbf16>
    %cst = arith.constant dense<0.000000e+00> : vector<256x128xf32>
    %2 = tpu.matmul %0, %1, %cst {dimension_numbers = #tpu.dot_dimension_numbers<[1], [0], [0], [1], [0, 0, 1, 1], [], []>} : vector<256x27xbf16>, vector<27x128xbf16>, vector<256x128xf32> -> vector<256x128xf32>
    %c0_3 = arith.constant 0 : index
    %c0_4 = arith.constant 0 : index
    %3 = vector.load %arg3[%c0_3, %c0_4] : memref<1x128xf32, #tpu.memory_space<vmem>>, vector<1x128xf32>
    %4 = vector.broadcast %3 : vector<1x128xf32> to vector<256x128xf32>
    %5 = arith.addf %2, %4 : vector<256x128xf32>
    %cst_5 = arith.constant 0.000000e+00 : f32
    %6 = vector.broadcast %cst_5 : f32 to vector<256x128xf32>
    %7 = arith.maximumf %5, %6 : vector<256x128xf32>
    %8 = arith.truncf %7 : vector<256x128xf32> to vector<256x128xbf16>
    %c0_6 = arith.constant 0 : index
    %c0_7 = arith.constant 0 : index
    %9 = vector.load %arg4[%c0_6, %c0_7] : memref<256x128xbf16, #tpu.memory_space<vmem>>, vector<256x128xbf16>
    tpu.vector_store %arg4[%c0_6, %c0_7], %8 {strides = array<i32>} : memref<256x128xbf16, #tpu.memory_space<vmem>>, vector<256x128xbf16>,
    return
  }
  func.func @transform_0(%arg0: i32) -> (i32, i32) {
    %c0_i32 = arith.constant 0 : i32
    %c0_i32_0 = arith.constant 0 : i32
    return %arg0, %c0_i32 : i32, i32
  }
  func.func @transform_1(%arg0: i32) -> (i32, i32) {
    %c0_i32 = arith.constant 0 : i32
    %c0_i32_0 = arith.constant 0 : i32
    %c0_i32_1 = arith.constant 0 : i32
    return %c0_i32, %c0_i32_0 : i32, i32
  }
  func.func @transform_2(%arg0: i32) -> (i32, i32) {
    %c0_i32 = arith.constant 0 : i32
    %c0_i32_0 = arith.constant 0 : i32
    %c0_i32_1 = arith.constant 0 : i32
    return %c0_i32, %c0_i32_0 : i32, i32
  }
  func.func @transform_3(%arg0: i32) -> (i32, i32) {
    %c0_i32 = arith.constant 0 : i32
    %c0_i32_0 = arith.constant 0 : i32
    return %arg0, %c0_i32 : i32, i32
  }
}

module attributes {stable_mosaic.version = 11 : i64} {
  func.func @_matmul_bias_act_kernel(%arg0: i32, %arg1: memref<256x144xbf16, #tpu.memory_space<vmem>>, %arg2: memref<144x128xbf16, #tpu.memory_space<vmem>>, %arg3: memref<1x128xf32, #tpu.memory_space<vmem>>, %arg4: memref<256x128xbf16, #tpu.memory_space<vmem>>) attributes {dimension_semantics = [#tpu.dimension_semantics<parallel>], iteration_bounds = array<i64: 2>, scalar_prefetch = 0 : i64, scratch_operands = 0 : i64, tpu.core_type = #tpu.core_type<tc>, window_params = [{transform_indices = @transform_0, window_bounds = array<i64: 256, 144>}, {pipeline_mode = #tpu.pipeline_mode<synchronous>, transform_indices = @transform_1, window_bounds = array<i64: 144, 128>}, {pipeline_mode = #tpu.pipeline_mode<synchronous>, transform_indices = @transform_2, window_bounds = array<i64: 1, 128>}, {transform_indices = @transform_3, window_bounds = array<i64: 256, 128>}]} {
    %c0 = arith.constant 0 : index
    %c0_0 = arith.constant 0 : index
    %0 = vector.load %arg1[%c0, %c0_0] : memref<256x144xbf16, #tpu.memory_space<vmem>>, vector<256x144xbf16>
    %c0_1 = arith.constant 0 : index
    %c0_2 = arith.constant 0 : index
    %1 = vector.load %arg2[%c0_1, %c0_2] : memref<144x128xbf16, #tpu.memory_space<vmem>>, vector<144x128xbf16>
    %cst = arith.constant dense<0.000000e+00> : vector<256x128xf32>
    %2 = tpu.matmul %0, %1, %cst {dimension_numbers = #tpu.dot_dimension_numbers<[1], [0], [0], [1], [0, 0, 1, 1], [], []>} : vector<256x144xbf16>, vector<144x128xbf16>, vector<256x128xf32> -> vector<256x128xf32>
    %c0_3 = arith.constant 0 : index
    %c0_4 = arith.constant 0 : index
    %3 = vector.load %arg3[%c0_3, %c0_4] : memref<1x128xf32, #tpu.memory_space<vmem>>, vector<1x128xf32>
    %4 = vector.broadcast %3 : vector<1x128xf32> to vector<256x128xf32>
    %5 = arith.addf %2, %4 : vector<256x128xf32>
    %cst_5 = arith.constant 0.000000e+00 : f32
    %6 = vector.broadcast %cst_5 : f32 to vector<256x128xf32>
    %7 = arith.maximumf %5, %6 : vector<256x128xf32>
    %8 = arith.truncf %7 : vector<256x128xf32> to vector<256x128xbf16>
    %c0_6 = arith.constant 0 : index
    %c0_7 = arith.constant 0 : index
    %9 = vector.load %arg4[%c0_6, %c0_7] : memref<256x128xbf16, #tpu.memory_space<vmem>>, vector<256x128xbf16>
    tpu.vector_store %arg4[%c0_6, %c0_7], %8 {strides = array<i32>} : memref<256x128xbf16, #tpu.memory_space<vmem>>, vector<256x128xbf16>,
    return
  }
  func.func @transform_0(%arg0: i32) -> (i32, i32) {
    %c0_i32 = arith.constant 0 : i32
    %c0_i32_0 = arith.constant 0 : i32
    return %arg0, %c0_i32 : i32, i32
  }
  func.func @transform_1(%arg0: i32) -> (i32, i32) {
    %c0_i32 = arith.constant 0 : i32
    %c0_i32_0 = arith.constant 0 : i32
    %c0_i32_1 = arith.constant 0 : i32
    return %c0_i32, %c0_i32_0 : i32, i32
  }
  func.func @transform_2(%arg0: i32) -> (i32, i32) {
    %c0_i32 = arith.constant 0 : i32
    %c0_i32_0 = arith.constant 0 : i32
    %c0_i32_1 = arith.constant 0 : i32
    return %c0_i32, %c0_i32_0 : i32, i32
  }
  func.func @transform_3(%arg0: i32) -> (i32, i32) {
    %c0_i32 = arith.constant 0 : i32
    %c0_i32_0 = arith.constant 0 : i32
    return %arg0, %c0_i32 : i32, i32
  }
}

module attributes {stable_mosaic.version = 11 : i64} {
  func.func @_matmul_bias_act_kernel(%arg0: i32, %arg1: memref<128x144xbf16, #tpu.memory_space<vmem>>, %arg2: memref<144x128xbf16, #tpu.memory_space<vmem>>, %arg3: memref<1x128xf32, #tpu.memory_space<vmem>>, %arg4: memref<128x128xbf16, #tpu.memory_space<vmem>>) attributes {dimension_semantics = [#tpu.dimension_semantics<parallel>], iteration_bounds = array<i64: 1>, scalar_prefetch = 0 : i64, scratch_operands = 0 : i64, tpu.core_type = #tpu.core_type<tc>, window_params = [{transform_indices = @transform_0, window_bounds = array<i64: 128, 144>}, {pipeline_mode = #tpu.pipeline_mode<synchronous>, transform_indices = @transform_1, window_bounds = array<i64: 144, 128>}, {pipeline_mode = #tpu.pipeline_mode<synchronous>, transform_indices = @transform_2, window_bounds = array<i64: 1, 128>}, {transform_indices = @transform_3, window_bounds = array<i64: 128, 128>}]} {
    %c0 = arith.constant 0 : index
    %c0_0 = arith.constant 0 : index
    %0 = vector.load %arg1[%c0, %c0_0] : memref<128x144xbf16, #tpu.memory_space<vmem>>, vector<128x144xbf16>
    %c0_1 = arith.constant 0 : index
    %c0_2 = arith.constant 0 : index
    %1 = vector.load %arg2[%c0_1, %c0_2] : memref<144x128xbf16, #tpu.memory_space<vmem>>, vector<144x128xbf16>
    %cst = arith.constant dense<0.000000e+00> : vector<128x128xf32>
    %2 = tpu.matmul %0, %1, %cst {dimension_numbers = #tpu.dot_dimension_numbers<[1], [0], [0], [1], [0, 0, 1, 1], [], []>} : vector<128x144xbf16>, vector<144x128xbf16>, vector<128x128xf32> -> vector<128x128xf32>
    %c0_3 = arith.constant 0 : index
    %c0_4 = arith.constant 0 : index
    %3 = vector.load %arg3[%c0_3, %c0_4] : memref<1x128xf32, #tpu.memory_space<vmem>>, vector<1x128xf32>
    %4 = vector.broadcast %3 : vector<1x128xf32> to vector<128x128xf32>
    %5 = arith.addf %2, %4 : vector<128x128xf32>
    %cst_5 = arith.constant 0.000000e+00 : f32
    %6 = vector.broadcast %cst_5 : f32 to vector<128x128xf32>
    %7 = arith.maximumf %5, %6 : vector<128x128xf32>
    %8 = arith.truncf %7 : vector<128x128xf32> to vector<128x128xbf16>
    %c0_6 = arith.constant 0 : index
    %c0_7 = arith.constant 0 : index
    %9 = vector.load %arg4[%c0_6, %c0_7] : memref<128x128xbf16, #tpu.memory_space<vmem>>, vector<128x128xbf16>
    tpu.vector_store %arg4[%c0_6, %c0_7], %8 {strides = array<i32>} : memref<128x128xbf16, #tpu.memory_space<vmem>>, vector<128x128xbf16>,
    return
  }
  func.func @transform_0(%arg0: i32) -> (i32, i32) {
    %c0_i32 = arith.constant 0 : i32
    %c0_i32_0 = arith.constant 0 : i32
    return %arg0, %c0_i32 : i32, i32
  }
  func.func @transform_1(%arg0: i32) -> (i32, i32) {
    %c0_i32 = arith.constant 0 : i32
    %c0_i32_0 = arith.constant 0 : i32
    %c0_i32_1 = arith.constant 0 : i32
    return %c0_i32, %c0_i32_0 : i32, i32
  }
  func.func @transform_2(%arg0: i32) -> (i32, i32) {
    %c0_i32 = arith.constant 0 : i32
    %c0_i32_0 = arith.constant 0 : i32
    %c0_i32_1 = arith.constant 0 : i32
    return %c0_i32, %c0_i32_0 : i32, i32
  }
  func.func @transform_3(%arg0: i32) -> (i32, i32) {
    %c0_i32 = arith.constant 0 : i32
    %c0_i32_0 = arith.constant 0 : i32
    return %arg0, %c0_i32 : i32, i32
  }
}

module attributes {stable_mosaic.version = 11 : i64} {
  func.func @_matmul_bias_act_kernel(%arg0: i32, %arg1: memref<32x288xbf16, #tpu.memory_space<vmem>>, %arg2: memref<288x128xbf16, #tpu.memory_space<vmem>>, %arg3: memref<1x128xf32, #tpu.memory_space<vmem>>, %arg4: memref<32x128xbf16, #tpu.memory_space<vmem>>) attributes {dimension_semantics = [#tpu.dimension_semantics<parallel>], iteration_bounds = array<i64: 1>, scalar_prefetch = 0 : i64, scratch_operands = 0 : i64, tpu.core_type = #tpu.core_type<tc>, window_params = [{transform_indices = @transform_0, window_bounds = array<i64: 32, 288>}, {pipeline_mode = #tpu.pipeline_mode<synchronous>, transform_indices = @transform_1, window_bounds = array<i64: 288, 128>}, {pipeline_mode = #tpu.pipeline_mode<synchronous>, transform_indices = @transform_2, window_bounds = array<i64: 1, 128>}, {transform_indices = @transform_3, window_bounds = array<i64: 32, 128>}]} {
    %c0 = arith.constant 0 : index
    %c0_0 = arith.constant 0 : index
    %0 = vector.load %arg1[%c0, %c0_0] : memref<32x288xbf16, #tpu.memory_space<vmem>>, vector<32x288xbf16>
    %c0_1 = arith.constant 0 : index
    %c0_2 = arith.constant 0 : index
    %1 = vector.load %arg2[%c0_1, %c0_2] : memref<288x128xbf16, #tpu.memory_space<vmem>>, vector<288x128xbf16>
    %cst = arith.constant dense<0.000000e+00> : vector<32x128xf32>
    %2 = tpu.matmul %0, %1, %cst {dimension_numbers = #tpu.dot_dimension_numbers<[1], [0], [0], [1], [0, 0, 1, 1], [], []>} : vector<32x288xbf16>, vector<288x128xbf16>, vector<32x128xf32> -> vector<32x128xf32>
    %c0_3 = arith.constant 0 : index
    %c0_4 = arith.constant 0 : index
    %3 = vector.load %arg3[%c0_3, %c0_4] : memref<1x128xf32, #tpu.memory_space<vmem>>, vector<1x128xf32>
    %4 = vector.broadcast %3 : vector<1x128xf32> to vector<32x128xf32>
    %5 = arith.addf %2, %4 : vector<32x128xf32>
    %cst_5 = arith.constant 0.000000e+00 : f32
    %6 = vector.broadcast %cst_5 : f32 to vector<32x128xf32>
    %7 = arith.maximumf %5, %6 : vector<32x128xf32>
    %8 = arith.truncf %7 : vector<32x128xf32> to vector<32x128xbf16>
    %c0_6 = arith.constant 0 : index
    %c0_7 = arith.constant 0 : index
    %9 = vector.load %arg4[%c0_6, %c0_7] : memref<32x128xbf16, #tpu.memory_space<vmem>>, vector<32x128xbf16>
    tpu.vector_store %arg4[%c0_6, %c0_7], %8 {strides = array<i32>} : memref<32x128xbf16, #tpu.memory_space<vmem>>, vector<32x128xbf16>,
    return
  }
  func.func @transform_0(%arg0: i32) -> (i32, i32) {
    %c0_i32 = arith.constant 0 : i32
    %c0_i32_0 = arith.constant 0 : i32
    return %arg0, %c0_i32 : i32, i32
  }
  func.func @transform_1(%arg0: i32) -> (i32, i32) {
    %c0_i32 = arith.constant 0 : i32
    %c0_i32_0 = arith.constant 0 : i32
    %c0_i32_1 = arith.constant 0 : i32
    return %c0_i32, %c0_i32_0 : i32, i32
  }
  func.func @transform_2(%arg0: i32) -> (i32, i32) {
    %c0_i32 = arith.constant 0 : i32
    %c0_i32_0 = arith.constant 0 : i32
    %c0_i32_1 = arith.constant 0 : i32
    return %c0_i32, %c0_i32_0 : i32, i32
  }
  func.func @transform_3(%arg0: i32) -> (i32, i32) {
    %c0_i32 = arith.constant 0 : i32
    %c0_i32_0 = arith.constant 0 : i32
    return %arg0, %c0_i32 : i32, i32
  }
}

module attributes {stable_mosaic.version = 11 : i64} {
  func.func @_matmul_bias_act_kernel(%arg0: i32, %arg1: memref<16x432xbf16, #tpu.memory_space<vmem>>, %arg2: memref<432x128xbf16, #tpu.memory_space<vmem>>, %arg3: memref<1x128xf32, #tpu.memory_space<vmem>>, %arg4: memref<16x128xbf16, #tpu.memory_space<vmem>>) attributes {dimension_semantics = [#tpu.dimension_semantics<parallel>], iteration_bounds = array<i64: 1>, scalar_prefetch = 0 : i64, scratch_operands = 0 : i64, tpu.core_type = #tpu.core_type<tc>, window_params = [{transform_indices = @transform_0, window_bounds = array<i64: 16, 432>}, {pipeline_mode = #tpu.pipeline_mode<synchronous>, transform_indices = @transform_1, window_bounds = array<i64: 432, 128>}, {pipeline_mode = #tpu.pipeline_mode<synchronous>, transform_indices = @transform_2, window_bounds = array<i64: 1, 128>}, {transform_indices = @transform_3, window_bounds = array<i64: 16, 128>}]} {
    %c0 = arith.constant 0 : index
    %c0_0 = arith.constant 0 : index
    %0 = vector.load %arg1[%c0, %c0_0] : memref<16x432xbf16, #tpu.memory_space<vmem>>, vector<16x432xbf16>
    %c0_1 = arith.constant 0 : index
    %c0_2 = arith.constant 0 : index
    %1 = vector.load %arg2[%c0_1, %c0_2] : memref<432x128xbf16, #tpu.memory_space<vmem>>, vector<432x128xbf16>
    %cst = arith.constant dense<0.000000e+00> : vector<16x128xf32>
    %2 = tpu.matmul %0, %1, %cst {dimension_numbers = #tpu.dot_dimension_numbers<[1], [0], [0], [1], [0, 0, 1, 1], [], []>} : vector<16x432xbf16>, vector<432x128xbf16>, vector<16x128xf32> -> vector<16x128xf32>
    %c0_3 = arith.constant 0 : index
    %c0_4 = arith.constant 0 : index
    %3 = vector.load %arg3[%c0_3, %c0_4] : memref<1x128xf32, #tpu.memory_space<vmem>>, vector<1x128xf32>
    %4 = vector.broadcast %3 : vector<1x128xf32> to vector<16x128xf32>
    %5 = arith.addf %2, %4 : vector<16x128xf32>
    %cst_5 = arith.constant 0.000000e+00 : f32
    %6 = vector.broadcast %cst_5 : f32 to vector<16x128xf32>
    %7 = arith.maximumf %5, %6 : vector<16x128xf32>
    %8 = arith.truncf %7 : vector<16x128xf32> to vector<16x128xbf16>
    %c0_6 = arith.constant 0 : index
    %c0_7 = arith.constant 0 : index
    %9 = vector.load %arg4[%c0_6, %c0_7] : memref<16x128xbf16, #tpu.memory_space<vmem>>, vector<16x128xbf16>
    tpu.vector_store %arg4[%c0_6, %c0_7], %8 {strides = array<i32>} : memref<16x128xbf16, #tpu.memory_space<vmem>>, vector<16x128xbf16>,
    return
  }
  func.func @transform_0(%arg0: i32) -> (i32, i32) {
    %c0_i32 = arith.constant 0 : i32
    %c0_i32_0 = arith.constant 0 : i32
    return %arg0, %c0_i32 : i32, i32
  }
  func.func @transform_1(%arg0: i32) -> (i32, i32) {
    %c0_i32 = arith.constant 0 : i32
    %c0_i32_0 = arith.constant 0 : i32
    %c0_i32_1 = arith.constant 0 : i32
    return %c0_i32, %c0_i32_0 : i32, i32
  }
  func.func @transform_2(%arg0: i32) -> (i32, i32) {
    %c0_i32 = arith.constant 0 : i32
    %c0_i32_0 = arith.constant 0 : i32
    %c0_i32_1 = arith.constant 0 : i32
    return %c0_i32, %c0_i32_0 : i32, i32
  }
  func.func @transform_3(%arg0: i32) -> (i32, i32) {
    %c0_i32 = arith.constant 0 : i32
    %c0_i32_0 = arith.constant 0 : i32
    return %arg0, %c0_i32 : i32, i32
  }
}

module attributes {stable_mosaic.version = 11 : i64} {
  func.func @_matmul_bias_act_kernel(%arg0: i32, %arg1: memref<16x576xbf16, #tpu.memory_space<vmem>>, %arg2: memref<576x128xbf16, #tpu.memory_space<vmem>>, %arg3: memref<1x128xf32, #tpu.memory_space<vmem>>, %arg4: memref<16x128xbf16, #tpu.memory_space<vmem>>) attributes {dimension_semantics = [#tpu.dimension_semantics<parallel>], iteration_bounds = array<i64: 1>, scalar_prefetch = 0 : i64, scratch_operands = 0 : i64, tpu.core_type = #tpu.core_type<tc>, window_params = [{transform_indices = @transform_0, window_bounds = array<i64: 16, 576>}, {pipeline_mode = #tpu.pipeline_mode<synchronous>, transform_indices = @transform_1, window_bounds = array<i64: 576, 128>}, {pipeline_mode = #tpu.pipeline_mode<synchronous>, transform_indices = @transform_2, window_bounds = array<i64: 1, 128>}, {transform_indices = @transform_3, window_bounds = array<i64: 16, 128>}]} {
    %c0 = arith.constant 0 : index
    %c0_0 = arith.constant 0 : index
    %0 = vector.load %arg1[%c0, %c0_0] : memref<16x576xbf16, #tpu.memory_space<vmem>>, vector<16x576xbf16>
    %c0_1 = arith.constant 0 : index
    %c0_2 = arith.constant 0 : index
    %1 = vector.load %arg2[%c0_1, %c0_2] : memref<576x128xbf16, #tpu.memory_space<vmem>>, vector<576x128xbf16>
    %cst = arith.constant dense<0.000000e+00> : vector<16x128xf32>
    %2 = tpu.matmul %0, %1, %cst {dimension_numbers = #tpu.dot_dimension_numbers<[1], [0], [0], [1], [0, 0, 1, 1], [], []>} : vector<16x576xbf16>, vector<576x128xbf16>, vector<16x128xf32> -> vector<16x128xf32>
    %c0_3 = arith.constant 0 : index
    %c0_4 = arith.constant 0 : index
    %3 = vector.load %arg3[%c0_3, %c0_4] : memref<1x128xf32, #tpu.memory_space<vmem>>, vector<1x128xf32>
    %4 = vector.broadcast %3 : vector<1x128xf32> to vector<16x128xf32>
    %5 = arith.addf %2, %4 : vector<16x128xf32>
    %cst_5 = arith.constant 0.000000e+00 : f32
    %6 = vector.broadcast %cst_5 : f32 to vector<16x128xf32>
    %7 = arith.maximumf %5, %6 : vector<16x128xf32>
    %8 = arith.truncf %7 : vector<16x128xf32> to vector<16x128xbf16>
    %c0_6 = arith.constant 0 : index
    %c0_7 = arith.constant 0 : index
    %9 = vector.load %arg4[%c0_6, %c0_7] : memref<16x128xbf16, #tpu.memory_space<vmem>>, vector<16x128xbf16>
    tpu.vector_store %arg4[%c0_6, %c0_7], %8 {strides = array<i32>} : memref<16x128xbf16, #tpu.memory_space<vmem>>, vector<16x128xbf16>,
    return
  }
  func.func @transform_0(%arg0: i32) -> (i32, i32) {
    %c0_i32 = arith.constant 0 : i32
    %c0_i32_0 = arith.constant 0 : i32
    return %arg0, %c0_i32 : i32, i32
  }
  func.func @transform_1(%arg0: i32) -> (i32, i32) {
    %c0_i32 = arith.constant 0 : i32
    %c0_i32_0 = arith.constant 0 : i32
    %c0_i32_1 = arith.constant 0 : i32
    return %c0_i32, %c0_i32_0 : i32, i32
  }
  func.func @transform_2(%arg0: i32) -> (i32, i32) {
    %c0_i32 = arith.constant 0 : i32
    %c0_i32_0 = arith.constant 0 : i32
    %c0_i32_1 = arith.constant 0 : i32
    return %c0_i32, %c0_i32_0 : i32, i32
  }
  func.func @transform_3(%arg0: i32) -> (i32, i32) {
    %c0_i32 = arith.constant 0 : i32
    %c0_i32_0 = arith.constant 0 : i32
    return %arg0, %c0_i32 : i32, i32
  }
}

module attributes {stable_mosaic.version = 11 : i64} {
  func.func @_matmul_bias_act_kernel(%arg0: i32, %arg1: memref<16x64xbf16, #tpu.memory_space<vmem>>, %arg2: memref<64x128xbf16, #tpu.memory_space<vmem>>, %arg3: memref<1x128xf32, #tpu.memory_space<vmem>>, %arg4: memref<16x128xf32, #tpu.memory_space<vmem>>) attributes {dimension_semantics = [#tpu.dimension_semantics<parallel>], iteration_bounds = array<i64: 1>, scalar_prefetch = 0 : i64, scratch_operands = 0 : i64, tpu.core_type = #tpu.core_type<tc>, window_params = [{transform_indices = @transform_0, window_bounds = array<i64: 16, 64>}, {pipeline_mode = #tpu.pipeline_mode<synchronous>, transform_indices = @transform_1, window_bounds = array<i64: 64, 128>}, {pipeline_mode = #tpu.pipeline_mode<synchronous>, transform_indices = @transform_2, window_bounds = array<i64: 1, 128>}, {transform_indices = @transform_3, window_bounds = array<i64: 16, 128>}]} {
    %c0 = arith.constant 0 : index
    %c0_0 = arith.constant 0 : index
    %0 = vector.load %arg1[%c0, %c0_0] : memref<16x64xbf16, #tpu.memory_space<vmem>>, vector<16x64xbf16>
    %c0_1 = arith.constant 0 : index
    %c0_2 = arith.constant 0 : index
    %1 = vector.load %arg2[%c0_1, %c0_2] : memref<64x128xbf16, #tpu.memory_space<vmem>>, vector<64x128xbf16>
    %cst = arith.constant dense<0.000000e+00> : vector<16x128xf32>
    %2 = tpu.matmul %0, %1, %cst {dimension_numbers = #tpu.dot_dimension_numbers<[1], [0], [0], [1], [0, 0, 1, 1], [], []>} : vector<16x64xbf16>, vector<64x128xbf16>, vector<16x128xf32> -> vector<16x128xf32>
    %c0_3 = arith.constant 0 : index
    %c0_4 = arith.constant 0 : index
    %3 = vector.load %arg3[%c0_3, %c0_4] : memref<1x128xf32, #tpu.memory_space<vmem>>, vector<1x128xf32>
    %4 = vector.broadcast %3 : vector<1x128xf32> to vector<16x128xf32>
    %5 = arith.addf %2, %4 : vector<16x128xf32>
    %cst_5 = arith.constant 0.000000e+00 : f32
    %6 = vector.broadcast %cst_5 : f32 to vector<16x128xf32>
    %7 = arith.maximumf %5, %6 : vector<16x128xf32>
    %c0_6 = arith.constant 0 : index
    %c0_7 = arith.constant 0 : index
    %8 = vector.load %arg4[%c0_6, %c0_7] : memref<16x128xf32, #tpu.memory_space<vmem>>, vector<16x128xf32>
    tpu.vector_store %arg4[%c0_6, %c0_7], %7 {strides = array<i32>} : memref<16x128xf32, #tpu.memory_space<vmem>>, vector<16x128xf32>,
    return
  }
  func.func @transform_0(%arg0: i32) -> (i32, i32) {
    %c0_i32 = arith.constant 0 : i32
    %c0_i32_0 = arith.constant 0 : i32
    return %arg0, %c0_i32 : i32, i32
  }
  func.func @transform_1(%arg0: i32) -> (i32, i32) {
    %c0_i32 = arith.constant 0 : i32
    %c0_i32_0 = arith.constant 0 : i32
    %c0_i32_1 = arith.constant 0 : i32
    return %c0_i32, %c0_i32_0 : i32, i32
  }
  func.func @transform_2(%arg0: i32) -> (i32, i32) {
    %c0_i32 = arith.constant 0 : i32
    %c0_i32_0 = arith.constant 0 : i32
    %c0_i32_1 = arith.constant 0 : i32
    return %c0_i32, %c0_i32_0 : i32, i32
  }
  func.func @transform_3(%arg0: i32) -> (i32, i32) {
    %c0_i32 = arith.constant 0 : i32
    %c0_i32_0 = arith.constant 0 : i32
    return %arg0, %c0_i32 : i32, i32
  }
}

module attributes {stable_mosaic.version = 11 : i64} {
  func.func @_matmul_bias_act_kernel(%arg0: i32, %arg1: memref<16x128xbf16, #tpu.memory_space<vmem>>, %arg2: memref<128x128xbf16, #tpu.memory_space<vmem>>, %arg3: memref<1x128xf32, #tpu.memory_space<vmem>>, %arg4: memref<16x128xf32, #tpu.memory_space<vmem>>) attributes {dimension_semantics = [#tpu.dimension_semantics<parallel>], iteration_bounds = array<i64: 1>, scalar_prefetch = 0 : i64, scratch_operands = 0 : i64, tpu.core_type = #tpu.core_type<tc>, window_params = [{transform_indices = @transform_0, window_bounds = array<i64: 16, 128>}, {pipeline_mode = #tpu.pipeline_mode<synchronous>, transform_indices = @transform_1, window_bounds = array<i64: 128, 128>}, {pipeline_mode = #tpu.pipeline_mode<synchronous>, transform_indices = @transform_2, window_bounds = array<i64: 1, 128>}, {transform_indices = @transform_3, window_bounds = array<i64: 16, 128>}]} {
    %c0 = arith.constant 0 : index
    %c0_0 = arith.constant 0 : index
    %0 = vector.load %arg1[%c0, %c0_0] : memref<16x128xbf16, #tpu.memory_space<vmem>>, vector<16x128xbf16>
    %c0_1 = arith.constant 0 : index
    %c0_2 = arith.constant 0 : index
    %1 = vector.load %arg2[%c0_1, %c0_2] : memref<128x128xbf16, #tpu.memory_space<vmem>>, vector<128x128xbf16>
    %cst = arith.constant dense<0.000000e+00> : vector<16x128xf32>
    %2 = tpu.matmul %0, %1, %cst {dimension_numbers = #tpu.dot_dimension_numbers<[1], [0], [0], [1], [0, 0, 1, 1], [], []>} : vector<16x128xbf16>, vector<128x128xbf16>, vector<16x128xf32> -> vector<16x128xf32>
    %c0_3 = arith.constant 0 : index
    %c0_4 = arith.constant 0 : index
    %3 = vector.load %arg3[%c0_3, %c0_4] : memref<1x128xf32, #tpu.memory_space<vmem>>, vector<1x128xf32>
    %4 = vector.broadcast %3 : vector<1x128xf32> to vector<16x128xf32>
    %5 = arith.addf %2, %4 : vector<16x128xf32>
    %6 = arith.negf %5 : vector<16x128xf32>
    %7 = math.exp %6 : vector<16x128xf32>
    %cst_5 = arith.constant 1.000000e+00 : f32
    %8 = vector.broadcast %cst_5 : f32 to vector<16x128xf32>
    %9 = arith.addf %8, %7 : vector<16x128xf32>
    %10 = arith.divf %8, %9 : vector<16x128xf32>
    %c0_6 = arith.constant 0 : index
    %c0_7 = arith.constant 0 : index
    %11 = vector.load %arg4[%c0_6, %c0_7] : memref<16x128xf32, #tpu.memory_space<vmem>>, vector<16x128xf32>
    tpu.vector_store %arg4[%c0_6, %c0_7], %10 {strides = array<i32>} : memref<16x128xf32, #tpu.memory_space<vmem>>, vector<16x128xf32>,
    return
  }
  func.func @transform_0(%arg0: i32) -> (i32, i32) {
    %c0_i32 = arith.constant 0 : i32
    %c0_i32_0 = arith.constant 0 : i32
    return %arg0, %c0_i32 : i32, i32
  }
  func.func @transform_1(%arg0: i32) -> (i32, i32) {
    %c0_i32 = arith.constant 0 : i32
    %c0_i32_0 = arith.constant 0 : i32
    %c0_i32_1 = arith.constant 0 : i32
    return %c0_i32, %c0_i32_0 : i32, i32
  }
  func.func @transform_2(%arg0: i32) -> (i32, i32) {
    %c0_i32 = arith.constant 0 : i32
    %c0_i32_0 = arith.constant 0 : i32
    %c0_i32_1 = arith.constant 0 : i32
    return %c0_i32, %c0_i32_0 : i32, i32
  }
  func.func @transform_3(%arg0: i32) -> (i32, i32) {
    %c0_i32 = arith.constant 0 : i32
    %c0_i32_0 = arith.constant 0 : i32
    return %arg0, %c0_i32 : i32, i32
  }
}

module attributes {stable_mosaic.version = 11 : i64} {
  func.func @_mul_add_kernel(%arg0: i32, %arg1: i32, %arg2: memref<1x16x128xbf16, #tpu.memory_space<vmem>>, %arg3: memref<1x1x128xf32, #tpu.memory_space<vmem>>, %arg4: memref<1x1x128xf32, #tpu.memory_space<vmem>>, %arg5: memref<1x16x128xf32, #tpu.memory_space<vmem>>) attributes {dimension_semantics = [#tpu.dimension_semantics<parallel>, #tpu.dimension_semantics<parallel>], iteration_bounds = array<i64: 2, 1>, scalar_prefetch = 0 : i64, scratch_operands = 0 : i64, tpu.core_type = #tpu.core_type<tc>, window_params = [{transform_indices = @transform_0, window_bounds = array<i64: 1, 16, 128>}, {transform_indices = @transform_1, window_bounds = array<i64: 1, 1, 128>}, {transform_indices = @transform_2, window_bounds = array<i64: 1, 1, 128>}, {transform_indices = @transform_3, window_bounds = array<i64: 1, 16, 128>}]} {
    %c0 = arith.constant 0 : index
    %c0_0 = arith.constant 0 : index
    %c0_1 = arith.constant 0 : index
    %0 = vector.load %arg2[%c0, %c0_0, %c0_1] : memref<1x16x128xbf16, #tpu.memory_space<vmem>>, vector<1x16x128xbf16>
    %1 = arith.extf %0 : vector<1x16x128xbf16> to vector<1x16x128xf32>
    %c0_2 = arith.constant 0 : index
    %c0_3 = arith.constant 0 : index
    %c0_4 = arith.constant 0 : index
    %2 = vector.load %arg3[%c0_2, %c0_3, %c0_4] : memref<1x1x128xf32, #tpu.memory_space<vmem>>, vector<1x1x128xf32>
    %c0_5 = arith.constant 0 : index
    %c0_6 = arith.constant 0 : index
    %c0_7 = arith.constant 0 : index
    %3 = vector.load %arg4[%c0_5, %c0_6, %c0_7] : memref<1x1x128xf32, #tpu.memory_space<vmem>>, vector<1x1x128xf32>
    %4 = vector.broadcast %2 : vector<1x1x128xf32> to vector<1x16x128xf32>
    %5 = arith.mulf %1, %4 : vector<1x16x128xf32>
    %6 = vector.broadcast %3 : vector<1x1x128xf32> to vector<1x16x128xf32>
    %7 = arith.addf %5, %6 : vector<1x16x128xf32>
    %c0_8 = arith.constant 0 : index
    %c0_9 = arith.constant 0 : index
    %c0_10 = arith.constant 0 : index
    %8 = vector.load %arg5[%c0_8, %c0_9, %c0_10] : memref<1x16x128xf32, #tpu.memory_space<vmem>>, vector<1x16x128xf32>
    tpu.vector_store %arg5[%c0_8, %c0_9, %c0_10], %7 {strides = array<i32>} : memref<1x16x128xf32, #tpu.memory_space<vmem>>, vector<1x16x128xf32>,
    return
  }
  func.func @transform_0(%arg0: i32, %arg1: i32) -> (i32, i32, i32) {
    %c0_i32 = arith.constant 0 : i32
    %c0_i32_0 = arith.constant 0 : i32
    return %arg0, %arg1, %c0_i32 : i32, i32, i32
  }
  func.func @transform_1(%arg0: i32, %arg1: i32) -> (i32, i32, i32) {
    %c0_i32 = arith.constant 0 : i32
    %c0_i32_0 = arith.constant 0 : i32
    %c0_i32_1 = arith.constant 0 : i32
    return %arg0, %c0_i32, %c0_i32_0 : i32, i32, i32
  }
  func.func @transform_2(%arg0: i32, %arg1: i32) -> (i32, i32, i32) {
    %c0_i32 = arith.constant 0 : i32
    %c0_i32_0 = arith.constant 0 : i32
    %c0_i32_1 = arith.constant 0 : i32
    return %arg0, %c0_i32, %c0_i32_0 : i32, i32, i32
  }
  func.func @transform_3(%arg0: i32, %arg1: i32) -> (i32, i32, i32) {
    %c0_i32 = arith.constant 0 : i32
    %c0_i32_0 = arith.constant 0 : i32
    return %arg0, %arg1, %c0_i32 : i32, i32, i32
  }
}

module attributes {stable_mosaic.version = 11 : i64} {
  func.func @_matmul_bias_act_kernel(%arg0: i32, %arg1: memref<16x1152xbf16, #tpu.memory_space<vmem>>, %arg2: memref<1152x128xbf16, #tpu.memory_space<vmem>>, %arg3: memref<1x128xf32, #tpu.memory_space<vmem>>, %arg4: memref<16x128xf32, #tpu.memory_space<vmem>>) attributes {dimension_semantics = [#tpu.dimension_semantics<parallel>], iteration_bounds = array<i64: 1>, scalar_prefetch = 0 : i64, scratch_operands = 0 : i64, tpu.core_type = #tpu.core_type<tc>, window_params = [{transform_indices = @transform_0, window_bounds = array<i64: 16, 1152>}, {pipeline_mode = #tpu.pipeline_mode<synchronous>, transform_indices = @transform_1, window_bounds = array<i64: 1152, 128>}, {pipeline_mode = #tpu.pipeline_mode<synchronous>, transform_indices = @transform_2, window_bounds = array<i64: 1, 128>}, {transform_indices = @transform_3, window_bounds = array<i64: 16, 128>}]} {
    %c0 = arith.constant 0 : index
    %c0_0 = arith.constant 0 : index
    %0 = vector.load %arg1[%c0, %c0_0] : memref<16x1152xbf16, #tpu.memory_space<vmem>>, vector<16x1152xbf16>
    %c0_1 = arith.constant 0 : index
    %c0_2 = arith.constant 0 : index
    %1 = vector.load %arg2[%c0_1, %c0_2] : memref<1152x128xbf16, #tpu.memory_space<vmem>>, vector<1152x128xbf16>
    %cst = arith.constant dense<0.000000e+00> : vector<16x128xf32>
    %2 = tpu.matmul %0, %1, %cst {dimension_numbers = #tpu.dot_dimension_numbers<[1], [0], [0], [1], [0, 0, 1, 1], [], []>} : vector<16x1152xbf16>, vector<1152x128xbf16>, vector<16x128xf32> -> vector<16x128xf32>
    %c0_3 = arith.constant 0 : index
    %c0_4 = arith.constant 0 : index
    %3 = vector.load %arg3[%c0_3, %c0_4] : memref<1x128xf32, #tpu.memory_space<vmem>>, vector<1x128xf32>
    %4 = vector.broadcast %3 : vector<1x128xf32> to vector<16x128xf32>
    %5 = arith.addf %2, %4 : vector<16x128xf32>
    %cst_5 = arith.constant 0.000000e+00 : f32
    %6 = vector.broadcast %cst_5 : f32 to vector<16x128xf32>
    %7 = arith.maximumf %5, %6 : vector<16x128xf32>
    %c0_6 = arith.constant 0 : index
    %c0_7 = arith.constant 0 : index
    %8 = vector.load %arg4[%c0_6, %c0_7] : memref<16x128xf32, #tpu.memory_space<vmem>>, vector<16x128xf32>
    tpu.vector_store %arg4[%c0_6, %c0_7], %7 {strides = array<i32>} : memref<16x128xf32, #tpu.memory_space<vmem>>, vector<16x128xf32>,
    return
  }
  func.func @transform_0(%arg0: i32) -> (i32, i32) {
    %c0_i32 = arith.constant 0 : i32
    %c0_i32_0 = arith.constant 0 : i32
    return %arg0, %c0_i32 : i32, i32
  }
  func.func @transform_1(%arg0: i32) -> (i32, i32) {
    %c0_i32 = arith.constant 0 : i32
    %c0_i32_0 = arith.constant 0 : i32
    %c0_i32_1 = arith.constant 0 : i32
    return %c0_i32, %c0_i32_0 : i32, i32
  }
  func.func @transform_2(%arg0: i32) -> (i32, i32) {
    %c0_i32 = arith.constant 0 : i32
    %c0_i32_0 = arith.constant 0 : i32
    %c0_i32_1 = arith.constant 0 : i32
    return %c0_i32, %c0_i32_0 : i32, i32
  }
  func.func @transform_3(%arg0: i32) -> (i32, i32) {
    %c0_i32 = arith.constant 0 : i32
    %c0_i32_0 = arith.constant 0 : i32
    return %arg0, %c0_i32 : i32, i32
  }
}

module attributes {stable_mosaic.version = 11 : i64} {
  func.func @_matmul_bias_act_kernel(%arg0: i32, %arg1: memref<32x432xbf16, #tpu.memory_space<vmem>>, %arg2: memref<432x128xbf16, #tpu.memory_space<vmem>>, %arg3: memref<1x128xf32, #tpu.memory_space<vmem>>, %arg4: memref<32x128xbf16, #tpu.memory_space<vmem>>) attributes {dimension_semantics = [#tpu.dimension_semantics<parallel>], iteration_bounds = array<i64: 1>, scalar_prefetch = 0 : i64, scratch_operands = 0 : i64, tpu.core_type = #tpu.core_type<tc>, window_params = [{transform_indices = @transform_0, window_bounds = array<i64: 32, 432>}, {pipeline_mode = #tpu.pipeline_mode<synchronous>, transform_indices = @transform_1, window_bounds = array<i64: 432, 128>}, {pipeline_mode = #tpu.pipeline_mode<synchronous>, transform_indices = @transform_2, window_bounds = array<i64: 1, 128>}, {transform_indices = @transform_3, window_bounds = array<i64: 32, 128>}]} {
    %c0 = arith.constant 0 : index
    %c0_0 = arith.constant 0 : index
    %0 = vector.load %arg1[%c0, %c0_0] : memref<32x432xbf16, #tpu.memory_space<vmem>>, vector<32x432xbf16>
    %c0_1 = arith.constant 0 : index
    %c0_2 = arith.constant 0 : index
    %1 = vector.load %arg2[%c0_1, %c0_2] : memref<432x128xbf16, #tpu.memory_space<vmem>>, vector<432x128xbf16>
    %cst = arith.constant dense<0.000000e+00> : vector<32x128xf32>
    %2 = tpu.matmul %0, %1, %cst {dimension_numbers = #tpu.dot_dimension_numbers<[1], [0], [0], [1], [0, 0, 1, 1], [], []>} : vector<32x432xbf16>, vector<432x128xbf16>, vector<32x128xf32> -> vector<32x128xf32>
    %c0_3 = arith.constant 0 : index
    %c0_4 = arith.constant 0 : index
    %3 = vector.load %arg3[%c0_3, %c0_4] : memref<1x128xf32, #tpu.memory_space<vmem>>, vector<1x128xf32>
    %4 = vector.broadcast %3 : vector<1x128xf32> to vector<32x128xf32>
    %5 = arith.addf %2, %4 : vector<32x128xf32>
    %cst_5 = arith.constant 0.000000e+00 : f32
    %6 = vector.broadcast %cst_5 : f32 to vector<32x128xf32>
    %7 = arith.maximumf %5, %6 : vector<32x128xf32>
    %8 = arith.truncf %7 : vector<32x128xf32> to vector<32x128xbf16>
    %c0_6 = arith.constant 0 : index
    %c0_7 = arith.constant 0 : index
    %9 = vector.load %arg4[%c0_6, %c0_7] : memref<32x128xbf16, #tpu.memory_space<vmem>>, vector<32x128xbf16>
    tpu.vector_store %arg4[%c0_6, %c0_7], %8 {strides = array<i32>} : memref<32x128xbf16, #tpu.memory_space<vmem>>, vector<32x128xbf16>,
    return
  }
  func.func @transform_0(%arg0: i32) -> (i32, i32) {
    %c0_i32 = arith.constant 0 : i32
    %c0_i32_0 = arith.constant 0 : i32
    return %arg0, %c0_i32 : i32, i32
  }
  func.func @transform_1(%arg0: i32) -> (i32, i32) {
    %c0_i32 = arith.constant 0 : i32
    %c0_i32_0 = arith.constant 0 : i32
    %c0_i32_1 = arith.constant 0 : i32
    return %c0_i32, %c0_i32_0 : i32, i32
  }
  func.func @transform_2(%arg0: i32) -> (i32, i32) {
    %c0_i32 = arith.constant 0 : i32
    %c0_i32_0 = arith.constant 0 : i32
    %c0_i32_1 = arith.constant 0 : i32
    return %c0_i32, %c0_i32_0 : i32, i32
  }
  func.func @transform_3(%arg0: i32) -> (i32, i32) {
    %c0_i32 = arith.constant 0 : i32
    %c0_i32_0 = arith.constant 0 : i32
    return %arg0, %c0_i32 : i32, i32
  }
}

module attributes {stable_mosaic.version = 11 : i64} {
  func.func @_mul_add_kernel(%arg0: i32, %arg1: i32, %arg2: memref<1x16x128xbf16, #tpu.memory_space<vmem>>, %arg3: memref<1x1x128xf32, #tpu.memory_space<vmem>>, %arg4: memref<1x16x128xf32, #tpu.memory_space<vmem>>, %arg5: memref<1x16x128xf32, #tpu.memory_space<vmem>>) attributes {dimension_semantics = [#tpu.dimension_semantics<parallel>, #tpu.dimension_semantics<parallel>], iteration_bounds = array<i64: 2, 1>, scalar_prefetch = 0 : i64, scratch_operands = 0 : i64, tpu.core_type = #tpu.core_type<tc>, window_params = [{transform_indices = @transform_0, window_bounds = array<i64: 1, 16, 128>}, {transform_indices = @transform_1, window_bounds = array<i64: 1, 1, 128>}, {transform_indices = @transform_2, window_bounds = array<i64: 1, 16, 128>}, {transform_indices = @transform_3, window_bounds = array<i64: 1, 16, 128>}]} {
    %c0 = arith.constant 0 : index
    %c0_0 = arith.constant 0 : index
    %c0_1 = arith.constant 0 : index
    %0 = vector.load %arg2[%c0, %c0_0, %c0_1] : memref<1x16x128xbf16, #tpu.memory_space<vmem>>, vector<1x16x128xbf16>
    %1 = arith.extf %0 : vector<1x16x128xbf16> to vector<1x16x128xf32>
    %c0_2 = arith.constant 0 : index
    %c0_3 = arith.constant 0 : index
    %c0_4 = arith.constant 0 : index
    %2 = vector.load %arg3[%c0_2, %c0_3, %c0_4] : memref<1x1x128xf32, #tpu.memory_space<vmem>>, vector<1x1x128xf32>
    %c0_5 = arith.constant 0 : index
    %c0_6 = arith.constant 0 : index
    %c0_7 = arith.constant 0 : index
    %3 = vector.load %arg4[%c0_5, %c0_6, %c0_7] : memref<1x16x128xf32, #tpu.memory_space<vmem>>, vector<1x16x128xf32>
    %4 = vector.broadcast %2 : vector<1x1x128xf32> to vector<1x16x128xf32>
    %5 = arith.mulf %1, %4 : vector<1x16x128xf32>
    %6 = arith.addf %5, %3 : vector<1x16x128xf32>
    %c0_8 = arith.constant 0 : index
    %c0_9 = arith.constant 0 : index
    %c0_10 = arith.constant 0 : index
    %7 = vector.load %arg5[%c0_8, %c0_9, %c0_10] : memref<1x16x128xf32, #tpu.memory_space<vmem>>, vector<1x16x128xf32>
    tpu.vector_store %arg5[%c0_8, %c0_9, %c0_10], %6 {strides = array<i32>} : memref<1x16x128xf32, #tpu.memory_space<vmem>>, vector<1x16x128xf32>,
    return
  }
  func.func @transform_0(%arg0: i32, %arg1: i32) -> (i32, i32, i32) {
    %c0_i32 = arith.constant 0 : i32
    %c0_i32_0 = arith.constant 0 : i32
    return %arg0, %arg1, %c0_i32 : i32, i32, i32
  }
  func.func @transform_1(%arg0: i32, %arg1: i32) -> (i32, i32, i32) {
    %c0_i32 = arith.constant 0 : i32
    %c0_i32_0 = arith.constant 0 : i32
    %c0_i32_1 = arith.constant 0 : i32
    return %arg0, %c0_i32, %c0_i32_0 : i32, i32, i32
  }
  func.func @transform_2(%arg0: i32, %arg1: i32) -> (i32, i32, i32) {
    %c0_i32 = arith.constant 0 : i32
    %c0_i32_0 = arith.constant 0 : i32
    return %arg0, %arg1, %c0_i32 : i32, i32, i32
  }
  func.func @transform_3(%arg0: i32, %arg1: i32) -> (i32, i32, i32) {
    %c0_i32 = arith.constant 0 : i32
    %c0_i32_0 = arith.constant 0 : i32
    return %arg0, %arg1, %c0_i32 : i32, i32, i32
  }
}

module attributes {stable_mosaic.version = 11 : i64} {
  func.func @_matmul_bias_act_kernel(%arg0: i32, %arg1: memref<32x1152xbf16, #tpu.memory_space<vmem>>, %arg2: memref<1152x128xbf16, #tpu.memory_space<vmem>>, %arg3: memref<1x128xf32, #tpu.memory_space<vmem>>, %arg4: memref<32x128xf32, #tpu.memory_space<vmem>>) attributes {dimension_semantics = [#tpu.dimension_semantics<parallel>], iteration_bounds = array<i64: 1>, scalar_prefetch = 0 : i64, scratch_operands = 0 : i64, tpu.core_type = #tpu.core_type<tc>, window_params = [{transform_indices = @transform_0, window_bounds = array<i64: 32, 1152>}, {pipeline_mode = #tpu.pipeline_mode<synchronous>, transform_indices = @transform_1, window_bounds = array<i64: 1152, 128>}, {pipeline_mode = #tpu.pipeline_mode<synchronous>, transform_indices = @transform_2, window_bounds = array<i64: 1, 128>}, {transform_indices = @transform_3, window_bounds = array<i64: 32, 128>}]} {
    %c0 = arith.constant 0 : index
    %c0_0 = arith.constant 0 : index
    %0 = vector.load %arg1[%c0, %c0_0] : memref<32x1152xbf16, #tpu.memory_space<vmem>>, vector<32x1152xbf16>
    %c0_1 = arith.constant 0 : index
    %c0_2 = arith.constant 0 : index
    %1 = vector.load %arg2[%c0_1, %c0_2] : memref<1152x128xbf16, #tpu.memory_space<vmem>>, vector<1152x128xbf16>
    %cst = arith.constant dense<0.000000e+00> : vector<32x128xf32>
    %2 = tpu.matmul %0, %1, %cst {dimension_numbers = #tpu.dot_dimension_numbers<[1], [0], [0], [1], [0, 0, 1, 1], [], []>} : vector<32x1152xbf16>, vector<1152x128xbf16>, vector<32x128xf32> -> vector<32x128xf32>
    %c0_3 = arith.constant 0 : index
    %c0_4 = arith.constant 0 : index
    %3 = vector.load %arg3[%c0_3, %c0_4] : memref<1x128xf32, #tpu.memory_space<vmem>>, vector<1x128xf32>
    %4 = vector.broadcast %3 : vector<1x128xf32> to vector<32x128xf32>
    %5 = arith.addf %2, %4 : vector<32x128xf32>
    %cst_5 = arith.constant 0.000000e+00 : f32
    %6 = vector.broadcast %cst_5 : f32 to vector<32x128xf32>
    %7 = arith.maximumf %5, %6 : vector<32x128xf32>
    %c0_6 = arith.constant 0 : index
    %c0_7 = arith.constant 0 : index
    %8 = vector.load %arg4[%c0_6, %c0_7] : memref<32x128xf32, #tpu.memory_space<vmem>>, vector<32x128xf32>
    tpu.vector_store %arg4[%c0_6, %c0_7], %7 {strides = array<i32>} : memref<32x128xf32, #tpu.memory_space<vmem>>, vector<32x128xf32>,
    return
  }
  func.func @transform_0(%arg0: i32) -> (i32, i32) {
    %c0_i32 = arith.constant 0 : i32
    %c0_i32_0 = arith.constant 0 : i32
    return %arg0, %c0_i32 : i32, i32
  }
  func.func @transform_1(%arg0: i32) -> (i32, i32) {
    %c0_i32 = arith.constant 0 : i32
    %c0_i32_0 = arith.constant 0 : i32
    %c0_i32_1 = arith.constant 0 : i32
    return %c0_i32, %c0_i32_0 : i32, i32
  }
  func.func @transform_2(%arg0: i32) -> (i32, i32) {
    %c0_i32 = arith.constant 0 : i32
    %c0_i32_0 = arith.constant 0 : i32
    %c0_i32_1 = arith.constant 0 : i32
    return %c0_i32, %c0_i32_0 : i32, i32
  }
  func.func @transform_3(%arg0: i32) -> (i32, i32) {
    %c0_i32 = arith.constant 0 : i32
    %c0_i32_0 = arith.constant 0 : i32
    return %arg0, %c0_i32 : i32, i32
  }
}

module attributes {stable_mosaic.version = 11 : i64} {
  func.func @_matmul_bias_act_kernel(%arg0: i32, %arg1: memref<128x288xbf16, #tpu.memory_space<vmem>>, %arg2: memref<288x128xbf16, #tpu.memory_space<vmem>>, %arg3: memref<1x128xf32, #tpu.memory_space<vmem>>, %arg4: memref<128x128xf32, #tpu.memory_space<vmem>>) attributes {dimension_semantics = [#tpu.dimension_semantics<parallel>], iteration_bounds = array<i64: 1>, scalar_prefetch = 0 : i64, scratch_operands = 0 : i64, tpu.core_type = #tpu.core_type<tc>, window_params = [{transform_indices = @transform_0, window_bounds = array<i64: 128, 288>}, {pipeline_mode = #tpu.pipeline_mode<synchronous>, transform_indices = @transform_1, window_bounds = array<i64: 288, 128>}, {pipeline_mode = #tpu.pipeline_mode<synchronous>, transform_indices = @transform_2, window_bounds = array<i64: 1, 128>}, {transform_indices = @transform_3, window_bounds = array<i64: 128, 128>}]} {
    %c0 = arith.constant 0 : index
    %c0_0 = arith.constant 0 : index
    %0 = vector.load %arg1[%c0, %c0_0] : memref<128x288xbf16, #tpu.memory_space<vmem>>, vector<128x288xbf16>
    %c0_1 = arith.constant 0 : index
    %c0_2 = arith.constant 0 : index
    %1 = vector.load %arg2[%c0_1, %c0_2] : memref<288x128xbf16, #tpu.memory_space<vmem>>, vector<288x128xbf16>
    %cst = arith.constant dense<0.000000e+00> : vector<128x128xf32>
    %2 = tpu.matmul %0, %1, %cst {dimension_numbers = #tpu.dot_dimension_numbers<[1], [0], [0], [1], [0, 0, 1, 1], [], []>} : vector<128x288xbf16>, vector<288x128xbf16>, vector<128x128xf32> -> vector<128x128xf32>
    %c0_3 = arith.constant 0 : index
    %c0_4 = arith.constant 0 : index
    %3 = vector.load %arg3[%c0_3, %c0_4] : memref<1x128xf32, #tpu.memory_space<vmem>>, vector<1x128xf32>
    %4 = vector.broadcast %3 : vector<1x128xf32> to vector<128x128xf32>
    %5 = arith.addf %2, %4 : vector<128x128xf32>
    %cst_5 = arith.constant 0.000000e+00 : f32
    %6 = vector.broadcast %cst_5 : f32 to vector<128x128xf32>
    %7 = arith.maximumf %5, %6 : vector<128x128xf32>
    %c0_6 = arith.constant 0 : index
    %c0_7 = arith.constant 0 : index
    %8 = vector.load %arg4[%c0_6, %c0_7] : memref<128x128xf32, #tpu.memory_space<vmem>>, vector<128x128xf32>
    tpu.vector_store %arg4[%c0_6, %c0_7], %7 {strides = array<i32>} : memref<128x128xf32, #tpu.memory_space<vmem>>, vector<128x128xf32>,
    return
  }
  func.func @transform_0(%arg0: i32) -> (i32, i32) {
    %c0_i32 = arith.constant 0 : i32
    %c0_i32_0 = arith.constant 0 : i32
    return %arg0, %c0_i32 : i32, i32
  }
  func.func @transform_1(%arg0: i32) -> (i32, i32) {
    %c0_i32 = arith.constant 0 : i32
    %c0_i32_0 = arith.constant 0 : i32
    %c0_i32_1 = arith.constant 0 : i32
    return %c0_i32, %c0_i32_0 : i32, i32
  }
  func.func @transform_2(%arg0: i32) -> (i32, i32) {
    %c0_i32 = arith.constant 0 : i32
    %c0_i32_0 = arith.constant 0 : i32
    %c0_i32_1 = arith.constant 0 : i32
    return %c0_i32, %c0_i32_0 : i32, i32
  }
  func.func @transform_3(%arg0: i32) -> (i32, i32) {
    %c0_i32 = arith.constant 0 : i32
    %c0_i32_0 = arith.constant 0 : i32
    return %arg0, %c0_i32 : i32, i32
  }
}

</mosaic_0001>

<bundles_post_ra>
// kernel: context_path_forward.15
= control target key start
LH: loop header
LB: loop body
LE: loop exit
PB: predicated region body
PF: predicated region fallthrough
CT: control target
= control target key end

     0   :  { %s860_s12 = smov 0   ;;  %s982_s0 = inlined_call_operand.vmem [shape: bf16[2048,27], index: 0, kind: input, shape index: {}]   ;;  %s983_s1 = inlined_call_operand.vmem [shape: bf16[27,128], index: 1, kind: input, shape index: {}]   ;;  %s984_s2 = inlined_call_operand.vmem [shape: f32[1,128], index: 2, kind: input, shape index: {}]   ;;  %s985_s3 = inlined_call_operand.vmem [shape: bf16[2048,128], index: 3, kind: output, shape index: {}]  }
   0x1 LB: > { %s603_s13 = sadd.s32 4294967295, %s837_s12   ;;  %p607_p0 = scmp.ge.s32.totalorder %s837_s12, 1  ;;  %s837_s12 = sphi %s860_s12, %s13_s12  }
   0x2   : > { %p138_p1 = scmp.lt.s32.totalorder %s837_s12, 9 }
   0x4   : > { %p139_p2 = pnand %p607_p0, %p138_p1 }
   0x5   : > { %s608_s18 = sshll.u32 (!%p139_p2), %s603_s13, 5 }
   0x6   : > { %142 = sbr.rel (%p139_p2) target bundleno = 221 (0xdd), region = 32  ;;  %p163_p3 = scmp.lt.s32.totalorder (!%p139_p2), %s608_s18, 255 }
   0xb   : > { %v682_v0 = vld [vmem:[%s983_s1 + $0x8] sm:$0xf]  ;;  %v719_v1 = vld [vmem:[%s983_s1 + $0x8] sm:$0x30]  ;;  %vm355_vm0 = vcmask 1044480   ;;  %vm356_vm1 = vcmask 1045504  }
   0xc   : > { %v683_v2 = vor.u32 %v719_v1, %v682_v0  ;;  %v839_v3 = vmov 65535   ;;  %s987_s18 = smov (!%p163_p3, %s608_s18), 255  ;;  %v718_v7 = vld [vmem:[%s983_s1] sm:$0xff]  ;;  %vm306_vm2 = vcmask 220160  }
   0xd   : > { %v357_v4 = vsel %vm355_vm0, 4294967295, %v839_v3  ;;  %s609_s21 = sshll.u32 %s987_s18, 2  ;;  %v922_v26 = vld [vmem:[%s984_s2] ss:$0 sm:$0xff] }
   0xe   : > { %v358_v5 = vsel %vm356_vm1, %v357_v4, 0  ;;  %s885_s24 = scalar_lea.vmem %s982_s0, %s609_s21  ;;  %s933_s29 = scalar_lea.vmem %s985_s3, %s609_s21 }
   0xf   : > { %v360_v6 = vand.u32 %v683_v2, %v358_v5  ;;  %v702_v8 = vld [vmem:[%s885_s24] sm:$0xff]  ;;  %v703_v12 = vld [vmem:[%s885_s24 + $0x8] sm:$0xff]  ;;  %v704_v16 = vld [vmem:[%s885_s24 + $0x10] sm:$0xff] }
  0x10   : > { %v706_v9 = vld [vmem:[%s885_s24 + $0x20] sm:$0xff]  ;;  %v707_v13 = vld [vmem:[%s885_s24 + $0x28] sm:$0xff]  ;;  %v708_v17 = vld [vmem:[%s885_s24 + $0x30] sm:$0xff] }
  0x11   : > { %368 = vmatpush.bf16.msra.mxu0 %v360_v6  ;;  %815 = vmatpush.bf16.msra.mxu1 %v360_v6  ;;  %v710_v10 = vld [vmem:[%s885_s24 + $0x40] sm:$0xff]  ;;  %v711_v14 = vld [vmem:[%s885_s24 + $0x48] sm:$0xff]  ;;  %v712_v18 = vld [vmem:[%s885_s24 + $0x50] sm:$0xff] }
  0x12   : > { %816 = vmatpush.bf16.msra.mxu2 %v360_v6  ;;  %817 = vmatpush.bf16.msra.mxu3 %v360_v6  ;;  %v714_v11 = vld [vmem:[%s885_s24 + $0x60] sm:$0xff]  ;;  %v715_v15 = vld [vmem:[%s885_s24 + $0x68] sm:$0xff]  ;;  %v716_v19 = vld [vmem:[%s885_s24 + $0x70] sm:$0xff] }
  0x13   : > { %v705_v20 = vld [vmem:[%s885_s24 + $0x18] sm:$0xff] }
  0x14   : > { %v709_v21 = vld [vmem:[%s885_s24 + $0x38] sm:$0xff] }
  0x15   : > { %369 = vmatpush.bf16.msra.mxu0 %v718_v7  ;;  %818 = vmatpush.bf16.msra.mxu1 %v718_v7  ;;  %v713_v22 = vld [vmem:[%s885_s24 + $0x58] sm:$0xff] }
  0x16   : > { %819 = vmatpush.bf16.msra.mxu2 %v718_v7  ;;  %820 = vmatpush.bf16.msra.mxu3 %v718_v7  ;;  %v717_v23 = vld [vmem:[%s885_s24 + $0x78] sm:$0xff] }
  0x18   : > { %684 = vmatmul.msk.bf16.vlgmr.msra.gmra.mxu0 %vm306_vm2, %v702_v8  ;;  %688 = vmatmul.msk.bf16.vlgmr.msra.gmra.mxu1 %vm306_vm2, %v706_v9 }
  0x19   : > { %692 = vmatmul.msk.bf16.vlgmr.msra.gmra.mxu2 %vm306_vm2, %v710_v10  ;;  %696 = vmatmul.msk.bf16.vlgmr.msra.gmra.mxu3 %vm306_vm2, %v714_v11 }
  0x28   : > { %685 = vmatmul.msk.bf16.gmra.mxu0 %vm306_vm2, %v703_v12  ;;  %689 = vmatmul.msk.bf16.gmra.mxu1 %vm306_vm2, %v707_v13 }
  0x29   : > { %693 = vmatmul.msk.bf16.gmra.mxu2 %vm306_vm2, %v711_v14  ;;  %697 = vmatmul.msk.bf16.gmra.mxu3 %vm306_vm2, %v715_v15 }
  0x38   : > { %686 = vmatmul.msk.bf16.gmra.mxu0 %vm306_vm2, %v704_v16  ;;  %690 = vmatmul.msk.bf16.gmra.mxu1 %vm306_vm2, %v708_v17 }
  0x39   : > { %694 = vmatmul.msk.bf16.gmra.mxu2 %vm306_vm2, %v712_v18  ;;  %698 = vmatmul.msk.bf16.gmra.mxu3 %vm306_vm2, %v716_v19 }
  0x48   : > { %687 = vmatmul.msk.bf16.gmra.mxu0 %vm306_vm2, %v705_v20  ;;  %691 = vmatmul.msk.bf16.gmra.mxu1 %vm306_vm2, %v709_v21 }
  0x49   : > { %695 = vmatmul.msk.bf16.gmra.mxu2 %vm306_vm2, %v713_v22  ;;  %699 = vmatmul.msk.bf16.gmra.mxu3 %vm306_vm2, %v717_v23 }
  0x95   : > { %v371_v24 = vpop.f32.mrf.mxu0  ;;  %v391_v25 = vpop.f32.mrf.mxu1 }
  0x96   : > { %v372_v27 = vadd.f32 %v922_v26, %v371_v24  ;;  %v392_v28 = vadd.f32 %v922_v26, %v391_v25 }
  0x98   : > { %v451_v35 = vmax.f32 %v372_v27, 0.0  ;;  %v459_v36 = vmax.f32 %v392_v28, 0.0 }
  0x9c   : > { %v411_v29 = vpop.f32.mrf.mxu2  ;;  %v431_v30 = vpop.f32.mrf.mxu3 }
  0x9d   : > { %v373_v31 = vpop.f32.mrf.mxu0  ;;  %v393_v32 = vpop.f32.mrf.mxu1  ;;  %v412_v41 = vadd.f32 %v922_v26, %v411_v29  ;;  %v432_v42 = vadd.f32 %v922_v26, %v431_v30 }
  0x9e   : > { %v374_v33 = vadd.f32 %v922_v26, %v373_v31  ;;  %v394_v34 = vadd.f32 %v922_v26, %v393_v32 }
  0x9f   : > { %v467_v49 = vmax.f32 %v412_v41, 0.0  ;;  %v475_v50 = vmax.f32 %v432_v42, 0.0 }
  0xa0   : > { %v452_v37 = vmax.f32 %v374_v33, 0.0  ;;  %v460_v38 = vmax.f32 %v394_v34, 0.0 }
  0xa2   : > { %v723_v39 = vpack.c.bf16 %v452_v37, %v451_v35  ;;  %v743_v40 = vpack.c.bf16 %v460_v38, %v459_v36 }
  0xa4   : > { %724 = vst [vmem:[%s933_s29] sm:$0xff] %v723_v39   ;;  %v413_v43 = vpop.f32.mrf.mxu2  ;;  %v433_v44 = vpop.f32.mrf.mxu3 }
  0xa5   : > { %803 = vst [vmem:[%s933_s29 + $0x20] sm:$0xff] %v743_v40   ;;  %v414_v45 = vadd.f32 %v922_v26, %v413_v43  ;;  %v434_v46 = vadd.f32 %v922_v26, %v433_v44  ;;  %v376_v47 = vpop.f32.mrf.mxu0  ;;  %v396_v48 = vpop.f32.mrf.mxu1 }
  0xa6   : > { %v377_v55 = vadd.f32 %v922_v26, %v376_v47  ;;  %v397_v56 = vadd.f32 %v922_v26, %v396_v48 }
  0xa7   : > { %v468_v51 = vmax.f32 %v414_v45, 0.0  ;;  %v476_v52 = vmax.f32 %v434_v46, 0.0 }
  0xa8   : > { %v453_v63 = vmax.f32 %v377_v55, 0.0  ;;  %v461_v0 = vmax.f32 %v397_v56, 0.0 }
  0xa9   : > { %v763_v53 = vpack.c.bf16 %v468_v51, %v467_v49  ;;  %v783_v54 = vpack.c.bf16 %v476_v52, %v475_v50 }
  0xab   : > { %807 = vst [vmem:[%s933_s29 + $0x40] sm:$0xff] %v763_v53  }
  0xac   : > { %811 = vst [vmem:[%s933_s29 + $0x60] sm:$0xff] %v783_v54   ;;  %v416_v57 = vpop.f32.mrf.mxu2  ;;  %v436_v58 = vpop.f32.mrf.mxu3 }
  0xad   : > { %v378_v59 = vpop.f32.mrf.mxu0  ;;  %v398_v60 = vpop.f32.mrf.mxu1  ;;  %v417_v5 = vadd.f32 %v922_v26, %v416_v57  ;;  %v437_v6 = vadd.f32 %v922_v26, %v436_v58 }
  0xae   : > { %v379_v61 = vadd.f32 %v922_v26, %v378_v59  ;;  %v399_v62 = vadd.f32 %v922_v26, %v398_v60 }
  0xaf   : > { %v469_v13 = vmax.f32 %v417_v5, 0.0  ;;  %v477_v14 = vmax.f32 %v437_v6, 0.0 }
  0xb0   : > { %v454_v1 = vmax.f32 %v379_v61, 0.0  ;;  %v462_v2 = vmax.f32 %v399_v62, 0.0 }
  0xb2   : > { %v728_v3 = vpack.c.bf16 %v454_v1, %v453_v63  ;;  %v748_v4 = vpack.c.bf16 %v462_v2, %v461_v0 }
  0xb4   : > { %800 = vst [vmem:[%s933_s29 + $0x8] sm:$0xff] %v728_v3   ;;  %v418_v7 = vpop.f32.mrf.mxu2  ;;  %v438_v8 = vpop.f32.mrf.mxu3 }
  0xb5   : > { %804 = vst [vmem:[%s933_s29 + $0x28] sm:$0xff] %v748_v4   ;;  %v419_v9 = vadd.f32 %v922_v26, %v418_v7  ;;  %v439_v10 = vadd.f32 %v922_v26, %v438_v8  ;;  %v381_v11 = vpop.f32.mrf.mxu0  ;;  %v401_v12 = vpop.f32.mrf.mxu1 }
  0xb6   : > { %v382_v19 = vadd.f32 %v922_v26, %v381_v11  ;;  %v402_v20 = vadd.f32 %v922_v26, %v401_v12 }
  0xb7   : > { %v470_v15 = vmax.f32 %v419_v9, 0.0  ;;  %v478_v16 = vmax.f32 %v439_v10, 0.0 }
  0xb8   : > { %v455_v28 = vmax.f32 %v382_v19, 0.0  ;;  %v463_v29 = vmax.f32 %v402_v20, 0.0 }
  0xb9   : > { %v768_v17 = vpack.c.bf16 %v470_v15, %v469_v13  ;;  %v788_v18 = vpack.c.bf16 %v478_v16, %v477_v14 }
  0xbb   : > { %808 = vst [vmem:[%s933_s29 + $0x48] sm:$0xff] %v768_v17  }
  0xbc   : > { %812 = vst [vmem:[%s933_s29 + $0x68] sm:$0xff] %v788_v18   ;;  %v421_v21 = vpop.f32.mrf.mxu2  ;;  %v441_v22 = vpop.f32.mrf.mxu3 }
  0xbd   : > { %v383_v23 = vpop.f32.mrf.mxu0  ;;  %v403_v24 = vpop.f32.mrf.mxu1  ;;  %v422_v34 = vadd.f32 %v922_v26, %v421_v21  ;;  %v442_v35 = vadd.f32 %v922_v26, %v441_v22 }
  0xbe   : > { %v384_v25 = vadd.f32 %v922_v26, %v383_v23  ;;  %v404_v27 = vadd.f32 %v922_v26, %v403_v24 }
  0xbf   : > { %v471_v42 = vmax.f32 %v422_v34, 0.0  ;;  %v479_v43 = vmax.f32 %v442_v35, 0.0 }
  0xc0   : > { %v456_v30 = vmax.f32 %v384_v25, 0.0  ;;  %v464_v31 = vmax.f32 %v404_v27, 0.0 }
  0xc2   : > { %v733_v32 = vpack.c.bf16 %v456_v30, %v455_v28  ;;  %v753_v33 = vpack.c.bf16 %v464_v31, %v463_v29 }
  0xc4   : > { %801 = vst [vmem:[%s933_s29 + $0x10] sm:$0xff] %v733_v32   ;;  %v423_v36 = vpop.f32.mrf.mxu2  ;;  %v443_v37 = vpop.f32.mrf.mxu3 }
  0xc5   : > { %805 = vst [vmem:[%s933_s29 + $0x30] sm:$0xff] %v753_v33   ;;  %v424_v38 = vadd.f32 %v922_v26, %v423_v36  ;;  %v444_v39 = vadd.f32 %v922_v26, %v443_v37  ;;  %v386_v40 = vpop.f32.mrf.mxu0  ;;  %v406_v41 = vpop.f32.mrf.mxu1 }
  0xc6   : > { %v387_v48 = vadd.f32 %v922_v26, %v386_v40  ;;  %v407_v49 = vadd.f32 %v922_v26, %v406_v41 }
  0xc7   : > { %v472_v44 = vmax.f32 %v424_v38, 0.0  ;;  %v480_v45 = vmax.f32 %v444_v39, 0.0 }
  0xc8   : > { %v457_v56 = vmax.f32 %v387_v48, 0.0  ;;  %v465_v57 = vmax.f32 %v407_v49, 0.0 }
  0xc9   : > { %v773_v46 = vpack.c.bf16 %v472_v44, %v471_v42  ;;  %v793_v47 = vpack.c.bf16 %v480_v45, %v479_v43 }
  0xcb   : > { %809 = vst [vmem:[%s933_s29 + $0x50] sm:$0xff] %v773_v46  }
  0xcc   : > { %813 = vst [vmem:[%s933_s29 + $0x70] sm:$0xff] %v793_v47   ;;  %v426_v50 = vpop.f32.mrf.mxu2  ;;  %v446_v51 = vpop.f32.mrf.mxu3 }
  0xcd   : > { %v388_v52 = vpop.f32.mrf.mxu0  ;;  %v408_v53 = vpop.f32.mrf.mxu1  ;;  %v427_v62 = vadd.f32 %v922_v26, %v426_v50  ;;  %v447_v63 = vadd.f32 %v922_v26, %v446_v51 }
  0xce   : > { %v389_v54 = vadd.f32 %v922_v26, %v388_v52  ;;  %v409_v55 = vadd.f32 %v922_v26, %v408_v53 }
  0xcf   : > { %v473_v4 = vmax.f32 %v427_v62, 0.0  ;;  %v481_v5 = vmax.f32 %v447_v63, 0.0 }
  0xd0   : > { %v458_v58 = vmax.f32 %v389_v54, 0.0  ;;  %v466_v59 = vmax.f32 %v409_v55, 0.0 }
  0xd2   : > { %v738_v60 = vpack.c.bf16 %v458_v58, %v457_v56  ;;  %v758_v61 = vpack.c.bf16 %v466_v59, %v465_v57 }
  0xd4   : > { %802 = vst [vmem:[%s933_s29 + $0x18] sm:$0xff] %v738_v60   ;;  %v428_v0 = vpop.f32.mrf.mxu2  ;;  %v448_v1 = vpop.f32.mrf.mxu3 }
  0xd5   : > { %806 = vst [vmem:[%s933_s29 + $0x38] sm:$0xff] %v758_v61   ;;  %v429_v2 = vadd.f32 %v922_v26, %v428_v0  ;;  %v449_v3 = vadd.f32 %v922_v26, %v448_v1 }
  0xd7   : > { %v474_v6 = vmax.f32 %v429_v2, 0.0  ;;  %v482_v7 = vmax.f32 %v449_v3, 0.0 }
  0xd9   : > { %v778_v8 = vpack.c.bf16 %v474_v6, %v473_v4  ;;  %v798_v9 = vpack.c.bf16 %v482_v7, %v481_v5 }
  0xdb   : > { %810 = vst [vmem:[%s933_s29 + $0x58] sm:$0xff] %v778_v8  }
  0xdc   : > { %814 = vst [vmem:[%s933_s29 + $0x78] sm:$0xff] %v798_v9  }
  0xdd PF: > { %s13_s12 = sadd.s32 1, %s837_s12  }
  0xde   : > { %p10_p4 = scmp.ge.s32.totalorder %s13_s12, 10  }
  0xe0   :  { %12 = sbr.rel (!%p10_p4) target bundleno = 1 (0x1), region = 62 }

// kernel: context_path_forward.16
= control target key start
LH: loop header
LB: loop body
LE: loop exit
PB: predicated region body
PF: predicated region fallthrough
CT: control target
= control target key end

     0   :  { %s1184_s12 = smov 0   ;;  %s1375_s0 = inlined_call_operand.vmem [shape: bf16[512,144], index: 0, kind: input, shape index: {}]   ;;  %s1376_s1 = inlined_call_operand.vmem [shape: bf16[144,128], index: 1, kind: input, shape index: {}]   ;;  %s1377_s2 = inlined_call_operand.vmem [shape: f32[1,128], index: 2, kind: input, shape index: {}]   ;;  %s1378_s3 = inlined_call_operand.vmem [shape: bf16[512,128], index: 3, kind: output, shape index: {}]  }
   0x1 LB: > { %s809_s13 = sadd.s32 4294967295, %s1162_s12   ;;  %p813_p0 = scmp.ge.s32.totalorder %s1162_s12, 1  ;;  %s1162_s12 = sphi %s1184_s12, %s13_s12  }
   0x2   : > { %p139_p1 = scmp.lt.s32.totalorder %s1162_s12, 3 }
   0x4   : > { %p140_p2 = pnand %p813_p0, %p139_p1 }
   0x5   : > { %s814_s18 = sshll.u32 (!%p140_p2), %s809_s13, 5 }
   0x6   : > { %143 = sbr.rel (%p140_p2) target bundleno = 304 (0x130), region = 32  ;;  %p165_p3 = scmp.lt.s32.totalorder (!%p140_p2), %s814_s18, 63 }
   0xb   : > { %v1041_v0 = vld [vmem:[%s1376_s1 + $0x38] sm:$0xff]  ;;  %v1042_v1 = vld [vmem:[%s1376_s1 + $0x40] sm:$0xff]  ;;  %v1040_v2 = vld [vmem:[%s1376_s1 + $0x30] sm:$0xff]  ;;  %s1380_s18 = smov (!%p165_p3, %s814_s18), 63  ;;  %vm430_vm0 = vcmask 130048  }
   0xc   : > { %479 = vmatpush.bf16.msra.mxu0 %v1041_v0  ;;  %1138 = vmatpush.bf16.msra.mxu2 %v1041_v0  ;;  %s1001_s21 = sshll.u32 %s1380_s18, 3  ;;  %v1039_v3 = vld [vmem:[%s1376_s1 + $0x28] sm:$0xff]  ;;  %v1038_v7 = vld [vmem:[%s1376_s1 + $0x20] sm:$0xff]  ;;  %v1037_v11 = vld [vmem:[%s1376_s1 + $0x18] sm:$0xff]  ;;  %s818_s13 = sshll.u32 %s1380_s18, 2 }
   0xd   : > { %575 = vmatpush.bf16.msra.mxu1 %v1042_v1  ;;  %1146 = vmatpush.bf16.msra.mxu3 %v1042_v1  ;;  %s1207_s24 = scalar_lea.vmem %s1375_s0, %s1001_s21  ;;  %v1036_v12 = vld [vmem:[%s1376_s1 + $0x10] sm:$0xff]  ;;  %v1035_v16 = vld [vmem:[%s1376_s1 + $0x8] sm:$0xff]  ;;  %v1034_v19 = vld [vmem:[%s1376_s1] sm:$0xff]  ;;  %s1320_s16 = scalar_lea.vmem %s1378_s3, %s818_s13 }
   0xe   : > { %v1002_v4 = vld [vmem:[%s1207_s24 + $0x4] sm:$0xf]  ;;  %v823_v5 = vld [vmem:[%s1207_s24 + $0x8] sm:$0xf0]  ;;  %v1020_v8 = vld [vmem:[%s1207_s24 + $0x94] sm:$0xf] }
   0xf   : > { %v826_v6 = vor.u32 %v1002_v4, %v823_v5  ;;  %v895_v9 = vld [vmem:[%s1207_s24 + $0x98] sm:$0xf0]  ;;  %v1004_v13 = vld [vmem:[%s1207_s24 + $0x14] sm:$0xf]  ;;  %v1022_v17 = vld [vmem:[%s1207_s24 + $0xa4] sm:$0xf] }
  0x10   : > { %480 = vmatpush.bf16.msra.mxu0 %v1040_v2  ;;  %1139 = vmatpush.bf16.msra.mxu2 %v1040_v2  ;;  %v898_v10 = vor.u32 %v1020_v8, %v895_v9  ;;  %v831_v14 = vld [vmem:[%s1207_s24 + $0x18] sm:$0xf0]  ;;  %v903_v18 = vld [vmem:[%s1207_s24 + $0xa8] sm:$0xf0]  ;;  %v821_v20 = vld [vmem:[%s1207_s24] sm:$0xf] }
  0x11   : > { %983 = vmatmul.msk.bf16.vlgmr.msra.gmra.mxu1 %vm430_vm0, %v826_v6  ;;  %v834_v15 = vor.u32 %v1004_v13, %v831_v14  ;;  %v1003_v21 = vld [vmem:[%s1207_s24 + $0x4] sm:$0xf0]  ;;  %v906_v22 = vor.u32 %v1022_v17, %v903_v18  ;;  %v885_v23 = vld [vmem:[%s1207_s24 + $0x80] sm:$0xf]  ;;  %v1006_v27 = vld [vmem:[%s1207_s24 + $0x24] sm:$0xf] }
  0x12   : > { %992 = vmatmul.msk.bf16.vlgmr.msra.gmra.mxu3 %vm430_vm0, %v898_v10  ;;  %v1019_v24 = vld [vmem:[%s1207_s24 + $0x84] sm:$0xf0]  ;;  %v822_v25 = vor.u32 %v1003_v21, %v821_v20  ;;  %v839_v28 = vld [vmem:[%s1207_s24 + $0x28] sm:$0xf0]  ;;  %v1024_v30 = vld [vmem:[%s1207_s24 + $0xb4] sm:$0xf] }
  0x13   : > { %v886_v26 = vor.u32 %v1019_v24, %v885_v23  ;;  %v842_v29 = vor.u32 %v1006_v27, %v839_v28  ;;  %v911_v31 = vld [vmem:[%s1207_s24 + $0xb8] sm:$0xf0]  ;;  %v829_v32 = vld [vmem:[%s1207_s24 + $0x10] sm:$0xf]  ;;  %v1005_v33 = vld [vmem:[%s1207_s24 + $0x14] sm:$0xf0] }
  0x14   : > { %481 = vmatpush.bf16.msra.mxu0 %v1039_v3  ;;  %1140 = vmatpush.bf16.msra.mxu2 %v1039_v3  ;;  %v914_v34 = vor.u32 %v1024_v30, %v911_v31  ;;  %v893_v35 = vld [vmem:[%s1207_s24 + $0x90] sm:$0xf]  ;;  %v1021_v36 = vld [vmem:[%s1207_s24 + $0x94] sm:$0xf0]  ;;  %v830_v37 = vor.u32 %v1005_v33, %v829_v32  ;;  %v1008_v39 = vld [vmem:[%s1207_s24 + $0x34] sm:$0xf] }
  0x15   : > { %v894_v38 = vor.u32 %v1021_v36, %v893_v35  ;;  %v847_v40 = vld [vmem:[%s1207_s24 + $0x38] sm:$0xf0]  ;;  %v1026_v42 = vld [vmem:[%s1207_s24 + $0xc4] sm:$0xf]  ;;  %v919_v43 = vld [vmem:[%s1207_s24 + $0xc8] sm:$0xf0] }
  0x16   : > { %v850_v41 = vor.u32 %v1008_v39, %v847_v40  ;;  %v837_v44 = vld [vmem:[%s1207_s24 + $0x20] sm:$0xf]  ;;  %v1007_v45 = vld [vmem:[%s1207_s24 + $0x24] sm:$0xf0]  ;;  %v922_v46 = vor.u32 %v1026_v42, %v919_v43  ;;  %v1010_v51 = vld [vmem:[%s1207_s24 + $0x44] sm:$0xf] }
  0x17   : > { %v901_v47 = vld [vmem:[%s1207_s24 + $0xa0] sm:$0xf]  ;;  %v1023_v48 = vld [vmem:[%s1207_s24 + $0xa4] sm:$0xf0]  ;;  %v838_v49 = vor.u32 %v1007_v45, %v837_v44  ;;  %v855_v52 = vld [vmem:[%s1207_s24 + $0x48] sm:$0xf0] }
  0x18   : > { %482 = vmatpush.bf16.msra.mxu0 %v1038_v7  ;;  %1141 = vmatpush.bf16.msra.mxu2 %v1038_v7  ;;  %v902_v50 = vor.u32 %v1023_v48, %v901_v47  ;;  %v858_v53 = vor.u32 %v1010_v51, %v855_v52  ;;  %v1028_v54 = vld [vmem:[%s1207_s24 + $0xd4] sm:$0xf]  ;;  %v927_v55 = vld [vmem:[%s1207_s24 + $0xd8] sm:$0xf0]  ;;  %v845_v56 = vld [vmem:[%s1207_s24 + $0x30] sm:$0xf] }
  0x19   : > { %v1009_v57 = vld [vmem:[%s1207_s24 + $0x34] sm:$0xf0]  ;;  %v930_v58 = vor.u32 %v1028_v54, %v927_v55  ;;  %v909_v59 = vld [vmem:[%s1207_s24 + $0xb0] sm:$0xf]  ;;  %v1012_v63 = vld [vmem:[%s1207_s24 + $0x54] sm:$0xf] }
  0x1a   : > { %v1025_v60 = vld [vmem:[%s1207_s24 + $0xb4] sm:$0xf0]  ;;  %v846_v61 = vor.u32 %v1009_v57, %v845_v56  ;;  %v863_v0 = vld [vmem:[%s1207_s24 + $0x58] sm:$0xf0]  ;;  %v1030_v2 = vld [vmem:[%s1207_s24 + $0xe4] sm:$0xf] }
  0x1b   : > { %v910_v62 = vor.u32 %v1025_v60, %v909_v59  ;;  %v866_v1 = vor.u32 %v1012_v63, %v863_v0  ;;  %v935_v3 = vld [vmem:[%s1207_s24 + $0xe8] sm:$0xf0]  ;;  %v853_v4 = vld [vmem:[%s1207_s24 + $0x40] sm:$0xf]  ;;  %v1011_v5 = vld [vmem:[%s1207_s24 + $0x44] sm:$0xf0] }
  0x1c   : > { %483 = vmatpush.bf16.msra.mxu0 %v1037_v11  ;;  %1142 = vmatpush.bf16.msra.mxu2 %v1037_v11  ;;  %v938_v6 = vor.u32 %v1030_v2, %v935_v3  ;;  %v917_v7 = vld [vmem:[%s1207_s24 + $0xc0] sm:$0xf]  ;;  %v1027_v8 = vld [vmem:[%s1207_s24 + $0xc4] sm:$0xf0]  ;;  %v854_v9 = vor.u32 %v1011_v5, %v853_v4  ;;  %v1014_v11 = vld [vmem:[%s1207_s24 + $0x64] sm:$0xf] }
  0x1d   : > { %v918_v10 = vor.u32 %v1027_v8, %v917_v7  ;;  %v1032_v14 = vld [vmem:[%s1207_s24 + $0xf4] sm:$0xf]  ;;  %v1013_v17 = vld [vmem:[%s1207_s24 + $0x54] sm:$0xf0]  ;;  %v879_v24 = vld [vmem:[%s1207_s24 + $0x78] sm:$0xf0] }
  0x1e   : > { %v1029_v20 = vld [vmem:[%s1207_s24 + $0xd4] sm:$0xf0]  ;;  %v1016_v23 = vld [vmem:[%s1207_s24 + $0x74] sm:$0xf]  ;;  %v1015_v27 = vld [vmem:[%s1207_s24 + $0x64] sm:$0xf0] }
  0x1f   : > { %v933_v28 = vld [vmem:[%s1207_s24 + $0xe0] sm:$0xf]  ;;  %v1018_v32 = vld [vmem:[%s1207_s24 + $0x84] sm:$0xf]  ;;  %v887_v33 = vld [vmem:[%s1207_s24 + $0x88] sm:$0xf0] }
  0x20   : > { %484 = vmatpush.bf16.msra.mxu0 %v1036_v12  ;;  %1143 = vmatpush.bf16.msra.mxu2 %v1036_v12  ;;  %v871_v12 = vld [vmem:[%s1207_s24 + $0x68] sm:$0xf0]  ;;  %v877_v36 = vld [vmem:[%s1207_s24 + $0x70] sm:$0xf]  ;;  %v1033_v39 = vld [vmem:[%s1207_s24 + $0xf4] sm:$0xf0] }
  0x21   : > { %984 = vmatmul.msk.bf16.gmra.mxu1 %vm430_vm0, %v834_v15  ;;  %v874_v13 = vor.u32 %v1014_v11, %v871_v12  ;;  %v943_v15 = vld [vmem:[%s1207_s24 + $0xf8] sm:$0xf0] }
  0x22   : > { %993 = vmatmul.msk.bf16.gmra.mxu3 %vm430_vm0, %v906_v22  ;;  %v946_v18 = vor.u32 %v1032_v14, %v943_v15 }
  0x24   : > { %485 = vmatpush.bf16.msra.mxu0 %v1035_v16  ;;  %1144 = vmatpush.bf16.msra.mxu2 %v1035_v16  ;;  %v861_v16 = vld [vmem:[%s1207_s24 + $0x50] sm:$0xf] }
  0x25   : > { %v862_v21 = vor.u32 %v1013_v17, %v861_v16 }
  0x28   : > { %486 = vmatpush.bf16.msra.mxu0 %v1034_v19  ;;  %1145 = vmatpush.bf16.msra.mxu2 %v1034_v19  ;;  %v925_v19 = vld [vmem:[%s1207_s24 + $0xd0] sm:$0xf] }
  0x29   : > { %v926_v22 = vor.u32 %v1029_v20, %v925_v19 }
  0x2b   : > { %487 = vmatmul.bf16.vlgmr.msra.gmra.mxu0 %v822_v25  ;;  %527 = vmatmul.bf16.vlgmr.msra.gmra.mxu2 %v886_v26  ;;  %v882_v25 = vor.u32 %v1016_v23, %v879_v24  ;;  %v869_v26 = vld [vmem:[%s1207_s24 + $0x60] sm:$0xf] }
  0x2c   : > { %v870_v30 = vor.u32 %v1015_v27, %v869_v26 }
  0x31   : > { %985 = vmatmul.msk.bf16.gmra.mxu1 %vm430_vm0, %v842_v29  ;;  %v1031_v29 = vld [vmem:[%s1207_s24 + $0xe4] sm:$0xf0] }
  0x32   : > { %994 = vmatmul.msk.bf16.gmra.mxu3 %vm430_vm0, %v914_v34  ;;  %v934_v31 = vor.u32 %v1031_v29, %v933_v28  ;;  %v890_v34 = vor.u32 %v1018_v32, %v887_v33 }
  0x3b   : > { %492 = vmatmul.bf16.gmra.mxu0 %v830_v37  ;;  %532 = vmatmul.bf16.gmra.mxu2 %v894_v38  ;;  %v1017_v37 = vld [vmem:[%s1207_s24 + $0x74] sm:$0xf0]  ;;  %v941_v38 = vld [vmem:[%s1207_s24 + $0xf0] sm:$0xf] }
  0x3c   : > { %v878_v40 = vor.u32 %v1017_v37, %v877_v36 }
  0x41   : > { %986 = vmatmul.msk.bf16.gmra.mxu1 %vm430_vm0, %v850_v41  ;;  %v942_v41 = vor.u32 %v1033_v39, %v941_v38 }
  0x42   : > { %995 = vmatmul.msk.bf16.gmra.mxu3 %vm430_vm0, %v922_v46  ;;  %v1310_v46 = vld [vmem:[%s1377_s2] ss:$0 sm:$0xff] }
  0x4b   : > { %497 = vmatmul.bf16.gmra.mxu0 %v838_v49  ;;  %537 = vmatmul.bf16.gmra.mxu2 %v902_v50 }
  0x51   : > { %987 = vmatmul.msk.bf16.gmra.mxu1 %vm430_vm0, %v858_v53 }
  0x52   : > { %996 = vmatmul.msk.bf16.gmra.mxu3 %vm430_vm0, %v930_v58 }
  0x5b   : > { %502 = vmatmul.bf16.gmra.mxu0 %v846_v61  ;;  %542 = vmatmul.bf16.gmra.mxu2 %v910_v62 }
  0x61   : > { %988 = vmatmul.msk.bf16.gmra.mxu1 %vm430_vm0, %v866_v1 }
  0x62   : > { %997 = vmatmul.msk.bf16.gmra.mxu3 %vm430_vm0, %v938_v6 }
  0x6b   : > { %507 = vmatmul.bf16.gmra.mxu0 %v854_v9  ;;  %547 = vmatmul.bf16.gmra.mxu2 %v918_v10 }
  0x71   : > { %989 = vmatmul.msk.bf16.gmra.mxu1 %vm430_vm0, %v874_v13 }
  0x72   : > { %998 = vmatmul.msk.bf16.gmra.mxu3 %vm430_vm0, %v946_v18 }
  0x7b   : > { %512 = vmatmul.bf16.gmra.mxu0 %v862_v21  ;;  %552 = vmatmul.bf16.gmra.mxu2 %v926_v22 }
  0x81   : > { %990 = vmatmul.msk.bf16.gmra.mxu1 %vm430_vm0, %v882_v25 }
  0x8b   : > { %517 = vmatmul.bf16.gmra.mxu0 %v870_v30  ;;  %557 = vmatmul.bf16.gmra.mxu2 %v934_v31 }
  0x8e   : > { %v577_v35 = vpop.f32.mrf.mxu1 }
  0x91   : > { %991 = vmatmul.msk.bf16.gmra.mxu1 %vm430_vm0, %v890_v34 }
  0x95   : > { %v622_v44 = vpop.f32.mrf.mxu3 }
  0x96   : > { %v579_v42 = vpop.f32.mrf.mxu1 }
  0x9b   : > { %522 = vmatmul.bf16.gmra.mxu0 %v878_v40  ;;  %562 = vmatmul.bf16.gmra.mxu2 %v942_v41 }
  0x9d   : > { %v624_v54 = vpop.f32.mrf.mxu3 }
  0x9e   : > { %v582_v43 = vpop.f32.mrf.mxu1 }
  0xa5   : > { %v627_v62 = vpop.f32.mrf.mxu3 }
  0xa6   : > { %v584_v47 = vpop.f32.mrf.mxu1 }
  0xa8   : > { %v488_v45 = vpop.f32.mrf.mxu0 }
  0xa9   : > { %v489_v48 = vadd.f32 %v1310_v46, %v488_v45 }
  0xab   : > { %v578_v51 = vadd.f32 %v577_v35, %v489_v48 }
  0xad   : > { %v657_v56 = vmax.f32 %v578_v51, 0.0  ;;  %v629_v9 = vpop.f32.mrf.mxu3 }
  0xae   : > { %v1313_v49 = vpop.f32.mrf.mxu2  ;;  %v587_v53 = vpop.f32.mrf.mxu1 }
  0xb0   : > { %v490_v50 = vpop.f32.mrf.mxu0 }
  0xb1   : > { %v491_v52 = vadd.f32 %v1310_v46, %v490_v50 }
  0xb3   : > { %v580_v55 = vadd.f32 %v579_v42, %v491_v52 }
  0xb5   : > { %v658_v57 = vmax.f32 %v580_v55, 0.0  ;;  %v632_v22 = vpop.f32.mrf.mxu3 }
  0xb6   : > { %v1322_v59 = vpop.f32.mrf.mxu2  ;;  %v589_v61 = vpop.f32.mrf.mxu1 }
  0xb7   : > { %v1046_v58 = vpack.c.bf16 %v658_v57, %v657_v56 }
  0xb8   : > { %v493_v60 = vpop.f32.mrf.mxu0 }
  0xb9   : > { %1047 = vst [vmem:[%s1320_s16] sm:$0xff] %v1046_v58   ;;  %v494_v63 = vadd.f32 %v1310_v46, %v493_v60 }
  0xbb   : > { %v583_v2 = vadd.f32 %v582_v43, %v494_v63 }
  0xbd   : > { %v659_v7 = vmax.f32 %v583_v2, 0.0  ;;  %v634_v37 = vpop.f32.mrf.mxu3 }
  0xbe   : > { %v533_v0 = vpop.f32.mrf.mxu2  ;;  %v592_v4 = vpop.f32.mrf.mxu1 }
  0xbf   : > { %v534_v6 = vadd.f32 %v1310_v46, %v533_v0 }
  0xc0   : > { %v495_v1 = vpop.f32.mrf.mxu0 }
  0xc1   : > { %v496_v3 = vadd.f32 %v1310_v46, %v495_v1  ;;  %v623_v12 = vadd.f32 %v622_v44, %v534_v6 }
  0xc3   : > { %v585_v5 = vadd.f32 %v584_v47, %v496_v3  ;;  %v675_v17 = vmax.f32 %v623_v12, 0.0 }
  0xc5   : > { %v660_v8 = vmax.f32 %v585_v5, 0.0  ;;  %v637_v51 = vpop.f32.mrf.mxu3 }
  0xc6   : > { %v535_v11 = vpop.f32.mrf.mxu2  ;;  %v594_v15 = vpop.f32.mrf.mxu1 }
  0xc7   : > { %v1051_v10 = vpack.c.bf16 %v660_v8, %v659_v7  ;;  %v536_v13 = vadd.f32 %v1310_v46, %v535_v11 }
  0xc8   : > { %v498_v14 = vpop.f32.mrf.mxu0 }
  0xc9   : > { %1123 = vst [vmem:[%s1320_s16 + $0x8] sm:$0xff] %v1051_v10   ;;  %v625_v16 = vadd.f32 %v624_v54, %v536_v13  ;;  %v499_v19 = vadd.f32 %v1310_v46, %v498_v14 }
  0xcb   : > { %v676_v18 = vmax.f32 %v625_v16, 0.0  ;;  %v588_v24 = vadd.f32 %v587_v53, %v499_v19 }
  0xcd   : > { %v1091_v20 = vpack.c.bf16 %v676_v18, %v675_v17  ;;  %v661_v29 = vmax.f32 %v588_v24, 0.0  ;;  %v639_v2 = vpop.f32.mrf.mxu3 }
  0xce   : > { %v538_v21 = vpop.f32.mrf.mxu2  ;;  %v597_v26 = vpop.f32.mrf.mxu1 }
  0xcf   : > { %1131 = vst [vmem:[%s1320_s16 + $0x48] sm:$0xff] %v1091_v20   ;;  %v539_v28 = vadd.f32 %v1310_v46, %v538_v21 }
  0xd0   : > { %v500_v23 = vpop.f32.mrf.mxu0 }
  0xd1   : > { %v501_v25 = vadd.f32 %v1310_v46, %v500_v23  ;;  %v628_v33 = vadd.f32 %v627_v62, %v539_v28 }
  0xd3   : > { %v590_v27 = vadd.f32 %v589_v61, %v501_v25  ;;  %v677_v39 = vmax.f32 %v628_v33, 0.0 }
  0xd5   : > { %v662_v30 = vmax.f32 %v590_v27, 0.0 }
  0xd6   : > { %v540_v32 = vpop.f32.mrf.mxu2  ;;  %v599_v36 = vpop.f32.mrf.mxu1 }
  0xd7   : > { %v1056_v31 = vpack.c.bf16 %v662_v30, %v661_v29  ;;  %v541_v34 = vadd.f32 %v1310_v46, %v540_v32 }
  0xd8   : > { %v503_v35 = vpop.f32.mrf.mxu0 }
  0xd9   : > { %1124 = vst [vmem:[%s1320_s16 + $0x10] sm:$0xff] %v1056_v31   ;;  %v630_v38 = vadd.f32 %v629_v9, %v541_v34  ;;  %v504_v41 = vadd.f32 %v1310_v46, %v503_v35 }
  0xdb   : > { %v678_v40 = vmax.f32 %v630_v38, 0.0  ;;  %v593_v45 = vadd.f32 %v592_v4, %v504_v41 }
  0xdd   : > { %v1096_v42 = vpack.c.bf16 %v678_v40, %v677_v39  ;;  %v663_v53 = vmax.f32 %v593_v45, 0.0 }
  0xde   : > { %v543_v43 = vpop.f32.mrf.mxu2  ;;  %v602_v48 = vpop.f32.mrf.mxu1 }
  0xdf   : > { %1132 = vst [vmem:[%s1320_s16 + $0x50] sm:$0xff] %v1096_v42   ;;  %v544_v52 = vadd.f32 %v1310_v46, %v543_v43 }
  0xe0   : > { %v505_v44 = vpop.f32.mrf.mxu0 }
  0xe1   : > { %v506_v47 = vadd.f32 %v1310_v46, %v505_v44  ;;  %v633_v57 = vadd.f32 %v632_v22, %v544_v52 }
  0xe3   : > { %v595_v50 = vadd.f32 %v594_v15, %v506_v47  ;;  %v679_v63 = vmax.f32 %v633_v57, 0.0  ;;  %v642_v15 = vpop.f32.mrf.mxu3 }
  0xe5   : > { %v664_v54 = vmax.f32 %v595_v50, 0.0 }
  0xe6   : > { %v545_v56 = vpop.f32.mrf.mxu2  ;;  %v604_v61 = vpop.f32.mrf.mxu1 }
  0xe7   : > { %v1061_v55 = vpack.c.bf16 %v664_v54, %v663_v53  ;;  %v546_v58 = vadd.f32 %v1310_v46, %v545_v56 }
  0xe8   : > { %v508_v60 = vpop.f32.mrf.mxu0 }
  0xe9   : > { %1125 = vst [vmem:[%s1320_s16 + $0x18] sm:$0xff] %v1061_v55   ;;  %v635_v62 = vadd.f32 %v634_v37, %v546_v58  ;;  %v509_v1 = vadd.f32 %v1310_v46, %v508_v60  ;;  %v529_v60 = vadd.f32 %v1310_v46, %v1313_v49 }
  0xeb   : > { %v680_v0 = vmax.f32 %v635_v62, 0.0  ;;  %v598_v6 = vadd.f32 %v597_v26, %v509_v1  ;;  %v644_v30 = vpop.f32.mrf.mxu3 }
  0xed   : > { %v1101_v3 = vpack.c.bf16 %v680_v0, %v679_v63  ;;  %v665_v11 = vmax.f32 %v598_v6, 0.0  ;;  %v531_v63 = vadd.f32 %v1310_v46, %v1322_v59 }
  0xee   : > { %v548_v4 = vpop.f32.mrf.mxu2  ;;  %v607_v8 = vpop.f32.mrf.mxu1 }
  0xef   : > { %1133 = vst [vmem:[%s1320_s16 + $0x58] sm:$0xff] %v1101_v3   ;;  %v549_v10 = vadd.f32 %v1310_v46, %v548_v4 }
  0xf0   : > { %v510_v5 = vpop.f32.mrf.mxu0 }
  0xf1   : > { %v511_v7 = vadd.f32 %v1310_v46, %v510_v5  ;;  %v638_v16 = vadd.f32 %v637_v51, %v549_v10 }
  0xf3   : > { %v600_v9 = vadd.f32 %v599_v36, %v511_v7  ;;  %v681_v21 = vmax.f32 %v638_v16, 0.0  ;;  %v647_v42 = vpop.f32.mrf.mxu3 }
  0xf5   : > { %v666_v12 = vmax.f32 %v600_v9, 0.0 }
  0xf6   : > { %v550_v14 = vpop.f32.mrf.mxu2  ;;  %v609_v19 = vpop.f32.mrf.mxu1 }
  0xf7   : > { %v1066_v13 = vpack.c.bf16 %v666_v12, %v665_v11  ;;  %v551_v17 = vadd.f32 %v1310_v46, %v550_v14 }
  0xf8   : > { %v513_v18 = vpop.f32.mrf.mxu0 }
  0xf9   : > { %1126 = vst [vmem:[%s1320_s16 + $0x20] sm:$0xff] %v1066_v13   ;;  %v640_v20 = vadd.f32 %v639_v2, %v551_v17  ;;  %v514_v23 = vadd.f32 %v1310_v46, %v513_v18 }
  0xfb   : > { %v682_v22 = vmax.f32 %v640_v20, 0.0  ;;  %v603_v27 = vadd.f32 %v602_v48, %v514_v23  ;;  %v649_v58 = vpop.f32.mrf.mxu3 }
  0xfd   : > { %v1106_v24 = vpack.c.bf16 %v682_v22, %v681_v21  ;;  %v667_v33 = vmax.f32 %v603_v27, 0.0 }
  0xfe   : > { %v553_v25 = vpop.f32.mrf.mxu2  ;;  %v612_v29 = vpop.f32.mrf.mxu1 }
  0xff   : > { %1134 = vst [vmem:[%s1320_s16 + $0x60] sm:$0xff] %v1106_v24   ;;  %v554_v32 = vadd.f32 %v1310_v46, %v553_v25 }
 0x100   : > { %v515_v26 = vpop.f32.mrf.mxu0 }
 0x101   : > { %v516_v28 = vadd.f32 %v1310_v46, %v515_v26  ;;  %v643_v37 = vadd.f32 %v642_v15, %v554_v32 }
 0x103   : > { %v605_v31 = vadd.f32 %v604_v61, %v516_v28  ;;  %v683_v43 = vmax.f32 %v643_v37, 0.0  ;;  %v652_v59 = vpop.f32.mrf.mxu3 }
 0x105   : > { %v668_v34 = vmax.f32 %v605_v31, 0.0 }
 0x106   : > { %v555_v36 = vpop.f32.mrf.mxu2  ;;  %v614_v40 = vpop.f32.mrf.mxu1 }
 0x107   : > { %v1071_v35 = vpack.c.bf16 %v668_v34, %v667_v33  ;;  %v556_v38 = vadd.f32 %v1310_v46, %v555_v36 }
 0x108   : > { %v518_v39 = vpop.f32.mrf.mxu0 }
 0x109   : > { %1127 = vst [vmem:[%s1320_s16 + $0x28] sm:$0xff] %v1071_v35   ;;  %v645_v41 = vadd.f32 %v644_v30, %v556_v38  ;;  %v519_v45 = vadd.f32 %v1310_v46, %v518_v39 }
 0x10b   : > { %v684_v44 = vmax.f32 %v645_v41, 0.0  ;;  %v608_v51 = vadd.f32 %v607_v8, %v519_v45  ;;  %v654_v25 = vpop.f32.mrf.mxu3 }
 0x10d   : > { %v1111_v47 = vpack.c.bf16 %v684_v44, %v683_v43  ;;  %v669_v56 = vmax.f32 %v608_v51, 0.0 }
 0x10e   : > { %v558_v48 = vpop.f32.mrf.mxu2  ;;  %v617_v53 = vpop.f32.mrf.mxu1 }
 0x10f   : > { %1135 = vst [vmem:[%s1320_s16 + $0x68] sm:$0xff] %v1111_v47   ;;  %v559_v55 = vadd.f32 %v1310_v46, %v558_v48  ;;  %v618_v1 = vadd.f32 %v617_v53, %v529_v60 }
 0x110   : > { %v520_v50 = vpop.f32.mrf.mxu0 }
 0x111   : > { %v521_v52 = vadd.f32 %v1310_v46, %v520_v50  ;;  %v648_v0 = vadd.f32 %v647_v42, %v559_v55  ;;  %v673_v8 = vmax.f32 %v618_v1, 0.0 }
 0x113   : > { %v610_v54 = vadd.f32 %v609_v19, %v521_v52  ;;  %v685_v7 = vmax.f32 %v648_v0, 0.0 }
 0x115   : > { %v670_v57 = vmax.f32 %v610_v54, 0.0 }
 0x116   : > { %v560_v62 = vpop.f32.mrf.mxu2  ;;  %v619_v4 = vpop.f32.mrf.mxu1 }
 0x117   : > { %v1076_v61 = vpack.c.bf16 %v670_v57, %v669_v56  ;;  %v561_v2 = vadd.f32 %v1310_v46, %v560_v62  ;;  %v620_v6 = vadd.f32 %v619_v4, %v531_v63 }
 0x118   : > { %v523_v3 = vpop.f32.mrf.mxu0 }
 0x119   : > { %1128 = vst [vmem:[%s1320_s16 + $0x30] sm:$0xff] %v1076_v61   ;;  %v650_v5 = vadd.f32 %v649_v58, %v561_v2  ;;  %v674_v49 = vmax.f32 %v620_v6, 0.0  ;;  %v524_v10 = vadd.f32 %v1310_v46, %v523_v3 }
 0x11b   : > { %v686_v9 = vmax.f32 %v650_v5, 0.0  ;;  %v1086_v12 = vpack.c.bf16 %v674_v49, %v673_v8  ;;  %v613_v15 = vadd.f32 %v612_v29, %v524_v10 }
 0x11d   : > { %v1116_v11 = vpack.c.bf16 %v686_v9, %v685_v7  ;;  %1130 = vst [vmem:[%s1320_s16 + $0x40] sm:$0xff] %v1086_v12   ;;  %v671_v19 = vmax.f32 %v613_v15, 0.0 }
 0x11e   : > { %v563_v13 = vpop.f32.mrf.mxu2 }
 0x11f   : > { %1136 = vst [vmem:[%s1320_s16 + $0x70] sm:$0xff] %v1116_v11   ;;  %v564_v18 = vadd.f32 %v1310_v46, %v563_v13 }
 0x120   : > { %v525_v14 = vpop.f32.mrf.mxu0 }
 0x121   : > { %v526_v16 = vadd.f32 %v1310_v46, %v525_v14  ;;  %v653_v23 = vadd.f32 %v652_v59, %v564_v18 }
 0x123   : > { %v615_v17 = vadd.f32 %v614_v40, %v526_v16  ;;  %v687_v27 = vmax.f32 %v653_v23, 0.0 }
 0x125   : > { %v672_v20 = vmax.f32 %v615_v17, 0.0 }
 0x126   : > { %v565_v22 = vpop.f32.mrf.mxu2 }
 0x127   : > { %v1081_v21 = vpack.c.bf16 %v672_v20, %v671_v19  ;;  %v566_v24 = vadd.f32 %v1310_v46, %v565_v22 }
 0x129   : > { %1129 = vst [vmem:[%s1320_s16 + $0x38] sm:$0xff] %v1081_v21   ;;  %v655_v26 = vadd.f32 %v654_v25, %v566_v24 }
 0x12b   : > { %v688_v28 = vmax.f32 %v655_v26, 0.0 }
 0x12d   : > { %v1121_v29 = vpack.c.bf16 %v688_v28, %v687_v27 }
 0x12f   : > { %1137 = vst [vmem:[%s1320_s16 + $0x78] sm:$0xff] %v1121_v29  }
 0x130 PF: > { %s13_s12 = sadd.s32 1, %s1162_s12  }
 0x131   : > { %p10_p4 = scmp.ge.s32.totalorder %s13_s12, 4  }
 0x133   :  { %12 = sbr.rel (!%p10_p4) target bundleno = 1 (0x1), region = 62 }

// kernel: context_path_forward.17
= control target key start
LH: loop header
LB: loop body
LE: loop exit
PB: predicated region body
PF: predicated region fallthrough
CT: control target
= control target key end

     0   :  { %vm179_vm0 = vcmask 130048   ;;  %s740_s1 = inlined_call_operand.vmem [shape: bf16[144,128], index: 1, kind: input, shape index: {}]   ;;  %s741_s0 = inlined_call_operand.vmem [shape: bf16[128,144], index: 0, kind: input, shape index: {}]   ;;  %s742_s2 = inlined_call_operand.vmem [shape: f32[1,128], index: 2, kind: input, shape index: {}]   ;;  %s743_s3 = inlined_call_operand.vmem [shape: bf16[128,128], index: 3, kind: output, shape index: {}]  }
   0x1   :  { %v485_v0 = vld [vmem:[%s740_s1 + $0x38] sm:$0xff]  ;;  %v486_v1 = vld [vmem:[%s740_s1 + $0x40] sm:$0xff]  ;;  %v358_v3 = vld [vmem:[%s741_s0 + $0x8] sm:$0xf0] }
   0x2   :  { %v462_v2 = vld [vmem:[%s741_s0 + $0x4] sm:$0xf]  ;;  %204 = vmatpush.bf16.msra.mxu0 %v485_v0  ;;  %534 = vmatpush.bf16.msra.mxu2 %v485_v0  ;;  %v484_v5 = vld [vmem:[%s740_s1 + $0x30] sm:$0xff]  ;;  %v483_v6 = vld [vmem:[%s740_s1 + $0x28] sm:$0xff] }
   0x3   :  { %v361_v4 = vor.u32 %v462_v2, %v358_v3  ;;  %260 = vmatpush.bf16.msra.mxu1 %v486_v1  ;;  %542 = vmatpush.bf16.msra.mxu3 %v486_v1  ;;  %v472_v7 = vld [vmem:[%s741_s0 + $0x54] sm:$0xf]  ;;  %v398_v8 = vld [vmem:[%s741_s0 + $0x58] sm:$0xf0]  ;;  %v482_v10 = vld [vmem:[%s740_s1 + $0x20] sm:$0xff] }
   0x4   :  { %v401_v9 = vor.u32 %v472_v7, %v398_v8  ;;  %v481_v11 = vld [vmem:[%s740_s1 + $0x18] sm:$0xff]  ;;  %v464_v12 = vld [vmem:[%s741_s0 + $0x14] sm:$0xf]  ;;  %v479_v16 = vld [vmem:[%s740_s1 + $0x8] sm:$0xff] }
   0x5   :  { %v366_v13 = vld [vmem:[%s741_s0 + $0x18] sm:$0xf0]  ;;  %v480_v15 = vld [vmem:[%s740_s1 + $0x10] sm:$0xff]  ;;  %v474_v17 = vld [vmem:[%s741_s0 + $0x64] sm:$0xf] }
   0x6   :  { %454 = vmatmul.msk.bf16.vlgmr.msra.gmra.mxu1 %vm179_vm0, %v361_v4  ;;  %205 = vmatpush.bf16.msra.mxu0 %v484_v5  ;;  %v369_v14 = vor.u32 %v464_v12, %v366_v13  ;;  %v406_v18 = vld [vmem:[%s741_s0 + $0x68] sm:$0xf0]  ;;  %v478_v20 = vld [vmem:[%s740_s1] sm:$0xff]  ;;  %v463_v22 = vld [vmem:[%s741_s0 + $0x4] sm:$0xf0] }
   0x7   :  { %535 = vmatpush.bf16.msra.mxu2 %v484_v5  ;;  %459 = vmatmul.msk.bf16.vlgmr.msra.gmra.mxu3 %vm179_vm0, %v401_v9  ;;  %v409_v19 = vor.u32 %v474_v17, %v406_v18  ;;  %v356_v21 = vld [vmem:[%s741_s0] sm:$0xf]  ;;  %v471_v24 = vld [vmem:[%s741_s0 + $0x44] sm:$0xf0]  ;;  %v466_v27 = vld [vmem:[%s741_s0 + $0x24] sm:$0xf] }
   0x8   :  { %v388_v23 = vld [vmem:[%s741_s0 + $0x40] sm:$0xf]  ;;  %v357_v25 = vor.u32 %v463_v22, %v356_v21  ;;  %v374_v28 = vld [vmem:[%s741_s0 + $0x28] sm:$0xf0]  ;;  %v476_v30 = vld [vmem:[%s741_s0 + $0x74] sm:$0xf] }
   0x9   :  { %v389_v26 = vor.u32 %v471_v24, %v388_v23  ;;  %v377_v29 = vor.u32 %v466_v27, %v374_v28  ;;  %v414_v31 = vld [vmem:[%s741_s0 + $0x78] sm:$0xf0]  ;;  %v364_v33 = vld [vmem:[%s741_s0 + $0x10] sm:$0xf]  ;;  %v465_v34 = vld [vmem:[%s741_s0 + $0x14] sm:$0xf0] }
   0xa   :  { %206 = vmatpush.bf16.msra.mxu0 %v483_v6  ;;  %v417_v32 = vor.u32 %v476_v30, %v414_v31  ;;  %v396_v35 = vld [vmem:[%s741_s0 + $0x50] sm:$0xf]  ;;  %v473_v36 = vld [vmem:[%s741_s0 + $0x54] sm:$0xf0]  ;;  %v365_v37 = vor.u32 %v465_v34, %v364_v33  ;;  %v468_v39 = vld [vmem:[%s741_s0 + $0x34] sm:$0xf] }
   0xb   :  { %536 = vmatpush.bf16.msra.mxu2 %v483_v6  ;;  %v397_v38 = vor.u32 %v473_v36, %v396_v35  ;;  %v382_v40 = vld [vmem:[%s741_s0 + $0x38] sm:$0xf0]  ;;  %v372_v42 = vld [vmem:[%s741_s0 + $0x20] sm:$0xf]  ;;  %v467_v43 = vld [vmem:[%s741_s0 + $0x24] sm:$0xf0] }
   0xc   :  { %v385_v41 = vor.u32 %v468_v39, %v382_v40  ;;  %v404_v44 = vld [vmem:[%s741_s0 + $0x60] sm:$0xf]  ;;  %v475_v45 = vld [vmem:[%s741_s0 + $0x64] sm:$0xf0]  ;;  %v373_v46 = vor.u32 %v467_v43, %v372_v42  ;;  %v470_v48 = vld [vmem:[%s741_s0 + $0x44] sm:$0xf] }
   0xd   :  { %v405_v47 = vor.u32 %v475_v45, %v404_v44  ;;  %v390_v49 = vld [vmem:[%s741_s0 + $0x48] sm:$0xf0]  ;;  %v380_v51 = vld [vmem:[%s741_s0 + $0x30] sm:$0xf]  ;;  %v469_v52 = vld [vmem:[%s741_s0 + $0x34] sm:$0xf0] }
   0xe   :  { %207 = vmatpush.bf16.msra.mxu0 %v482_v10  ;;  %v393_v50 = vor.u32 %v470_v48, %v390_v49  ;;  %v412_v53 = vld [vmem:[%s741_s0 + $0x70] sm:$0xf]  ;;  %v477_v54 = vld [vmem:[%s741_s0 + $0x74] sm:$0xf0]  ;;  %v381_v55 = vor.u32 %v469_v52, %v380_v51  ;;  %v698_v62 = vld [vmem:[%s742_s2] ss:$0 sm:$0xff] }
   0xf   :  { %537 = vmatpush.bf16.msra.mxu2 %v482_v10  ;;  %v413_v56 = vor.u32 %v477_v54, %v412_v53 }
  0x12   :  { %208 = vmatpush.bf16.msra.mxu0 %v481_v11 }
  0x13   :  { %538 = vmatpush.bf16.msra.mxu2 %v481_v11 }
  0x16   :  { %455 = vmatmul.msk.bf16.gmra.mxu1 %vm179_vm0, %v369_v14  ;;  %209 = vmatpush.bf16.msra.mxu0 %v480_v15 }
  0x17   :  { %539 = vmatpush.bf16.msra.mxu2 %v480_v15  ;;  %460 = vmatmul.msk.bf16.gmra.mxu3 %vm179_vm0, %v409_v19 }
  0x1a   :  { %210 = vmatpush.bf16.msra.mxu0 %v479_v16 }
  0x1b   :  { %540 = vmatpush.bf16.msra.mxu2 %v479_v16 }
  0x1e   :  { %211 = vmatpush.bf16.msra.mxu0 %v478_v20 }
  0x1f   :  { %541 = vmatpush.bf16.msra.mxu2 %v478_v20 }
  0x21   :  { %212 = vmatmul.bf16.vlgmr.msra.gmra.mxu0 %v357_v25 }
  0x22   :  { %232 = vmatmul.bf16.vlgmr.msra.gmra.mxu2 %v389_v26 }
  0x26   :  { %456 = vmatmul.msk.bf16.gmra.mxu1 %vm179_vm0, %v377_v29 }
  0x27   :  { %461 = vmatmul.msk.bf16.gmra.mxu3 %vm179_vm0, %v417_v32 }
  0x31   :  { %217 = vmatmul.bf16.gmra.mxu0 %v365_v37 }
  0x32   :  { %237 = vmatmul.bf16.gmra.mxu2 %v397_v38 }
  0x36   :  { %457 = vmatmul.msk.bf16.gmra.mxu1 %vm179_vm0, %v385_v41 }
  0x41   :  { %222 = vmatmul.bf16.gmra.mxu0 %v373_v46 }
  0x42   :  { %242 = vmatmul.bf16.gmra.mxu2 %v405_v47 }
  0x46   :  { %458 = vmatmul.msk.bf16.gmra.mxu1 %vm179_vm0, %v393_v50 }
  0x51   :  { %227 = vmatmul.bf16.gmra.mxu0 %v381_v55 }
  0x52   :  { %247 = vmatmul.bf16.gmra.mxu2 %v413_v56 }
  0x83   :  { %v262_v57 = vpop.f32.mrf.mxu1 }
  0x8a   :  { %v287_v11 = vpop.f32.mrf.mxu3 }
  0x8b   :  { %v264_v58 = vpop.f32.mrf.mxu1 }
  0x92   :  { %v289_v19 = vpop.f32.mrf.mxu3 }
  0x93   :  { %v267_v59 = vpop.f32.mrf.mxu1 }
  0x9a   :  { %v292_v31 = vpop.f32.mrf.mxu3 }
  0x9b   :  { %v269_v60 = vpop.f32.mrf.mxu1 }
  0x9e   :  { %v213_v61 = vpop.f32.mrf.mxu0 }
  0x9f   :  { %v214_v63 = vadd.f32 %v698_v62, %v213_v61 }
  0xa1   :  { %v263_v3 = vadd.f32 %v262_v57, %v214_v63 }
  0xa2   :  { %v294_v48 = vpop.f32.mrf.mxu3 }
  0xa3   :  { %v272_v0 = vpop.f32.mrf.mxu1  ;;  %v302_v6 = vmax.f32 %v263_v3, 0.0 }
  0xa5   :  { %v233_v1 = vpop.f32.mrf.mxu2 }
  0xa6   :  { %v215_v2 = vpop.f32.mrf.mxu0  ;;  %v234_v41 = vadd.f32 %v698_v62, %v233_v1 }
  0xa7   :  { %v216_v4 = vadd.f32 %v698_v62, %v215_v2 }
  0xa9   :  { %v265_v5 = vadd.f32 %v264_v58, %v216_v4 }
  0xaa   :  { %v297_v1 = vpop.f32.mrf.mxu3 }
  0xab   :  { %v303_v7 = vmax.f32 %v265_v5, 0.0  ;;  %v274_v8 = vpop.f32.mrf.mxu1 }
  0xad   :  { %v490_v9 = vpack.c.bf16 %v303_v7, %v302_v6  ;;  %v235_v10 = vpop.f32.mrf.mxu2 }
  0xae   :  { %v218_v12 = vpop.f32.mrf.mxu0  ;;  %v236_v43 = vadd.f32 %v698_v62, %v235_v10 }
  0xaf   :  { %491 = vst [vmem:[%s743_s3] sm:$0xff] %v490_v9   ;;  %v219_v13 = vadd.f32 %v698_v62, %v218_v12 }
  0xb1   :  { %v268_v17 = vadd.f32 %v267_v59, %v219_v13 }
  0xb3   :  { %v277_v14 = vpop.f32.mrf.mxu1  ;;  %v304_v22 = vmax.f32 %v268_v17, 0.0 }
  0xb5   :  { %v238_v15 = vpop.f32.mrf.mxu2 }
  0xb6   :  { %v220_v16 = vpop.f32.mrf.mxu0  ;;  %v239_v21 = vadd.f32 %v698_v62, %v238_v15  ;;  %v299_v15 = vpop.f32.mrf.mxu3 }
  0xb7   :  { %v221_v18 = vadd.f32 %v698_v62, %v220_v16 }
  0xb8   :  { %v288_v27 = vadd.f32 %v287_v11, %v239_v21 }
  0xb9   :  { %v270_v20 = vadd.f32 %v269_v60, %v221_v18 }
  0xba   :  { %v312_v32 = vmax.f32 %v288_v27, 0.0 }
  0xbb   :  { %v305_v23 = vmax.f32 %v270_v20, 0.0  ;;  %v279_v24 = vpop.f32.mrf.mxu1 }
  0xbd   :  { %v495_v25 = vpack.c.bf16 %v305_v23, %v304_v22  ;;  %v240_v26 = vpop.f32.mrf.mxu2 }
  0xbe   :  { %v241_v28 = vadd.f32 %v698_v62, %v240_v26  ;;  %v223_v29 = vpop.f32.mrf.mxu0 }
  0xbf   :  { %527 = vst [vmem:[%s743_s3 + $0x8] sm:$0xff] %v495_v25   ;;  %v224_v34 = vadd.f32 %v698_v62, %v223_v29 }
  0xc0   :  { %v290_v30 = vadd.f32 %v289_v19, %v241_v28 }
  0xc1   :  { %v273_v39 = vadd.f32 %v272_v0, %v224_v34 }
  0xc2   :  { %v313_v33 = vmax.f32 %v290_v30, 0.0 }
  0xc3   :  { %v282_v35 = vpop.f32.mrf.mxu1  ;;  %v306_v46 = vmax.f32 %v273_v39, 0.0 }
  0xc4   :  { %v515_v36 = vpack.c.bf16 %v313_v33, %v312_v32  ;;  %v283_v44 = vadd.f32 %v282_v35, %v234_v41 }
  0xc5   :  { %v243_v37 = vpop.f32.mrf.mxu2 }
  0xc6   :  { %531 = vst [vmem:[%s743_s3 + $0x28] sm:$0xff] %v515_v36   ;;  %v225_v38 = vpop.f32.mrf.mxu0  ;;  %v244_v45 = vadd.f32 %v698_v62, %v243_v37  ;;  %v310_v53 = vmax.f32 %v283_v44, 0.0 }
  0xc7   :  { %v226_v40 = vadd.f32 %v698_v62, %v225_v38 }
  0xc8   :  { %v293_v54 = vadd.f32 %v292_v31, %v244_v45 }
  0xc9   :  { %v275_v42 = vadd.f32 %v274_v8, %v226_v40 }
  0xca   :  { %v314_v60 = vmax.f32 %v293_v54, 0.0 }
  0xcb   :  { %v307_v47 = vmax.f32 %v275_v42, 0.0  ;;  %v284_v49 = vpop.f32.mrf.mxu1 }
  0xcc   :  { %v285_v50 = vadd.f32 %v284_v49, %v236_v43 }
  0xcd   :  { %v500_v51 = vpack.c.bf16 %v307_v47, %v306_v46  ;;  %v245_v52 = vpop.f32.mrf.mxu2 }
  0xce   :  { %v311_v55 = vmax.f32 %v285_v50, 0.0  ;;  %v246_v56 = vadd.f32 %v698_v62, %v245_v52  ;;  %v228_v57 = vpop.f32.mrf.mxu0 }
  0xcf   :  { %528 = vst [vmem:[%s743_s3 + $0x10] sm:$0xff] %v500_v51   ;;  %v229_v63 = vadd.f32 %v698_v62, %v228_v57 }
  0xd0   :  { %v510_v58 = vpack.c.bf16 %v311_v55, %v310_v53  ;;  %v295_v59 = vadd.f32 %v294_v48, %v246_v56 }
  0xd1   :  { %v278_v4 = vadd.f32 %v277_v14, %v229_v63 }
  0xd2   :  { %530 = vst [vmem:[%s743_s3 + $0x20] sm:$0xff] %v510_v58   ;;  %v315_v61 = vmax.f32 %v295_v59, 0.0 }
  0xd3   :  { %v308_v8 = vmax.f32 %v278_v4, 0.0 }
  0xd4   :  { %v520_v0 = vpack.c.bf16 %v315_v61, %v314_v60 }
  0xd5   :  { %v248_v2 = vpop.f32.mrf.mxu2 }
  0xd6   :  { %532 = vst [vmem:[%s743_s3 + $0x30] sm:$0xff] %v520_v0   ;;  %v230_v3 = vpop.f32.mrf.mxu0  ;;  %v249_v7 = vadd.f32 %v698_v62, %v248_v2 }
  0xd7   :  { %v231_v5 = vadd.f32 %v698_v62, %v230_v3 }
  0xd8   :  { %v298_v12 = vadd.f32 %v297_v1, %v249_v7 }
  0xd9   :  { %v280_v6 = vadd.f32 %v279_v24, %v231_v5 }
  0xda   :  { %v316_v17 = vmax.f32 %v298_v12, 0.0 }
  0xdb   :  { %v309_v9 = vmax.f32 %v280_v6, 0.0 }
  0xdd   :  { %v505_v10 = vpack.c.bf16 %v309_v9, %v308_v8  ;;  %v250_v11 = vpop.f32.mrf.mxu2 }
  0xde   :  { %v251_v13 = vadd.f32 %v698_v62, %v250_v11 }
  0xdf   :  { %529 = vst [vmem:[%s743_s3 + $0x18] sm:$0xff] %v505_v10  }
  0xe0   :  { %v300_v16 = vadd.f32 %v299_v15, %v251_v13 }
  0xe2   :  { %v317_v14 = vmax.f32 %v300_v16, 0.0 }
  0xe4   :  { %v525_v18 = vpack.c.bf16 %v317_v14, %v316_v17 }
  0xe6   :  { %533 = vst [vmem:[%s743_s3 + $0x38] sm:$0xff] %v525_v18  }

// kernel: context_path_forward.18
= control target key start
LH: loop header
LB: loop body
LE: loop exit
PB: predicated region body
PF: predicated region fallthrough
CT: control target
= control target key end

     0   :  { %vm201_vm0 = vcmask 261120   ;;  %s544_s1 = inlined_call_operand.vmem [shape: bf16[288,128], index: 1, kind: input, shape index: {}]   ;;  %s545_s0 = inlined_call_operand.vmem [shape: bf16[32,288], index: 0, kind: input, shape index: {}]   ;;  %s546_s2 = inlined_call_operand.vmem [shape: f32[1,128], index: 2, kind: input, shape index: {}]   ;;  %s547_s3 = inlined_call_operand.vmem [shape: bf16[32,128], index: 3, kind: output, shape index: {}]  }
   0x1   :  { %v392_v0 = vld [vmem:[%s544_s1 + $0x38] sm:$0xff]  ;;  %v391_v2 = vld [vmem:[%s544_s1 + $0x30] sm:$0xff]  ;;  %v402_v3 = vld [vmem:[%s544_s1 + $0x88] sm:$0xff] }
   0x2   :  { %v400_v1 = vld [vmem:[%s544_s1 + $0x78] sm:$0xff]  ;;  %208 = vmatpush.bf16.msra.mxu0 %v392_v0  ;;  %414 = vmatpush.bf16.msra.mxu3 %v392_v0  ;;  %v399_v4 = vld [vmem:[%s544_s1 + $0x70] sm:$0xff]  ;;  %v401_v5 = vld [vmem:[%s544_s1 + $0x80] sm:$0xff] }
   0x3   :  { %227 = vmatpush.bf16.msra.mxu1 %v400_v1  ;;  %252 = vmatpush.bf16.msra.mxu2 %v402_v3  ;;  %v291_v6 = vld [vmem:[%s545_s0 + $0x8] sm:$0xf]  ;;  %v381_v7 = vld [vmem:[%s545_s0 + $0x10] sm:$0xf0]  ;;  %v389_v11 = vld [vmem:[%s544_s1 + $0x20] sm:$0xff] }
   0x4   :  { %v390_v8 = vld [vmem:[%s544_s1 + $0x28] sm:$0xff]  ;;  %v292_v10 = vor.u32 %v381_v7, %v291_v6  ;;  %v397_v12 = vld [vmem:[%s544_s1 + $0x60] sm:$0xff]  ;;  %v388_v13 = vld [vmem:[%s544_s1 + $0x18] sm:$0xff] }
   0x5   :  { %v398_v9 = vld [vmem:[%s544_s1 + $0x68] sm:$0xff]  ;;  %v396_v14 = vld [vmem:[%s544_s1 + $0x58] sm:$0xff]  ;;  %v387_v15 = vld [vmem:[%s544_s1 + $0x10] sm:$0xff] }
   0x6   :  { %209 = vmatpush.bf16.msra.mxu0 %v391_v2  ;;  %415 = vmatpush.bf16.msra.mxu3 %v391_v2  ;;  %v395_v16 = vld [vmem:[%s544_s1 + $0x50] sm:$0xff]  ;;  %v303_v17 = vld [vmem:[%s545_s0 + $0x20] sm:$0xf]  ;;  %v384_v18 = vld [vmem:[%s545_s0 + $0x28] sm:$0xf0] }
   0x7   :  { %228 = vmatpush.bf16.msra.mxu1 %v399_v4  ;;  %253 = vmatpush.bf16.msra.mxu2 %v401_v5  ;;  %v386_v19 = vld [vmem:[%s544_s1 + $0x8] sm:$0xff]  ;;  %v304_v21 = vor.u32 %v384_v18, %v303_v17  ;;  %v385_v22 = vld [vmem:[%s544_s1] sm:$0xff]  ;;  %v295_v25 = vld [vmem:[%s545_s0 + $0x18] sm:$0xf] }
   0x8   :  { %v394_v20 = vld [vmem:[%s544_s1 + $0x48] sm:$0xff]  ;;  %v283_v23 = vld [vmem:[%s545_s0] sm:$0xf]  ;;  %v383_v26 = vld [vmem:[%s545_s0 + $0x20] sm:$0xf0] }
   0x9   :  { %v380_v24 = vld [vmem:[%s545_s0 + $0x8] sm:$0xf0]  ;;  %v393_v27 = vld [vmem:[%s544_s1 + $0x40] sm:$0xff]  ;;  %v285_v29 = vld [vmem:[%s545_s0 + $0xc] sm:$0xf0]  ;;  %v296_v31 = vor.u32 %v383_v26, %v295_v25 }
   0xa   :  { %210 = vmatpush.bf16.msra.mxu0 %v390_v8  ;;  %416 = vmatpush.bf16.msra.mxu3 %v390_v8  ;;  %v379_v28 = vld [vmem:[%s545_s0 + $0x4] sm:$0xf]  ;;  %v284_v30 = vor.u32 %v380_v24, %v283_v23  ;;  %v382_v33 = vld [vmem:[%s545_s0 + $0x1c] sm:$0xf]  ;;  %v297_v34 = vld [vmem:[%s545_s0 + $0x24] sm:$0xf0] }
   0xb   :  { %229 = vmatpush.bf16.msra.mxu1 %v398_v9  ;;  %377 = vmatmul.msk.bf16.vlgmr.msra.gmra.mxu2 %vm201_vm0, %v292_v10  ;;  %v288_v32 = vor.u32 %v379_v28, %v285_v29  ;;  %v300_v35 = vor.u32 %v382_v33, %v297_v34  ;;  %v422_v37 = vld [vmem:[%s546_s2] ss:$0 sm:$0xff] }
   0xe   :  { %211 = vmatpush.bf16.msra.mxu0 %v389_v11  ;;  %417 = vmatpush.bf16.msra.mxu3 %v389_v11 }
   0xf   :  { %230 = vmatpush.bf16.msra.mxu1 %v397_v12 }
  0x12   :  { %212 = vmatpush.bf16.msra.mxu0 %v388_v13  ;;  %418 = vmatpush.bf16.msra.mxu3 %v388_v13 }
  0x13   :  { %231 = vmatpush.bf16.msra.mxu1 %v396_v14 }
  0x16   :  { %213 = vmatpush.bf16.msra.mxu0 %v387_v15  ;;  %419 = vmatpush.bf16.msra.mxu3 %v387_v15 }
  0x17   :  { %232 = vmatpush.bf16.msra.mxu1 %v395_v16 }
  0x1a   :  { %214 = vmatpush.bf16.msra.mxu0 %v386_v19  ;;  %420 = vmatpush.bf16.msra.mxu3 %v386_v19 }
  0x1b   :  { %233 = vmatpush.bf16.msra.mxu1 %v394_v20  ;;  %378 = vmatmul.msk.bf16.gmra.mxu2 %vm201_vm0, %v304_v21 }
  0x1e   :  { %215 = vmatpush.bf16.msra.mxu0 %v385_v22  ;;  %421 = vmatpush.bf16.msra.mxu3 %v385_v22 }
  0x1f   :  { %234 = vmatpush.bf16.msra.mxu1 %v393_v27 }
  0x21   :  { %216 = vmatmul.bf16.vlgmr.msra.gmra.mxu0 %v284_v30  ;;  %221 = vmatmul.bf16.vlgmr.msra.gmra.mxu3 %v296_v31 }
  0x22   :  { %235 = vmatmul.bf16.vlgmr.msra.gmra.mxu1 %v288_v32 }
  0x32   :  { %240 = vmatmul.bf16.gmra.mxu1 %v300_v35 }
  0x8e   :  { %v255_v36 = vpop.f32.mrf.mxu2 }
  0x96   :  { %v257_v42 = vpop.f32.mrf.mxu2 }
  0x9e   :  { %v217_v38 = vpop.f32.mrf.mxu0  ;;  %v260_v53 = vpop.f32.mrf.mxu2 }
  0x9f   :  { %v236_v39 = vpop.f32.mrf.mxu1  ;;  %v218_v40 = vadd.f32 %v422_v37, %v217_v38 }
  0xa1   :  { %v237_v41 = vadd.f32 %v236_v39, %v218_v40 }
  0xa3   :  { %v256_v46 = vadd.f32 %v255_v36, %v237_v41 }
  0xa4   :  { %v222_v47 = vpop.f32.mrf.mxu3 }
  0xa5   :  { %v265_v50 = vmax.f32 %v256_v46, 0.0  ;;  %v223_v55 = vadd.f32 %v422_v37, %v222_v47 }
  0xa6   :  { %v219_v43 = vpop.f32.mrf.mxu0  ;;  %v262_v62 = vpop.f32.mrf.mxu2 }
  0xa7   :  { %v220_v44 = vadd.f32 %v422_v37, %v219_v43  ;;  %v238_v45 = vpop.f32.mrf.mxu1 }
  0xa9   :  { %v239_v48 = vadd.f32 %v238_v45, %v220_v44 }
  0xab   :  { %v258_v49 = vadd.f32 %v257_v42, %v239_v48 }
  0xac   :  { %v224_v56 = vpop.f32.mrf.mxu3 }
  0xad   :  { %v266_v51 = vmax.f32 %v258_v49, 0.0  ;;  %v225_v58 = vadd.f32 %v422_v37, %v224_v56 }
  0xaf   :  { %v406_v52 = vpack.c.bf16 %v266_v51, %v265_v50  ;;  %v241_v54 = vpop.f32.mrf.mxu1 }
  0xb0   :  { %v242_v57 = vadd.f32 %v241_v54, %v223_v55 }
  0xb1   :  { %407 = vst [vmem:[%s547_s3] sm:$0xff] %v406_v52  }
  0xb2   :  { %v261_v60 = vadd.f32 %v260_v53, %v242_v57 }
  0xb4   :  { %v267_v0 = vmax.f32 %v261_v60, 0.0 }
  0xb7   :  { %v243_v59 = vpop.f32.mrf.mxu1 }
  0xb8   :  { %v244_v61 = vadd.f32 %v243_v59, %v225_v58 }
  0xba   :  { %v263_v63 = vadd.f32 %v262_v62, %v244_v61 }
  0xbc   :  { %v268_v1 = vmax.f32 %v263_v63, 0.0 }
  0xbe   :  { %v411_v2 = vpack.c.bf16 %v268_v1, %v267_v0 }
  0xc0   :  { %413 = vst [vmem:[%s547_s3 + $0x8] sm:$0xff] %v411_v2  }

// kernel: context_path_forward.19
= control target key start
LH: loop header
LB: loop body
LE: loop exit
PB: predicated region body
PF: predicated region fallthrough
CT: control target
= control target key end

     0   :  { %vm258_vm0 = vcmask 392192   ;;  %s621_s1 = inlined_call_operand.vmem [shape: bf16[432,128], index: 1, kind: input, shape index: {}]   ;;  %s622_s0 = inlined_call_operand.vmem [shape: bf16[16,432], index: 0, kind: input, shape index: {}]   ;;  %s623_s2 = inlined_call_operand.vmem [shape: f32[1,128], index: 2, kind: input, shape index: {}]   ;;  %s624_s3 = inlined_call_operand.vmem [shape: bf16[16,128], index: 3, kind: output, shape index: {}]  }
   0x1   :  { %v464_v0 = vld [vmem:[%s621_s1 + $0x38] sm:$0xff]  ;;  %v463_v3 = vld [vmem:[%s621_s1 + $0x30] sm:$0xff]  ;;  %v462_v7 = vld [vmem:[%s621_s1 + $0x28] sm:$0xff] }
   0x2   :  { %v472_v1 = vld [vmem:[%s621_s1 + $0x78] sm:$0xff]  ;;  %262 = vmatpush.bf16.msra.mxu0 %v464_v0  ;;  %v471_v4 = vld [vmem:[%s621_s1 + $0x70] sm:$0xff]  ;;  %v470_v8 = vld [vmem:[%s621_s1 + $0x68] sm:$0xff] }
   0x3   :  { %v480_v2 = vld [vmem:[%s621_s1 + $0xb8] sm:$0xff]  ;;  %276 = vmatpush.bf16.msra.mxu1 %v472_v1  ;;  %v479_v5 = vld [vmem:[%s621_s1 + $0xb0] sm:$0xff]  ;;  %v478_v9 = vld [vmem:[%s621_s1 + $0xa8] sm:$0xff] }
   0x4   :  { %290 = vmatpush.bf16.msra.mxu2 %v480_v2  ;;  %v483_v6 = vld [vmem:[%s621_s1 + $0xd0] sm:$0xff]  ;;  %v482_v10 = vld [vmem:[%s621_s1 + $0xc8] sm:$0xff]  ;;  %v461_v11 = vld [vmem:[%s621_s1 + $0x20] sm:$0xff] }
   0x5   :  { %309 = vmatpush.bf16.msra.mxu3 %v483_v6  ;;  %v469_v12 = vld [vmem:[%s621_s1 + $0x60] sm:$0xff]  ;;  %v454_v15 = vld [vmem:[%s622_s0 + $0xc] sm:$0xf]  ;;  %v340_v16 = vld [vmem:[%s622_s0 + $0x18] sm:$0xf0] }
   0x6   :  { %263 = vmatpush.bf16.msra.mxu0 %v463_v3  ;;  %v477_v13 = vld [vmem:[%s621_s1 + $0xa0] sm:$0xff]  ;;  %v460_v17 = vld [vmem:[%s621_s1 + $0x18] sm:$0xff]  ;;  %v343_v20 = vor.u32 %v454_v15, %v340_v16  ;;  %v459_v21 = vld [vmem:[%s621_s1 + $0x10] sm:$0xff] }
   0x7   :  { %277 = vmatpush.bf16.msra.mxu1 %v471_v4  ;;  %v481_v14 = vld [vmem:[%s621_s1 + $0xc0] sm:$0xff]  ;;  %v468_v18 = vld [vmem:[%s621_s1 + $0x58] sm:$0xff]  ;;  %v467_v22 = vld [vmem:[%s621_s1 + $0x50] sm:$0xff] }
   0x8   :  { %291 = vmatpush.bf16.msra.mxu2 %v479_v5  ;;  %v476_v19 = vld [vmem:[%s621_s1 + $0x98] sm:$0xff]  ;;  %v475_v23 = vld [vmem:[%s621_s1 + $0x90] sm:$0xff]  ;;  %v458_v24 = vld [vmem:[%s621_s1 + $0x8] sm:$0xff] }
   0x9   :  { %310 = vmatpush.bf16.msra.mxu3 %v482_v10  ;;  %v466_v25 = vld [vmem:[%s621_s1 + $0x48] sm:$0xff]  ;;  %v457_v27 = vld [vmem:[%s621_s1] sm:$0xff]  ;;  %v455_v30 = vld [vmem:[%s622_s0 + $0xc] sm:$0xf0] }
   0xa   :  { %264 = vmatpush.bf16.msra.mxu0 %v462_v7  ;;  %v474_v26 = vld [vmem:[%s621_s1 + $0x88] sm:$0xff]  ;;  %v465_v28 = vld [vmem:[%s621_s1 + $0x40] sm:$0xff]  ;;  %v332_v32 = vld [vmem:[%s622_s0 + $0x10] sm:$0xf0] }
   0xb   :  { %278 = vmatpush.bf16.msra.mxu1 %v470_v8  ;;  %v330_v29 = vld [vmem:[%s622_s0] sm:$0xf]  ;;  %v453_v31 = vld [vmem:[%s622_s0 + $0x4] sm:$0xf]  ;;  %v338_v34 = vld [vmem:[%s622_s0 + $0x8] sm:$0xf] }
   0xc   :  { %292 = vmatpush.bf16.msra.mxu2 %v478_v9  ;;  %v473_v33 = vld [vmem:[%s621_s1 + $0x80] sm:$0xff]  ;;  %v456_v35 = vld [vmem:[%s622_s0 + $0x14] sm:$0xf0]  ;;  %v331_v36 = vor.u32 %v455_v30, %v330_v29  ;;  %v335_v37 = vor.u32 %v453_v31, %v332_v32 }
   0xd   :  { %311 = vmatpush.bf16.msra.mxu3 %v481_v14  ;;  %v339_v38 = vor.u32 %v456_v35, %v338_v34  ;;  %v489_v39 = vld [vmem:[%s623_s2] ss:$0 sm:$0xff] }
   0xe   :  { %265 = vmatpush.bf16.msra.mxu0 %v461_v11 }
   0xf   :  { %279 = vmatpush.bf16.msra.mxu1 %v469_v12 }
  0x10   :  { %293 = vmatpush.bf16.msra.mxu2 %v477_v13  ;;  %452 = vmatmul.msk.bf16.vlgmr.msra.gmra.mxu3 %vm258_vm0, %v343_v20 }
  0x12   :  { %266 = vmatpush.bf16.msra.mxu0 %v460_v17 }
  0x13   :  { %280 = vmatpush.bf16.msra.mxu1 %v468_v18 }
  0x14   :  { %294 = vmatpush.bf16.msra.mxu2 %v476_v19 }
  0x16   :  { %267 = vmatpush.bf16.msra.mxu0 %v459_v21 }
  0x17   :  { %281 = vmatpush.bf16.msra.mxu1 %v467_v22 }
  0x18   :  { %295 = vmatpush.bf16.msra.mxu2 %v475_v23 }
  0x1a   :  { %268 = vmatpush.bf16.msra.mxu0 %v458_v24 }
  0x1b   :  { %282 = vmatpush.bf16.msra.mxu1 %v466_v25 }
  0x1c   :  { %296 = vmatpush.bf16.msra.mxu2 %v474_v26 }
  0x1e   :  { %269 = vmatpush.bf16.msra.mxu0 %v457_v27 }
  0x1f   :  { %283 = vmatpush.bf16.msra.mxu1 %v465_v28 }
  0x20   :  { %297 = vmatpush.bf16.msra.mxu2 %v473_v33 }
  0x21   :  { %270 = vmatmul.bf16.vlgmr.msra.gmra.mxu0 %v331_v36 }
  0x22   :  { %284 = vmatmul.bf16.vlgmr.msra.gmra.mxu1 %v335_v37 }
  0x23   :  { %298 = vmatmul.bf16.vlgmr.msra.gmra.mxu2 %v339_v38 }
  0x93   :  { %v313_v43 = vpop.f32.mrf.mxu3 }
  0x9b   :  { %v315_v54 = vpop.f32.mrf.mxu3 }
  0x9e   :  { %v271_v40 = vpop.f32.mrf.mxu0 }
  0x9f   :  { %v285_v41 = vpop.f32.mrf.mxu1  ;;  %v272_v42 = vadd.f32 %v489_v39, %v271_v40 }
  0xa1   :  { %v286_v45 = vadd.f32 %v285_v41, %v272_v42 }
  0xa6   :  { %v299_v44 = vpop.f32.mrf.mxu2  ;;  %v273_v46 = vpop.f32.mrf.mxu0 }
  0xa7   :  { %v274_v47 = vadd.f32 %v489_v39, %v273_v46  ;;  %v300_v48 = vadd.f32 %v299_v44, %v286_v45  ;;  %v287_v49 = vpop.f32.mrf.mxu1 }
  0xa9   :  { %v288_v50 = vadd.f32 %v287_v49, %v274_v47  ;;  %v314_v52 = vadd.f32 %v313_v43, %v300_v48 }
  0xab   :  { %v318_v56 = vmax.f32 %v314_v52, 0.0 }
  0xae   :  { %v301_v51 = vpop.f32.mrf.mxu2 }
  0xaf   :  { %v302_v53 = vadd.f32 %v301_v51, %v288_v50 }
  0xb1   :  { %v316_v55 = vadd.f32 %v315_v54, %v302_v53 }
  0xb3   :  { %v319_v57 = vmax.f32 %v316_v55, 0.0 }
  0xb5   :  { %v487_v58 = vpack.c.bf16 %v319_v57, %v318_v56 }
  0xb7   :  { %488 = vst [vmem:[%s624_s3] sm:$0xff] %v487_v58  }

// kernel: context_path_forward.24
= control target key start
LH: loop header
LB: loop body
LE: loop exit
PB: predicated region body
PF: predicated region fallthrough
CT: control target
= control target key end

     0   :  { %vm58_vm0 = vcmask 523264   ;;  %s155_s1 = inlined_call_operand.vmem [shape: bf16[64,128], index: 1, kind: input, shape index: {}]   ;;  %s156_s2 = inlined_call_operand.vmem [shape: f32[1,128], index: 2, kind: input, shape index: {}]   ;;  %s157_s0 = inlined_call_operand.vmem [shape: bf16[16,64], index: 0, kind: input, shape index: {}]   ;;  %s158_s3 = inlined_call_operand.vmem [shape: f32[16,128], index: 3, kind: output, shape index: {}]  }
   0x1   :  { %v109_v0 = vld [vmem:[%s155_s1 + $0x18] sm:$0xff]  ;;  %v108_v1 = vld [vmem:[%s155_s1 + $0x10] sm:$0xff]  ;;  %v107_v2 = vld [vmem:[%s155_s1 + $0x8] sm:$0xff] }
   0x2   :  { %66 = vmatpush.bf16.msra.mxu0 %v109_v0  ;;  %v106_v3 = vld [vmem:[%s155_s1] sm:$0xff] }
   0x3   :  { %v105_v4 = vld [vmem:[%s157_s0] sm:$0xff] }
   0x4   :  { %v110_v5 = vld [vmem:[%s156_s2] ss:$0 sm:$0xff] }
   0x6   :  { %67 = vmatpush.bf16.msra.mxu0 %v108_v1 }
   0xa   :  { %68 = vmatpush.bf16.msra.mxu0 %v107_v2 }
   0xe   :  { %69 = vmatpush.bf16.msra.mxu0 %v106_v3 }
  0x11   :  { %104 = vmatmul.msk.bf16.vlgmr.msra.gmra.mxu0 %vm58_vm0, %v105_v4 }
  0x8e   :  { %v71_v6 = vpop.f32.mrf.mxu0 }
  0x8f   :  { %v72_v7 = vadd.f32 %v110_v5, %v71_v6 }
  0x91   :  { %v76_v8 = vmax.f32 %v72_v7, 0.0 }
  0x93   :  { %78 = vst [vmem:[%s158_s3] sm:$0xff] %v76_v8 }
  0x96   :  { %v73_v9 = vpop.f32.mrf.mxu0 }
  0x97   :  { %v74_v10 = vadd.f32 %v110_v5, %v73_v9 }
  0x99   :  { %v77_v11 = vmax.f32 %v74_v10, 0.0 }
  0x9b   :  { %79 = vst [vmem:[%s158_s3 + $0x8] sm:$0xff] %v77_v11 }

// kernel: context_path_forward.23
= control target key start
LH: loop header
LB: loop body
LE: loop exit
PB: predicated region body
PF: predicated region fallthrough
CT: control target
= control target key end

     0   :  { %s260_s1 = inlined_call_operand.vmem [shape: bf16[128,128], index: 1, kind: input, shape index: {}]   ;;  %s261_s2 = inlined_call_operand.vmem [shape: f32[1,128], index: 2, kind: input, shape index: {}]   ;;  %s262_s0 = inlined_call_operand.vmem [shape: bf16[16,128], index: 0, kind: input, shape index: {}]   ;;  %s263_s3 = inlined_call_operand.vmem [shape: f32[16,128], index: 3, kind: output, shape index: {}]  }
   0x1   :  { %v194_v0 = vld [vmem:[%s260_s1 + $0x38] sm:$0xff]  ;;  %v193_v1 = vld [vmem:[%s260_s1 + $0x30] sm:$0xff]  ;;  %v192_v2 = vld [vmem:[%s260_s1 + $0x28] sm:$0xff] }
   0x2   :  { %90 = vmatpush.bf16.msra.mxu0 %v194_v0  ;;  %v191_v3 = vld [vmem:[%s260_s1 + $0x20] sm:$0xff]  ;;  %v190_v4 = vld [vmem:[%s260_s1 + $0x18] sm:$0xff]  ;;  %v189_v5 = vld [vmem:[%s260_s1 + $0x10] sm:$0xff] }
   0x3   :  { %v188_v6 = vld [vmem:[%s260_s1 + $0x8] sm:$0xff]  ;;  %v187_v7 = vld [vmem:[%s260_s1] sm:$0xff] }
   0x4   :  { %v186_v8 = vld [vmem:[%s262_s0] sm:$0xff] }
   0x5   :  { %v195_v9 = vld [vmem:[%s261_s2] ss:$0 sm:$0xff] }
   0x6   :  { %91 = vmatpush.bf16.msra.mxu0 %v193_v1 }
   0xa   :  { %92 = vmatpush.bf16.msra.mxu0 %v192_v2 }
   0xe   :  { %93 = vmatpush.bf16.msra.mxu0 %v191_v3 }
  0x12   :  { %94 = vmatpush.bf16.msra.mxu0 %v190_v4 }
  0x16   :  { %95 = vmatpush.bf16.msra.mxu0 %v189_v5 }
  0x1a   :  { %96 = vmatpush.bf16.msra.mxu0 %v188_v6 }
  0x1e   :  { %97 = vmatpush.bf16.msra.mxu0 %v187_v7 }
  0x21   :  { %98 = vmatmul.bf16.vlgmr.msra.gmra.mxu0 %v186_v8 }
  0x9e   :  { %v99_v10 = vpop.f32.mrf.mxu0 }
  0x9f   :  { %v100_v11 = vadd.f32 %v195_v9, %v99_v10 }
  0xa1   :  { %v184_v12 = vmul.f32 -1.442695, %v100_v11 }
  0xa3   :  { %196 = vpow2.f32 %v184_v12 }
  0xa6   :  { %v101_v13 = vpop.f32.mrf.mxu0 }
  0xa7   :  { %v102_v14 = vadd.f32 %v195_v9, %v101_v13 }
  0xa9   :  { %v197_v15 = vpop.eup %196  ;;  %v185_v16 = vmul.f32 -1.442695, %v102_v14 }
  0xaa   :  { %v110_v17 = vadd.f32 1.0, %v197_v15 }
  0xab   :  { %198 = vpow2.f32 %v185_v16 }
  0xac   :  { %200 = vrcp.f32 %v110_v17  ;;  %v123_v23 = vand.u32 2147483648, %v110_v17  ;;  %v121_v25 = vand.u32 2147483647, %v110_v17  ;;  %vm117_vm1 = vweird.f32 %v110_v17 }
  0xae   :  { %v124_v28 = vor.u32 1.1754944e-38, %v123_v23  ;;  %vm122_vm3 = vcmp.eq.f32.partialorder %v121_v25, 8.507059e+37 }
  0xb1   :  { %v199_v18 = vpop.eup %198 }
  0xb2   :  { %v201_v19 = vpop.eup %200  ;;  %v111_v20 = vadd.f32 1.0, %v199_v18 }
  0xb3   :  { %v113_v21 = vmul.f32 %v201_v19, %v110_v17  ;;  %vm118_vm0 = vweird.f32 %v201_v19 }
  0xb4   :  { %202 = vrcp.f32 %v111_v20  ;;  %vm119_vm2 = vmor %vm117_vm1, %vm118_vm0  ;;  %v138_v33 = vand.u32 2147483648, %v111_v20  ;;  %v136_v35 = vand.u32 2147483647, %v111_v20  ;;  %vm132_vm5 = vweird.f32 %v111_v20 }
  0xb5   :  { %v114_v22 = vsub.f32 1.0, %v113_v21 }
  0xb6   :  { %v139_v37 = vor.u32 1.1754944e-38, %v138_v33  ;;  %vm137_vm7 = vcmp.eq.f32.partialorder %v136_v35, 8.507059e+37 }
  0xb7   :  { %v115_v24 = vmul.f32 %v201_v19, %v114_v22 }
  0xb9   :  { %v116_v26 = vadd.f32 %v201_v19, %v115_v24 }
  0xba   :  { %v203_v27 = vpop.eup %202 }
  0xbb   :  { %v120_v29 = vsel %vm119_vm2, %v201_v19, %v116_v26  ;;  %v128_v30 = vmul.f32 %v203_v27, %v111_v20  ;;  %vm133_vm4 = vweird.f32 %v203_v27 }
  0xbc   :  { %v125_v31 = vsel %vm122_vm3, %v124_v28, %v120_v29  ;;  %vm134_vm6 = vmor %vm132_vm5, %vm133_vm4 }
  0xbd   :  { %142 = vst [vmem:[%s263_s3] sm:$0xff] %v125_v31  ;;  %v129_v32 = vsub.f32 1.0, %v128_v30 }
  0xbf   :  { %v130_v34 = vmul.f32 %v203_v27, %v129_v32 }
  0xc1   :  { %v131_v36 = vadd.f32 %v203_v27, %v130_v34 }
  0xc3   :  { %v135_v38 = vsel %vm134_vm6, %v203_v27, %v131_v36 }
  0xc4   :  { %v140_v39 = vsel %vm137_vm7, %v139_v37, %v135_v38 }
  0xc5   :  { %143 = vst [vmem:[%s263_s3 + $0x8] sm:$0xff] %v140_v39 }

// kernel: context_path_forward.22
= control target key start
LH: loop header
LB: loop body
LE: loop exit
PB: predicated region body
PF: predicated region fallthrough
CT: control target
= control target key end

     0   :  { %vm338_vm0 = vcmask 523264   ;;  %s798_s1 = inlined_call_operand.vmem [shape: bf16[576,128], index: 1, kind: input, shape index: {}]   ;;  %s799_s2 = inlined_call_operand.vmem [shape: f32[1,128], index: 2, kind: input, shape index: {}]   ;;  %s800_s0 = inlined_call_operand.vmem [shape: bf16[16,576], index: 0, kind: input, shape index: {}]   ;;  %s801_s3 = inlined_call_operand.vmem [shape: bf16[16,128], index: 3, kind: output, shape index: {}]  }
   0x1   :  { %v599_v0 = vld [vmem:[%s798_s1 + $0x38] sm:$0xff]  ;;  %v598_v4 = vld [vmem:[%s798_s1 + $0x30] sm:$0xff]  ;;  %v597_v8 = vld [vmem:[%s798_s1 + $0x28] sm:$0xff] }
   0x2   :  { %v615_v1 = vld [vmem:[%s798_s1 + $0xb8] sm:$0xff]  ;;  %342 = vmatpush.bf16.msra.mxu0 %v599_v0  ;;  %v614_v5 = vld [vmem:[%s798_s1 + $0xb0] sm:$0xff]  ;;  %v613_v9 = vld [vmem:[%s798_s1 + $0xa8] sm:$0xff] }
   0x3   :  { %v623_v2 = vld [vmem:[%s798_s1 + $0xf8] sm:$0xff]  ;;  %370 = vmatpush.bf16.msra.mxu2 %v615_v1  ;;  %v622_v6 = vld [vmem:[%s798_s1 + $0xf0] sm:$0xff]  ;;  %v621_v10 = vld [vmem:[%s798_s1 + $0xe8] sm:$0xff] }
   0x4   :  { %v607_v3 = vld [vmem:[%s798_s1 + $0x78] sm:$0xff]  ;;  %384 = vmatpush.bf16.msra.mxu3 %v623_v2  ;;  %v606_v7 = vld [vmem:[%s798_s1 + $0x70] sm:$0xff]  ;;  %v605_v11 = vld [vmem:[%s798_s1 + $0x68] sm:$0xff] }
   0x5   :  { %356 = vmatpush.bf16.msra.mxu1 %v607_v3  ;;  %v596_v12 = vld [vmem:[%s798_s1 + $0x20] sm:$0xff]  ;;  %v595_v16 = vld [vmem:[%s798_s1 + $0x18] sm:$0xff]  ;;  %v594_v20 = vld [vmem:[%s798_s1 + $0x10] sm:$0xff] }
   0x6   :  { %343 = vmatpush.bf16.msra.mxu0 %v598_v4  ;;  %v612_v13 = vld [vmem:[%s798_s1 + $0xa0] sm:$0xff]  ;;  %v611_v17 = vld [vmem:[%s798_s1 + $0x98] sm:$0xff]  ;;  %v610_v21 = vld [vmem:[%s798_s1 + $0x90] sm:$0xff] }
   0x7   :  { %371 = vmatpush.bf16.msra.mxu2 %v614_v5  ;;  %v620_v14 = vld [vmem:[%s798_s1 + $0xe0] sm:$0xff]  ;;  %v619_v18 = vld [vmem:[%s798_s1 + $0xd8] sm:$0xff]  ;;  %v618_v22 = vld [vmem:[%s798_s1 + $0xd0] sm:$0xff] }
   0x8   :  { %385 = vmatpush.bf16.msra.mxu3 %v622_v6  ;;  %v604_v15 = vld [vmem:[%s798_s1 + $0x60] sm:$0xff]  ;;  %v603_v19 = vld [vmem:[%s798_s1 + $0x58] sm:$0xff]  ;;  %v602_v23 = vld [vmem:[%s798_s1 + $0x50] sm:$0xff] }
   0x9   :  { %357 = vmatpush.bf16.msra.mxu1 %v606_v7  ;;  %v593_v24 = vld [vmem:[%s798_s1 + $0x8] sm:$0xff]  ;;  %v592_v28 = vld [vmem:[%s798_s1] sm:$0xff]  ;;  %v589_v33 = vld [vmem:[%s800_s0 + $0x10] sm:$0xf0] }
   0xa   :  { %344 = vmatpush.bf16.msra.mxu0 %v597_v8  ;;  %v609_v25 = vld [vmem:[%s798_s1 + $0x88] sm:$0xff]  ;;  %v608_v29 = vld [vmem:[%s798_s1 + $0x80] sm:$0xff]  ;;  %v590_v35 = vld [vmem:[%s800_s0 + $0x18] sm:$0xf0] }
   0xb   :  { %372 = vmatpush.bf16.msra.mxu2 %v613_v9  ;;  %v617_v26 = vld [vmem:[%s798_s1 + $0xc8] sm:$0xff]  ;;  %v616_v30 = vld [vmem:[%s798_s1 + $0xc0] sm:$0xff]  ;;  %v426_v39 = vld [vmem:[%s800_s0 + $0x14] sm:$0xf0] }
   0xc   :  { %386 = vmatpush.bf16.msra.mxu3 %v621_v10  ;;  %v601_v27 = vld [vmem:[%s798_s1 + $0x48] sm:$0xff]  ;;  %v600_v31 = vld [vmem:[%s798_s1 + $0x40] sm:$0xff]  ;;  %v627_v40 = vld [vmem:[%s798_s1 + $0x118] sm:$0xff] }
   0xd   :  { %358 = vmatpush.bf16.msra.mxu1 %v605_v11  ;;  %v424_v32 = vld [vmem:[%s800_s0] sm:$0xf]  ;;  %v432_v34 = vld [vmem:[%s800_s0 + $0x8] sm:$0xf]  ;;  %v588_v36 = vld [vmem:[%s800_s0 + $0xc] sm:$0xf] }
   0xe   :  { %345 = vmatpush.bf16.msra.mxu0 %v596_v12  ;;  %v434_v37 = vld [vmem:[%s800_s0 + $0x1c] sm:$0xf0]  ;;  %v587_v38 = vld [vmem:[%s800_s0 + $0x4] sm:$0xf]  ;;  %v425_v41 = vor.u32 %v589_v33, %v424_v32  ;;  %v433_v42 = vor.u32 %v590_v35, %v432_v34  ;;  %v626_v45 = vld [vmem:[%s798_s1 + $0x110] sm:$0xff] }
   0xf   :  { %373 = vmatpush.bf16.msra.mxu2 %v612_v13  ;;  %v437_v43 = vor.u32 %v588_v36, %v434_v37  ;;  %v429_v44 = vor.u32 %v587_v38, %v426_v39  ;;  %v625_v46 = vld [vmem:[%s798_s1 + $0x108] sm:$0xff]  ;;  %v624_v47 = vld [vmem:[%s798_s1 + $0x100] sm:$0xff]  ;;  %v440_v48 = vld [vmem:[%s800_s0 + $0x10] sm:$0xf] }
  0x10   :  { %387 = vmatpush.bf16.msra.mxu3 %v620_v14  ;;  %v591_v49 = vld [vmem:[%s800_s0 + $0x20] sm:$0xf0]  ;;  %v633_v54 = vld [vmem:[%s799_s2] ss:$0 sm:$0xff] }
  0x11   :  { %359 = vmatpush.bf16.msra.mxu1 %v604_v15  ;;  %v441_v50 = vor.u32 %v591_v49, %v440_v48 }
  0x12   :  { %346 = vmatpush.bf16.msra.mxu0 %v595_v16 }
  0x13   :  { %374 = vmatpush.bf16.msra.mxu2 %v611_v17 }
  0x14   :  { %388 = vmatpush.bf16.msra.mxu3 %v619_v18 }
  0x15   :  { %360 = vmatpush.bf16.msra.mxu1 %v603_v19 }
  0x16   :  { %347 = vmatpush.bf16.msra.mxu0 %v594_v20 }
  0x17   :  { %375 = vmatpush.bf16.msra.mxu2 %v610_v21 }
  0x18   :  { %389 = vmatpush.bf16.msra.mxu3 %v618_v22 }
  0x19   :  { %361 = vmatpush.bf16.msra.mxu1 %v602_v23 }
  0x1a   :  { %348 = vmatpush.bf16.msra.mxu0 %v593_v24 }
  0x1b   :  { %376 = vmatpush.bf16.msra.mxu2 %v609_v25 }
  0x1c   :  { %390 = vmatpush.bf16.msra.mxu3 %v617_v26 }
  0x1d   :  { %362 = vmatpush.bf16.msra.mxu1 %v601_v27 }
  0x1e   :  { %349 = vmatpush.bf16.msra.mxu0 %v592_v28 }
  0x1f   :  { %377 = vmatpush.bf16.msra.mxu2 %v608_v29 }
  0x20   :  { %391 = vmatpush.bf16.msra.mxu3 %v616_v30 }
  0x21   :  { %363 = vmatpush.bf16.msra.mxu1 %v600_v31  ;;  %350 = vmatmul.bf16.vlgmr.msra.gmra.mxu0 %v425_v41 }
  0x22   :  { %402 = vmatpush.bf16.msrb.mxu0 %v627_v40  ;;  %378 = vmatmul.bf16.vlgmr.msra.gmra.mxu2 %v433_v42 }
  0x23   :  { %392 = vmatmul.bf16.vlgmr.msra.gmra.mxu3 %v437_v43 }
  0x24   :  { %364 = vmatmul.bf16.vlgmr.msra.gmra.mxu1 %v429_v44 }
  0x26   :  { %403 = vmatpush.bf16.msrb.mxu0 %v626_v45 }
  0x2a   :  { %404 = vmatpush.bf16.msrb.mxu0 %v625_v46 }
  0x2e   :  { %405 = vmatpush.bf16.msrb.mxu0 %v624_v47 }
  0x31   :  { %586 = vmatmul.msk.bf16.vlgmr.msrb.gmra.mxu0 %vm338_vm0, %v441_v50 }
  0x9e   :  { %v351_v51 = vpop.f32.mrf.mxu0 }
  0x9f   :  { %v352_v56 = vadd.f32 %v633_v54, %v351_v51 }
  0xa1   :  { %v365_v52 = vpop.f32.mrf.mxu1 }
  0xa2   :  { %v366_v60 = vadd.f32 %v365_v52, %v352_v56 }
  0xa5   :  { %v379_v53 = vpop.f32.mrf.mxu2 }
  0xa6   :  { %v353_v55 = vpop.f32.mrf.mxu0  ;;  %v393_v57 = vpop.f32.mrf.mxu3  ;;  %v380_v63 = vadd.f32 %v379_v53, %v366_v60 }
  0xa7   :  { %v354_v58 = vadd.f32 %v633_v54, %v353_v55 }
  0xa8   :  { %v394_v2 = vadd.f32 %v393_v57, %v380_v63 }
  0xa9   :  { %v367_v59 = vpop.f32.mrf.mxu1 }
  0xaa   :  { %v368_v0 = vadd.f32 %v367_v59, %v354_v58 }
  0xad   :  { %v381_v61 = vpop.f32.mrf.mxu2 }
  0xae   :  { %v407_v62 = vpop.f32.mrf.mxu0  ;;  %v382_v1 = vadd.f32 %v381_v61, %v368_v0  ;;  %v395_v3 = vpop.f32.mrf.mxu3 }
  0xaf   :  { %v408_v5 = vadd.f32 %v407_v62, %v394_v2 }
  0xb0   :  { %v396_v4 = vadd.f32 %v395_v3, %v382_v1 }
  0xb1   :  { %v412_v8 = vmax.f32 %v408_v5, 0.0 }
  0xb6   :  { %v409_v6 = vpop.f32.mrf.mxu0 }
  0xb7   :  { %v410_v7 = vadd.f32 %v409_v6, %v396_v4 }
  0xb9   :  { %v413_v9 = vmax.f32 %v410_v7, 0.0 }
  0xbb   :  { %v631_v10 = vpack.c.bf16 %v413_v9, %v412_v8 }
  0xbd   :  { %632 = vst [vmem:[%s801_s3] sm:$0xff] %v631_v10  }

// kernel: context_path_forward.25
= control target key start
LH: loop header
LB: loop body
LE: loop exit
PB: predicated region body
PF: predicated region fallthrough
CT: control target
= control target key end

     0   :  { %s448_s12 = smov 0   ;;  %s450_s13 = smov 0   ;;  %s484_s0 = inlined_call_operand.vmem [shape: bf16[2,16,128], index: 0, kind: input, shape index: {}]   ;;  %s485_s1 = inlined_call_operand.vmem [shape: f32[2,1,128], index: 1, kind: input, shape index: {}]   ;;  %s486_s2 = inlined_call_operand.vmem [shape: f32[2,1,128], index: 2, kind: input, shape index: {}]   ;;  %s487_s3 = inlined_call_operand.vmem [shape: f32[2,16,128], index: 3, kind: output, shape index: {}]  }
   0x1   :  { %s452_s14 = smov 0  }
   0x2 LB: > { %s25_s15 = sadd.s32 1, %s422_s13  ;;  %p365_p0 = scmp.ge.s32.totalorder %s426_s14, 1  ;;  %s426_s14 = sphi %s452_s14, %s13_s14   ;;  %s422_s13 = sphi %s450_s13, %s489_s13   ;;  %s418_s12 = sphi %s448_s12, %s488_s12  }
   0x3   : > { %p27_p1 = scmp.ge.s32.totalorder %s25_s15, 2  ;;  %p174_p2 = scmp.lt.s32.totalorder %s426_s14, 3 }
   0x5   : > { %s491_s15 = smov (%p27_p1, %s25_s15), 0  ;;  %p175_p3 = pnand %p365_p0, %p174_p2 }
   0x6   : > { %p213_p4 = scmp.lt.s32.totalorder (!%p175_p3), %s418_s12, 1 }
   0x7   : > { %178 = sbr.rel (%p175_p3) target bundleno = 24 (0x18), region = 32 }
   0xc   : > { %s493_s12 = smov (!%p213_p4, %s418_s12), 1 }
   0xd   : > { %s372_s16 = sshll.u32 %s493_s12, 3  ;;  %s224_s19 = scalar_lea.vmem %s485_s1, %s493_s12 }
   0xe   : > { %s220_s22 = scalar_lea.vmem %s484_s0, %s372_s16  ;;  %s227_s25 = scalar_lea.vmem %s486_s2, %s493_s12  ;;  %v402_v0 = vld [vmem:[%s224_s19] ss:$0 sm:$0xff] }
   0xf   : > { %v375_v1 = vld [vmem:[%s220_s22] sm:$0xff]   ;;  %s373_s26 = sshll.u32 %s493_s12, 4 }
  0x10   : > { %v376_v2 = vunpack.c.l.bf16 %v375_v1  ;;  %v403_v3 = vld [vmem:[%s227_s25] ss:$0 sm:$0xff]  ;;  %v377_v4 = vunpack.c.h.bf16 %v375_v1  ;;  %s236_s29 = scalar_lea.vmem %s487_s3, %s373_s26 }
  0x12   : > { %v247_v5 = vmul.f32 %v402_v0, %v376_v2  ;;  %v248_v6 = vmul.f32 %v402_v0, %v377_v4 }
  0x14   : > { %v252_v7 = vadd.f32 %v403_v3, %v247_v5  ;;  %v253_v8 = vadd.f32 %v403_v3, %v248_v6 }
  0x16   : > { %254 = vst [vmem:[%s236_s29] sm:$0xff] %v252_v7 }
  0x17   : > { %255 = vst [vmem:[%s236_s29 + $0x8] sm:$0xff] %v253_v8 }
  0x18 PF: > { %s13_s14 = sadd.s32 1, %s426_s14   ;;  %s488_s12 = smov %s422_s13 }
  0x19   : > { %p10_p5 = scmp.ge.s32.totalorder %s13_s14, 4   ;;  %s489_s13 = smov %s491_s15 }
  0x1b   :  { %12 = sbr.rel (!%p10_p5) target bundleno = 2 (0x2), region = 68 }

// kernel: context_path_forward.29
= control target key start
LH: loop header
LB: loop body
LE: loop exit
PB: predicated region body
PF: predicated region fallthrough
CT: control target
= control target key end

     0   :  { %s1489_s1 = inlined_call_operand.vmem [shape: bf16[1152,128], index: 1, kind: input, shape index: {}]   ;;  %s1490_s2 = inlined_call_operand.vmem [shape: f32[1,128], index: 2, kind: input, shape index: {}]   ;;  %s1491_s0 = inlined_call_operand.vmem [shape: bf16[16,1152], index: 0, kind: input, shape index: {}]   ;;  %s1492_s3 = inlined_call_operand.vmem [shape: f32[16,128], index: 3, kind: output, shape index: {}]  }
   0x1   :  { %v1124_v0 = vld [vmem:[%s1489_s1 + $0x38] sm:$0xff]  ;;  %v1123_v4 = vld [vmem:[%s1489_s1 + $0x30] sm:$0xff]  ;;  %v1122_v8 = vld [vmem:[%s1489_s1 + $0x28] sm:$0xff] }
   0x2   :  { %v1140_v1 = vld [vmem:[%s1489_s1 + $0xb8] sm:$0xff]  ;;  %650 = vmatpush.bf16.msra.mxu0 %v1124_v0  ;;  %v1139_v5 = vld [vmem:[%s1489_s1 + $0xb0] sm:$0xff]  ;;  %v1138_v9 = vld [vmem:[%s1489_s1 + $0xa8] sm:$0xff] }
   0x3   :  { %v1132_v2 = vld [vmem:[%s1489_s1 + $0x78] sm:$0xff]  ;;  %678 = vmatpush.bf16.msra.mxu2 %v1140_v1  ;;  %v1131_v6 = vld [vmem:[%s1489_s1 + $0x70] sm:$0xff]  ;;  %v1130_v10 = vld [vmem:[%s1489_s1 + $0x68] sm:$0xff] }
   0x4   :  { %v1148_v3 = vld [vmem:[%s1489_s1 + $0xf8] sm:$0xff]  ;;  %664 = vmatpush.bf16.msra.mxu1 %v1132_v2  ;;  %v1147_v7 = vld [vmem:[%s1489_s1 + $0xf0] sm:$0xff]  ;;  %v1146_v11 = vld [vmem:[%s1489_s1 + $0xe8] sm:$0xff] }
   0x5   :  { %692 = vmatpush.bf16.msra.mxu3 %v1148_v3  ;;  %v1121_v12 = vld [vmem:[%s1489_s1 + $0x20] sm:$0xff]  ;;  %v1120_v16 = vld [vmem:[%s1489_s1 + $0x18] sm:$0xff]  ;;  %v1119_v20 = vld [vmem:[%s1489_s1 + $0x10] sm:$0xff] }
   0x6   :  { %651 = vmatpush.bf16.msra.mxu0 %v1123_v4  ;;  %v1137_v13 = vld [vmem:[%s1489_s1 + $0xa0] sm:$0xff]  ;;  %v1136_v17 = vld [vmem:[%s1489_s1 + $0x98] sm:$0xff]  ;;  %v1135_v21 = vld [vmem:[%s1489_s1 + $0x90] sm:$0xff] }
   0x7   :  { %679 = vmatpush.bf16.msra.mxu2 %v1139_v5  ;;  %v1129_v14 = vld [vmem:[%s1489_s1 + $0x60] sm:$0xff]  ;;  %v1128_v18 = vld [vmem:[%s1489_s1 + $0x58] sm:$0xff]  ;;  %v1127_v22 = vld [vmem:[%s1489_s1 + $0x50] sm:$0xff] }
   0x8   :  { %665 = vmatpush.bf16.msra.mxu1 %v1131_v6  ;;  %v1145_v15 = vld [vmem:[%s1489_s1 + $0xe0] sm:$0xff]  ;;  %v1144_v19 = vld [vmem:[%s1489_s1 + $0xd8] sm:$0xff]  ;;  %v1143_v23 = vld [vmem:[%s1489_s1 + $0xd0] sm:$0xff] }
   0x9   :  { %693 = vmatpush.bf16.msra.mxu3 %v1147_v7  ;;  %v1118_v24 = vld [vmem:[%s1489_s1 + $0x8] sm:$0xff]  ;;  %v1117_v28 = vld [vmem:[%s1489_s1] sm:$0xff]  ;;  %v1156_v30 = vld [vmem:[%s1489_s1 + $0x138] sm:$0xff] }
   0xa   :  { %652 = vmatpush.bf16.msra.mxu0 %v1122_v8  ;;  %v1134_v25 = vld [vmem:[%s1489_s1 + $0x88] sm:$0xff]  ;;  %v1133_v29 = vld [vmem:[%s1489_s1 + $0x80] sm:$0xff]  ;;  %v1172_v31 = vld [vmem:[%s1489_s1 + $0x1b8] sm:$0xff] }
   0xb   :  { %680 = vmatpush.bf16.msra.mxu2 %v1138_v9  ;;  %v1126_v26 = vld [vmem:[%s1489_s1 + $0x48] sm:$0xff]  ;;  %v1125_v32 = vld [vmem:[%s1489_s1 + $0x40] sm:$0xff]  ;;  %v1164_v38 = vld [vmem:[%s1489_s1 + $0x178] sm:$0xff] }
   0xc   :  { %666 = vmatpush.bf16.msra.mxu1 %v1130_v10  ;;  %v1142_v27 = vld [vmem:[%s1489_s1 + $0xc8] sm:$0xff]  ;;  %v1141_v33 = vld [vmem:[%s1489_s1 + $0xc0] sm:$0xff]  ;;  %v1180_v39 = vld [vmem:[%s1489_s1 + $0x1f8] sm:$0xff] }
   0xd   :  { %694 = vmatpush.bf16.msra.mxu3 %v1146_v11  ;;  %v786_v34 = vld [vmem:[%s1491_s0] sm:$0xf]  ;;  %v1112_v35 = vld [vmem:[%s1491_s0 + $0x20] sm:$0xf0]  ;;  %v794_v36 = vld [vmem:[%s1491_s0 + $0x8] sm:$0xf] }
   0xe   :  { %653 = vmatpush.bf16.msra.mxu0 %v1121_v12  ;;  %v1113_v37 = vld [vmem:[%s1491_s0 + $0x28] sm:$0xf0]  ;;  %v1108_v40 = vld [vmem:[%s1491_s0 + $0x4] sm:$0xf]  ;;  %v788_v41 = vld [vmem:[%s1491_s0 + $0x24] sm:$0xf0]  ;;  %v787_v44 = vor.u32 %v1112_v35, %v786_v34 }
   0xf   :  { %681 = vmatpush.bf16.msra.mxu2 %v1137_v13  ;;  %v1109_v42 = vld [vmem:[%s1491_s0 + $0xc] sm:$0xf]  ;;  %v796_v43 = vld [vmem:[%s1491_s0 + $0x2c] sm:$0xf0]  ;;  %v795_v45 = vor.u32 %v1113_v37, %v794_v36  ;;  %v791_v48 = vor.u32 %v1108_v40, %v788_v41  ;;  %v1153_v56 = vld [vmem:[%s1489_s1 + $0x120] sm:$0xff] }
  0x10   :  { %667 = vmatpush.bf16.msra.mxu1 %v1129_v14  ;;  %v1155_v46 = vld [vmem:[%s1489_s1 + $0x130] sm:$0xff]  ;;  %v799_v49 = vor.u32 %v1109_v42, %v796_v43  ;;  %v1154_v52 = vld [vmem:[%s1489_s1 + $0x128] sm:$0xff]  ;;  %v1169_v57 = vld [vmem:[%s1489_s1 + $0x1a0] sm:$0xff] }
  0x11   :  { %695 = vmatpush.bf16.msra.mxu3 %v1145_v15  ;;  %v1171_v47 = vld [vmem:[%s1489_s1 + $0x1b0] sm:$0xff]  ;;  %v1170_v53 = vld [vmem:[%s1489_s1 + $0x1a8] sm:$0xff]  ;;  %v1161_v58 = vld [vmem:[%s1489_s1 + $0x160] sm:$0xff] }
  0x12   :  { %654 = vmatpush.bf16.msra.mxu0 %v1120_v16  ;;  %v1163_v50 = vld [vmem:[%s1489_s1 + $0x170] sm:$0xff]  ;;  %v1162_v54 = vld [vmem:[%s1489_s1 + $0x168] sm:$0xff]  ;;  %v1177_v59 = vld [vmem:[%s1489_s1 + $0x1e0] sm:$0xff] }
  0x13   :  { %682 = vmatpush.bf16.msra.mxu2 %v1136_v17  ;;  %v1179_v51 = vld [vmem:[%s1489_s1 + $0x1f0] sm:$0xff]  ;;  %v1178_v55 = vld [vmem:[%s1489_s1 + $0x1e8] sm:$0xff]  ;;  %v1152_v60 = vld [vmem:[%s1489_s1 + $0x118] sm:$0xff] }
  0x14   :  { %668 = vmatpush.bf16.msra.mxu1 %v1128_v18  ;;  %v1168_v61 = vld [vmem:[%s1489_s1 + $0x198] sm:$0xff]  ;;  %v1151_v0 = vld [vmem:[%s1489_s1 + $0x110] sm:$0xff]  ;;  %v1150_v4 = vld [vmem:[%s1489_s1 + $0x108] sm:$0xff] }
  0x15   :  { %696 = vmatpush.bf16.msra.mxu3 %v1144_v19  ;;  %v1160_v62 = vld [vmem:[%s1489_s1 + $0x158] sm:$0xff]  ;;  %v1167_v1 = vld [vmem:[%s1489_s1 + $0x190] sm:$0xff]  ;;  %v1166_v5 = vld [vmem:[%s1489_s1 + $0x188] sm:$0xff] }
  0x16   :  { %655 = vmatpush.bf16.msra.mxu0 %v1119_v20  ;;  %v1176_v63 = vld [vmem:[%s1489_s1 + $0x1d8] sm:$0xff]  ;;  %v1159_v2 = vld [vmem:[%s1489_s1 + $0x150] sm:$0xff]  ;;  %v1158_v6 = vld [vmem:[%s1489_s1 + $0x148] sm:$0xff] }
  0x17   :  { %683 = vmatpush.bf16.msra.mxu2 %v1135_v21  ;;  %v1175_v3 = vld [vmem:[%s1489_s1 + $0x1d0] sm:$0xff]  ;;  %v1174_v7 = vld [vmem:[%s1489_s1 + $0x1c8] sm:$0xff]  ;;  %v1149_v8 = vld [vmem:[%s1489_s1 + $0x100] sm:$0xff] }
  0x18   :  { %669 = vmatpush.bf16.msra.mxu1 %v1127_v22  ;;  %v1165_v9 = vld [vmem:[%s1489_s1 + $0x180] sm:$0xff]  ;;  %v1188_v10 = vld [vmem:[%s1489_s1 + $0x238] sm:$0xff]  ;;  %v802_v11 = vld [vmem:[%s1491_s0 + $0x10] sm:$0xf] }
  0x19   :  { %697 = vmatpush.bf16.msra.mxu3 %v1143_v23  ;;  %v1114_v12 = vld [vmem:[%s1491_s0 + $0x30] sm:$0xf0]  ;;  %v810_v13 = vld [vmem:[%s1491_s0 + $0x18] sm:$0xf]  ;;  %v1115_v14 = vld [vmem:[%s1491_s0 + $0x38] sm:$0xf0] }
  0x1a   :  { %656 = vmatpush.bf16.msra.mxu0 %v1118_v24  ;;  %v1157_v15 = vld [vmem:[%s1489_s1 + $0x140] sm:$0xff]  ;;  %v1110_v17 = vld [vmem:[%s1491_s0 + $0x14] sm:$0xf]  ;;  %v804_v18 = vld [vmem:[%s1491_s0 + $0x34] sm:$0xf0]  ;;  %v803_v21 = vor.u32 %v1114_v12, %v802_v11  ;;  %v811_v22 = vor.u32 %v1115_v14, %v810_v13 }
  0x1b   :  { %684 = vmatpush.bf16.msra.mxu2 %v1134_v25  ;;  %v1173_v16 = vld [vmem:[%s1489_s1 + $0x1c0] sm:$0xff]  ;;  %v1111_v19 = vld [vmem:[%s1491_s0 + $0x1c] sm:$0xf]  ;;  %v807_v23 = vor.u32 %v1110_v17, %v804_v18  ;;  %v1187_v25 = vld [vmem:[%s1489_s1 + $0x230] sm:$0xff] }
  0x1c   :  { %670 = vmatpush.bf16.msra.mxu1 %v1126_v26  ;;  %v812_v20 = vld [vmem:[%s1491_s0 + $0x3c] sm:$0xf0]  ;;  %v1186_v26 = vld [vmem:[%s1489_s1 + $0x228] sm:$0xff] }
  0x1d   :  { %698 = vmatpush.bf16.msra.mxu3 %v1142_v27  ;;  %v815_v24 = vor.u32 %v1111_v19, %v812_v20  ;;  %v1185_v27 = vld [vmem:[%s1489_s1 + $0x220] sm:$0xff] }
  0x1e   :  { %657 = vmatpush.bf16.msra.mxu0 %v1117_v28  ;;  %v1184_v28 = vld [vmem:[%s1489_s1 + $0x218] sm:$0xff]  ;;  %v1189_v36 = vld [vmem:[%s1490_s2] ss:$0 sm:$0xff] }
  0x1f   :  { %685 = vmatpush.bf16.msra.mxu2 %v1133_v29  ;;  %v1183_v29 = vld [vmem:[%s1489_s1 + $0x210] sm:$0xff] }
  0x20   :  { %671 = vmatpush.bf16.msra.mxu1 %v1125_v32  ;;  %v818_v32 = vld [vmem:[%s1491_s0 + $0x20] sm:$0xf] }
  0x21   :  { %699 = vmatpush.bf16.msra.mxu3 %v1141_v33  ;;  %658 = vmatmul.bf16.vlgmr.msra.gmra.mxu0 %v787_v44  ;;  %v1116_v33 = vld [vmem:[%s1491_s0 + $0x40] sm:$0xf0] }
  0x22   :  { %706 = vmatpush.bf16.msrb.mxu0 %v1156_v30  ;;  %686 = vmatmul.bf16.vlgmr.msra.gmra.mxu2 %v795_v45  ;;  %v1182_v30 = vld [vmem:[%s1489_s1 + $0x208] sm:$0xff]  ;;  %v819_v34 = vor.u32 %v1116_v33, %v818_v32 }
  0x23   :  { %734 = vmatpush.bf16.msrb.mxu2 %v1172_v31  ;;  %672 = vmatmul.bf16.vlgmr.msra.gmra.mxu1 %v791_v48  ;;  %v1181_v31 = vld [vmem:[%s1489_s1 + $0x200] sm:$0xff] }
  0x24   :  { %720 = vmatpush.bf16.msrb.mxu1 %v1164_v38  ;;  %700 = vmatmul.bf16.vlgmr.msra.gmra.mxu3 %v799_v49 }
  0x25   :  { %748 = vmatpush.bf16.msrb.mxu3 %v1180_v39 }
  0x26   :  { %707 = vmatpush.bf16.msrb.mxu0 %v1155_v46 }
  0x27   :  { %735 = vmatpush.bf16.msrb.mxu2 %v1171_v47 }
  0x28   :  { %721 = vmatpush.bf16.msrb.mxu1 %v1163_v50 }
  0x29   :  { %749 = vmatpush.bf16.msrb.mxu3 %v1179_v51 }
  0x2a   :  { %708 = vmatpush.bf16.msrb.mxu0 %v1154_v52 }
  0x2b   :  { %736 = vmatpush.bf16.msrb.mxu2 %v1170_v53 }
  0x2c   :  { %722 = vmatpush.bf16.msrb.mxu1 %v1162_v54 }
  0x2d   :  { %750 = vmatpush.bf16.msrb.mxu3 %v1178_v55 }
  0x2e   :  { %709 = vmatpush.bf16.msrb.mxu0 %v1153_v56 }
  0x2f   :  { %737 = vmatpush.bf16.msrb.mxu2 %v1169_v57 }
  0x30   :  { %723 = vmatpush.bf16.msrb.mxu1 %v1161_v58 }
  0x31   :  { %751 = vmatpush.bf16.msrb.mxu3 %v1177_v59 }
  0x32   :  { %710 = vmatpush.bf16.msrb.mxu0 %v1152_v60 }
  0x33   :  { %738 = vmatpush.bf16.msrb.mxu2 %v1168_v61 }
  0x34   :  { %724 = vmatpush.bf16.msrb.mxu1 %v1160_v62 }
  0x35   :  { %752 = vmatpush.bf16.msrb.mxu3 %v1176_v63 }
  0x36   :  { %711 = vmatpush.bf16.msrb.mxu0 %v1151_v0 }
  0x37   :  { %739 = vmatpush.bf16.msrb.mxu2 %v1167_v1 }
  0x38   :  { %725 = vmatpush.bf16.msrb.mxu1 %v1159_v2 }
  0x39   :  { %753 = vmatpush.bf16.msrb.mxu3 %v1175_v3 }
  0x3a   :  { %712 = vmatpush.bf16.msrb.mxu0 %v1150_v4 }
  0x3b   :  { %740 = vmatpush.bf16.msrb.mxu2 %v1166_v5 }
  0x3c   :  { %726 = vmatpush.bf16.msrb.mxu1 %v1158_v6 }
  0x3d   :  { %754 = vmatpush.bf16.msrb.mxu3 %v1174_v7 }
  0x3e   :  { %713 = vmatpush.bf16.msrb.mxu0 %v1149_v8 }
  0x3f   :  { %741 = vmatpush.bf16.msrb.mxu2 %v1165_v9 }
  0x40   :  { %727 = vmatpush.bf16.msrb.mxu1 %v1157_v15 }
  0x41   :  { %755 = vmatpush.bf16.msrb.mxu3 %v1173_v16  ;;  %714 = vmatmul.bf16.vlgmr.msrb.gmra.mxu0 %v803_v21 }
  0x42   :  { %762 = vmatpush.bf16.msra.mxu0 %v1188_v10  ;;  %742 = vmatmul.bf16.vlgmr.msrb.gmra.mxu2 %v811_v22 }
  0x43   :  { %728 = vmatmul.bf16.vlgmr.msrb.gmra.mxu1 %v807_v23 }
  0x44   :  { %756 = vmatmul.bf16.vlgmr.msrb.gmra.mxu3 %v815_v24 }
  0x46   :  { %763 = vmatpush.bf16.msra.mxu0 %v1187_v25 }
  0x4a   :  { %764 = vmatpush.bf16.msra.mxu0 %v1186_v26 }
  0x4e   :  { %765 = vmatpush.bf16.msra.mxu0 %v1185_v27 }
  0x52   :  { %766 = vmatpush.bf16.msra.mxu0 %v1184_v28 }
  0x56   :  { %767 = vmatpush.bf16.msra.mxu0 %v1183_v29 }
  0x5a   :  { %768 = vmatpush.bf16.msra.mxu0 %v1182_v30 }
  0x5e   :  { %769 = vmatpush.bf16.msra.mxu0 %v1181_v31 }
  0x61   :  { %770 = vmatmul.bf16.vlgmr.msra.gmra.mxu0 %v819_v34 }
  0x9e   :  { %v659_v35 = vpop.f32.mrf.mxu0 }
  0x9f   :  { %v660_v39 = vadd.f32 %v1189_v36, %v659_v35 }
  0xa0   :  { %v673_v37 = vpop.f32.mrf.mxu1 }
  0xa1   :  { %v674_v42 = vadd.f32 %v673_v37, %v660_v39 }
  0xa5   :  { %v687_v38 = vpop.f32.mrf.mxu2 }
  0xa6   :  { %v661_v40 = vpop.f32.mrf.mxu0  ;;  %v688_v44 = vadd.f32 %v687_v38, %v674_v42 }
  0xa7   :  { %v701_v41 = vpop.f32.mrf.mxu3  ;;  %v662_v47 = vadd.f32 %v1189_v36, %v661_v40 }
  0xa8   :  { %v675_v43 = vpop.f32.mrf.mxu1  ;;  %v702_v48 = vadd.f32 %v701_v41, %v688_v44 }
  0xa9   :  { %v676_v50 = vadd.f32 %v675_v43, %v662_v47 }
  0xad   :  { %v689_v45 = vpop.f32.mrf.mxu2 }
  0xae   :  { %v690_v54 = vadd.f32 %v689_v45, %v676_v50 }
  0xaf   :  { %v703_v49 = vpop.f32.mrf.mxu3 }
  0xb0   :  { %v704_v58 = vadd.f32 %v703_v49, %v690_v54 }
  0xbe   :  { %v715_v46 = vpop.f32.mrf.mxu0 }
  0xbf   :  { %v716_v51 = vadd.f32 %v715_v46, %v702_v48 }
  0xc0   :  { %v729_v52 = vpop.f32.mrf.mxu1 }
  0xc1   :  { %v730_v55 = vadd.f32 %v729_v52, %v716_v51 }
  0xc5   :  { %v743_v53 = vpop.f32.mrf.mxu2 }
  0xc6   :  { %v717_v56 = vpop.f32.mrf.mxu0  ;;  %v744_v59 = vadd.f32 %v743_v53, %v730_v55 }
  0xc7   :  { %v757_v57 = vpop.f32.mrf.mxu3  ;;  %v718_v60 = vadd.f32 %v717_v56, %v704_v58 }
  0xc8   :  { %v731_v61 = vpop.f32.mrf.mxu1  ;;  %v758_v62 = vadd.f32 %v757_v57, %v744_v59 }
  0xc9   :  { %v732_v1 = vadd.f32 %v731_v61, %v718_v60 }
  0xcd   :  { %v745_v63 = vpop.f32.mrf.mxu2 }
  0xce   :  { %v746_v3 = vadd.f32 %v745_v63, %v732_v1 }
  0xcf   :  { %v759_v5 = vpop.f32.mrf.mxu3 }
  0xd0   :  { %v760_v6 = vadd.f32 %v759_v5, %v746_v3 }
  0xde   :  { %v771_v0 = vpop.f32.mrf.mxu0 }
  0xdf   :  { %v772_v2 = vadd.f32 %v771_v0, %v758_v62 }
  0xe1   :  { %v776_v4 = vmax.f32 %v772_v2, 0.0 }
  0xe3   :  { %778 = vst [vmem:[%s1492_s3] sm:$0xff] %v776_v4 }
  0xe6   :  { %v773_v7 = vpop.f32.mrf.mxu0 }
  0xe7   :  { %v774_v8 = vadd.f32 %v773_v7, %v760_v6 }
  0xe9   :  { %v777_v9 = vmax.f32 %v774_v8, 0.0 }
  0xeb   :  { %779 = vst [vmem:[%s1492_s3 + $0x8] sm:$0xff] %v777_v9 }

// kernel: context_path_forward.26
= control target key start
LH: loop header
LB: loop body
LE: loop exit
PB: predicated region body
PF: predicated region fallthrough
CT: control target
= control target key end

     0   :  { %s479_s12 = smov 0   ;;  %s481_s13 = smov 0   ;;  %s515_s0 = inlined_call_operand.vmem [shape: bf16[2,16,128], index: 0, kind: input, shape index: {}]   ;;  %s516_s1 = inlined_call_operand.vmem [shape: f32[2,1,128], index: 1, kind: input, shape index: {}]   ;;  %s517_s2 = inlined_call_operand.vmem [shape: f32[2,16,128], index: 2, kind: input, shape index: {}]   ;;  %s518_s3 = inlined_call_operand.vmem [shape: f32[2,16,128], index: 3, kind: output, shape index: {}]  }
   0x1   :  { %s483_s14 = smov 0  }
   0x2 LB: > { %s25_s15 = sadd.s32 1, %s453_s13  ;;  %p394_p0 = scmp.ge.s32.totalorder %s457_s14, 1  ;;  %s457_s14 = sphi %s483_s14, %s13_s14   ;;  %s453_s13 = sphi %s481_s13, %s520_s13   ;;  %s449_s12 = sphi %s479_s12, %s519_s12  }
   0x3   : > { %p27_p1 = scmp.ge.s32.totalorder %s25_s15, 2  ;;  %p183_p2 = scmp.lt.s32.totalorder %s457_s14, 3 }
   0x5   : > { %s522_s15 = smov (%p27_p1, %s25_s15), 0  ;;  %p184_p3 = pnand %p394_p0, %p183_p2 }
   0x6   : > { %p228_p4 = scmp.lt.s32.totalorder (!%p184_p3), %s449_s12, 1 }
   0x7   : > { %187 = sbr.rel (%p184_p3) target bundleno = 24 (0x18), region = 32 }
   0xc   : > { %s524_s12 = smov (!%p228_p4, %s449_s12), 1 }
   0xd   : > { %s403_s16 = sshll.u32 %s524_s12, 3  ;;  %s239_s19 = scalar_lea.vmem %s516_s1, %s524_s12 }
   0xe   : > { %s235_s22 = scalar_lea.vmem %s515_s0, %s403_s16  ;;  %s404_s23 = sshll.u32 %s524_s12, 4  ;;  %v434_v0 = vld [vmem:[%s239_s19] ss:$0 sm:$0xff] }
   0xf   : > { %s248_s26 = scalar_lea.vmem %s517_s2, %s404_s23  ;;  %v407_v1 = vld [vmem:[%s235_s22] sm:$0xff]   ;;  %s258_s29 = scalar_lea.vmem %s518_s3, %s404_s23 }
  0x10   : > { %v408_v2 = vunpack.c.l.bf16 %v407_v1  ;;  %v409_v3 = vunpack.c.h.bf16 %v407_v1  ;;  %v265_v4 = vld [vmem:[%s248_s26] sm:$0xff]  ;;  %v266_v5 = vld [vmem:[%s248_s26 + $0x8] sm:$0xff] }
  0x12   : > { %v270_v6 = vmul.f32 %v434_v0, %v408_v2  ;;  %v271_v7 = vmul.f32 %v434_v0, %v409_v3 }
  0x14   : > { %v272_v8 = vadd.f32 %v270_v6, %v265_v4  ;;  %v273_v9 = vadd.f32 %v271_v7, %v266_v5 }
  0x16   : > { %274 = vst [vmem:[%s258_s29] sm:$0xff] %v272_v8 }
  0x17   : > { %275 = vst [vmem:[%s258_s29 + $0x8] sm:$0xff] %v273_v9 }
  0x18 PF: > { %s13_s14 = sadd.s32 1, %s457_s14   ;;  %s519_s12 = smov %s453_s13 }
  0x19   : > { %p10_p5 = scmp.ge.s32.totalorder %s13_s14, 4   ;;  %s520_s13 = smov %s522_s15 }
  0x1b   :  { %12 = sbr.rel (!%p10_p5) target bundleno = 2 (0x2), region = 68 }

// kernel: context_path_forward.20
= control target key start
LH: loop header
LB: loop body
LE: loop exit
PB: predicated region body
PF: predicated region fallthrough
CT: control target
= control target key end

     0   :  { %vm281_vm0 = vcmask 392192   ;;  %s729_s1 = inlined_call_operand.vmem [shape: bf16[432,128], index: 1, kind: input, shape index: {}]   ;;  %s730_s0 = inlined_call_operand.vmem [shape: bf16[32,432], index: 0, kind: input, shape index: {}]   ;;  %s731_s2 = inlined_call_operand.vmem [shape: f32[1,128], index: 2, kind: input, shape index: {}]   ;;  %s732_s3 = inlined_call_operand.vmem [shape: bf16[32,128], index: 3, kind: output, shape index: {}]  }
   0x1   :  { %v537_v0 = vld [vmem:[%s729_s1 + $0x38] sm:$0xff]  ;;  %v536_v3 = vld [vmem:[%s729_s1 + $0x30] sm:$0xff]  ;;  %v535_v7 = vld [vmem:[%s729_s1 + $0x28] sm:$0xff] }
   0x2   :  { %v545_v1 = vld [vmem:[%s729_s1 + $0x78] sm:$0xff]  ;;  %288 = vmatpush.bf16.msra.mxu0 %v537_v0  ;;  %v544_v4 = vld [vmem:[%s729_s1 + $0x70] sm:$0xff]  ;;  %v543_v8 = vld [vmem:[%s729_s1 + $0x68] sm:$0xff] }
   0x3   :  { %v553_v2 = vld [vmem:[%s729_s1 + $0xb8] sm:$0xff]  ;;  %307 = vmatpush.bf16.msra.mxu1 %v545_v1  ;;  %v552_v5 = vld [vmem:[%s729_s1 + $0xb0] sm:$0xff]  ;;  %v551_v9 = vld [vmem:[%s729_s1 + $0xa8] sm:$0xff] }
   0x4   :  { %326 = vmatpush.bf16.msra.mxu2 %v553_v2  ;;  %v556_v6 = vld [vmem:[%s729_s1 + $0xd0] sm:$0xff]  ;;  %v555_v10 = vld [vmem:[%s729_s1 + $0xc8] sm:$0xff]  ;;  %v534_v11 = vld [vmem:[%s729_s1 + $0x20] sm:$0xff] }
   0x5   :  { %350 = vmatpush.bf16.msra.mxu3 %v556_v6  ;;  %v542_v12 = vld [vmem:[%s729_s1 + $0x60] sm:$0xff]  ;;  %v523_v15 = vld [vmem:[%s730_s0 + $0xc] sm:$0xf]  ;;  %v392_v16 = vld [vmem:[%s730_s0 + $0x18] sm:$0xf0] }
   0x6   :  { %289 = vmatpush.bf16.msra.mxu0 %v536_v3  ;;  %v550_v13 = vld [vmem:[%s729_s1 + $0xa0] sm:$0xff]  ;;  %v533_v17 = vld [vmem:[%s729_s1 + $0x18] sm:$0xff]  ;;  %v395_v20 = vor.u32 %v523_v15, %v392_v16  ;;  %v532_v21 = vld [vmem:[%s729_s1 + $0x10] sm:$0xff] }
   0x7   :  { %308 = vmatpush.bf16.msra.mxu1 %v544_v4  ;;  %v554_v14 = vld [vmem:[%s729_s1 + $0xc0] sm:$0xff]  ;;  %v541_v18 = vld [vmem:[%s729_s1 + $0x58] sm:$0xff]  ;;  %v540_v22 = vld [vmem:[%s729_s1 + $0x50] sm:$0xff] }
   0x8   :  { %327 = vmatpush.bf16.msra.mxu2 %v552_v5  ;;  %v549_v19 = vld [vmem:[%s729_s1 + $0x98] sm:$0xff]  ;;  %v548_v23 = vld [vmem:[%s729_s1 + $0x90] sm:$0xff]  ;;  %v531_v24 = vld [vmem:[%s729_s1 + $0x8] sm:$0xff] }
   0x9   :  { %351 = vmatpush.bf16.msra.mxu3 %v555_v10  ;;  %v539_v25 = vld [vmem:[%s729_s1 + $0x48] sm:$0xff]  ;;  %v530_v27 = vld [vmem:[%s729_s1] sm:$0xff]  ;;  %v524_v30 = vld [vmem:[%s730_s0 + $0xc] sm:$0xf0] }
   0xa   :  { %290 = vmatpush.bf16.msra.mxu0 %v535_v7  ;;  %v547_v26 = vld [vmem:[%s729_s1 + $0x88] sm:$0xff]  ;;  %v538_v28 = vld [vmem:[%s729_s1 + $0x40] sm:$0xff]  ;;  %v384_v32 = vld [vmem:[%s730_s0 + $0x10] sm:$0xf0] }
   0xb   :  { %309 = vmatpush.bf16.msra.mxu1 %v543_v8  ;;  %v382_v29 = vld [vmem:[%s730_s0] sm:$0xf]  ;;  %v522_v31 = vld [vmem:[%s730_s0 + $0x4] sm:$0xf]  ;;  %v390_v34 = vld [vmem:[%s730_s0 + $0x8] sm:$0xf] }
   0xc   :  { %328 = vmatpush.bf16.msra.mxu2 %v551_v9  ;;  %v546_v33 = vld [vmem:[%s729_s1 + $0x80] sm:$0xff]  ;;  %v525_v35 = vld [vmem:[%s730_s0 + $0x14] sm:$0xf0]  ;;  %v527_v36 = vld [vmem:[%s730_s0 + $0x2c] sm:$0xf]  ;;  %v383_v38 = vor.u32 %v524_v30, %v382_v29  ;;  %v387_v39 = vor.u32 %v522_v31, %v384_v32 }
   0xd   :  { %352 = vmatpush.bf16.msra.mxu3 %v554_v14  ;;  %v408_v37 = vld [vmem:[%s730_s0 + $0x38] sm:$0xf0]  ;;  %v391_v40 = vor.u32 %v525_v35, %v390_v34  ;;  %v398_v42 = vld [vmem:[%s730_s0 + $0x20] sm:$0xf]  ;;  %v528_v43 = vld [vmem:[%s730_s0 + $0x2c] sm:$0xf0] }
   0xe   :  { %291 = vmatpush.bf16.msra.mxu0 %v534_v11  ;;  %v411_v41 = vor.u32 %v527_v36, %v408_v37  ;;  %v526_v44 = vld [vmem:[%s730_s0 + $0x24] sm:$0xf]  ;;  %v400_v45 = vld [vmem:[%s730_s0 + $0x30] sm:$0xf0]  ;;  %v406_v46 = vld [vmem:[%s730_s0 + $0x28] sm:$0xf]  ;;  %v399_v48 = vor.u32 %v528_v43, %v398_v42 }
   0xf   :  { %310 = vmatpush.bf16.msra.mxu1 %v542_v12  ;;  %v529_v47 = vld [vmem:[%s730_s0 + $0x34] sm:$0xf0]  ;;  %v403_v49 = vor.u32 %v526_v44, %v400_v45  ;;  %v568_v51 = vld [vmem:[%s731_s2] ss:$0 sm:$0xff] }
  0x10   :  { %329 = vmatpush.bf16.msra.mxu2 %v550_v13  ;;  %520 = vmatmul.msk.bf16.vlgmr.msra.gmra.mxu3 %vm281_vm0, %v395_v20  ;;  %v407_v50 = vor.u32 %v529_v47, %v406_v46 }
  0x12   :  { %292 = vmatpush.bf16.msra.mxu0 %v533_v17 }
  0x13   :  { %311 = vmatpush.bf16.msra.mxu1 %v541_v18 }
  0x14   :  { %330 = vmatpush.bf16.msra.mxu2 %v549_v19 }
  0x16   :  { %293 = vmatpush.bf16.msra.mxu0 %v532_v21 }
  0x17   :  { %312 = vmatpush.bf16.msra.mxu1 %v540_v22 }
  0x18   :  { %331 = vmatpush.bf16.msra.mxu2 %v548_v23 }
  0x1a   :  { %294 = vmatpush.bf16.msra.mxu0 %v531_v24 }
  0x1b   :  { %313 = vmatpush.bf16.msra.mxu1 %v539_v25 }
  0x1c   :  { %332 = vmatpush.bf16.msra.mxu2 %v547_v26 }
  0x1e   :  { %295 = vmatpush.bf16.msra.mxu0 %v530_v27 }
  0x1f   :  { %314 = vmatpush.bf16.msra.mxu1 %v538_v28 }
  0x20   :  { %333 = vmatpush.bf16.msra.mxu2 %v546_v33  ;;  %521 = vmatmul.msk.bf16.gmra.mxu3 %vm281_vm0, %v411_v41 }
  0x21   :  { %296 = vmatmul.bf16.vlgmr.msra.gmra.mxu0 %v383_v38 }
  0x22   :  { %315 = vmatmul.bf16.vlgmr.msra.gmra.mxu1 %v387_v39 }
  0x23   :  { %334 = vmatmul.bf16.vlgmr.msra.gmra.mxu2 %v391_v40 }
  0x31   :  { %301 = vmatmul.bf16.gmra.mxu0 %v399_v48 }
  0x32   :  { %320 = vmatmul.bf16.gmra.mxu1 %v403_v49 }
  0x33   :  { %339 = vmatmul.bf16.gmra.mxu2 %v407_v50 }
  0x93   :  { %v354_v54 = vpop.f32.mrf.mxu3 }
  0x9b   :  { %v356_v62 = vpop.f32.mrf.mxu3 }
  0x9e   :  { %v297_v52 = vpop.f32.mrf.mxu0 }
  0x9f   :  { %v316_v53 = vpop.f32.mrf.mxu1  ;;  %v298_v55 = vadd.f32 %v568_v51, %v297_v52 }
  0xa1   :  { %v317_v57 = vadd.f32 %v316_v53, %v298_v55 }
  0xa3   :  { %v359_v10 = vpop.f32.mrf.mxu3 }
  0xa6   :  { %v335_v56 = vpop.f32.mrf.mxu2  ;;  %v299_v58 = vpop.f32.mrf.mxu0 }
  0xa7   :  { %v318_v59 = vpop.f32.mrf.mxu1  ;;  %v300_v60 = vadd.f32 %v568_v51, %v299_v58  ;;  %v336_v61 = vadd.f32 %v335_v56, %v317_v57 }
  0xa9   :  { %v319_v63 = vadd.f32 %v318_v59, %v300_v60  ;;  %v355_v1 = vadd.f32 %v354_v54, %v336_v61 }
  0xab   :  { %v364_v6 = vmax.f32 %v355_v1, 0.0  ;;  %v361_v21 = vpop.f32.mrf.mxu3 }
  0xae   :  { %v337_v0 = vpop.f32.mrf.mxu2  ;;  %v302_v3 = vpop.f32.mrf.mxu0 }
  0xaf   :  { %v338_v2 = vadd.f32 %v337_v0, %v319_v63  ;;  %v321_v5 = vpop.f32.mrf.mxu1  ;;  %v303_v8 = vadd.f32 %v568_v51, %v302_v3 }
  0xb1   :  { %v357_v4 = vadd.f32 %v356_v62, %v338_v2  ;;  %v322_v12 = vadd.f32 %v321_v5, %v303_v8 }
  0xb3   :  { %v365_v7 = vmax.f32 %v357_v4, 0.0 }
  0xb5   :  { %v560_v9 = vpack.c.bf16 %v365_v7, %v364_v6 }
  0xb6   :  { %v340_v11 = vpop.f32.mrf.mxu2  ;;  %v304_v13 = vpop.f32.mrf.mxu0 }
  0xb7   :  { %561 = vst [vmem:[%s732_s3] sm:$0xff] %v560_v9   ;;  %v305_v14 = vadd.f32 %v568_v51, %v304_v13  ;;  %v341_v15 = vadd.f32 %v340_v11, %v322_v12  ;;  %v323_v16 = vpop.f32.mrf.mxu1 }
  0xb9   :  { %v324_v17 = vadd.f32 %v323_v16, %v305_v14  ;;  %v360_v19 = vadd.f32 %v359_v10, %v341_v15 }
  0xbb   :  { %v366_v23 = vmax.f32 %v360_v19, 0.0 }
  0xbe   :  { %v342_v18 = vpop.f32.mrf.mxu2 }
  0xbf   :  { %v343_v20 = vadd.f32 %v342_v18, %v324_v17 }
  0xc1   :  { %v362_v22 = vadd.f32 %v361_v21, %v343_v20 }
  0xc3   :  { %v367_v24 = vmax.f32 %v362_v22, 0.0 }
  0xc5   :  { %v565_v25 = vpack.c.bf16 %v367_v24, %v366_v23 }
  0xc7   :  { %567 = vst [vmem:[%s732_s3 + $0x8] sm:$0xff] %v565_v25  }

// kernel: context_path_forward.27
= control target key start
LH: loop header
LB: loop body
LE: loop exit
PB: predicated region body
PF: predicated region fallthrough
CT: control target
= control target key end

     0   :  { %vm316_vm0 = vcmask 261120   ;;  %s1055_s0 = inlined_call_operand.vmem [shape: bf16[128,288], index: 0, kind: input, shape index: {}]   ;;  %s1056_s1 = inlined_call_operand.vmem [shape: bf16[288,128], index: 1, kind: input, shape index: {}]   ;;  %s1057_s2 = inlined_call_operand.vmem [shape: f32[1,128], index: 2, kind: input, shape index: {}]   ;;  %s1058_s3 = inlined_call_operand.hbm [shape: f32[128,128], index: 3, kind: output, shape index: {}]  }
   0x1   :  { %v745_v0 = vld [vmem:[%s1056_s1 + $0x38] sm:$0xff]  ;;  %v755_v1 = vld [vmem:[%s1056_s1 + $0x88] sm:$0xff]  ;;  %v744_v3 = vld [vmem:[%s1056_s1 + $0x30] sm:$0xff] }
   0x2   :  { %v753_v2 = vld [vmem:[%s1056_s1 + $0x78] sm:$0xff]  ;;  %341 = vmatpush.bf16.msra.mxu0 %v745_v0  ;;  %756 = vmatpush.bf16.msra.mxu3 %v745_v0  ;;  %v754_v4 = vld [vmem:[%s1056_s1 + $0x80] sm:$0xff]  ;;  %v752_v5 = vld [vmem:[%s1056_s1 + $0x70] sm:$0xff] }
   0x3   :  { %445 = vmatpush.bf16.msra.mxu2 %v755_v1  ;;  %390 = vmatpush.bf16.msra.mxu1 %v753_v2  ;;  %v548_v6 = vld [vmem:[%s1055_s0 + $0x8] sm:$0xf]  ;;  %v716_v7 = vld [vmem:[%s1055_s0 + $0x10] sm:$0xf0]  ;;  %v742_v11 = vld [vmem:[%s1056_s1 + $0x20] sm:$0xff] }
   0x4   :  { %v549_v8 = vor.u32 %v716_v7, %v548_v6  ;;  %v743_v9 = vld [vmem:[%s1056_s1 + $0x28] sm:$0xff] }
   0x5   :  { %v751_v10 = vld [vmem:[%s1056_s1 + $0x68] sm:$0xff] }
   0x6   :  { %342 = vmatpush.bf16.msra.mxu0 %v744_v3  ;;  %757 = vmatpush.bf16.msra.mxu3 %v744_v3 }
   0x7   :  { %446 = vmatpush.bf16.msra.mxu2 %v754_v4  ;;  %391 = vmatpush.bf16.msra.mxu1 %v752_v5 }
   0xa   :  { %706 = vmatmul.msk.bf16.vlgmr.msra.gmra.mxu2 %vm316_vm0, %v549_v8  ;;  %343 = vmatpush.bf16.msra.mxu0 %v743_v9 }
   0xb   :  { %8 = vsyncpa [#allocation3], 0  ;;  %758 = vmatpush.bf16.msra.mxu3 %v743_v9  ;;  %392 = vmatpush.bf16.msra.mxu1 %v751_v10  ;;  %v750_v12 = vld [vmem:[%s1056_s1 + $0x60] sm:$0xff]  ;;  %v741_v13 = vld [vmem:[%s1056_s1 + $0x18] sm:$0xff]  ;;  %s803_s10 = smov 128   ;;  %s804_s11 = smov 8  }
   0xc   :  { %v749_v14 = vld [vmem:[%s1056_s1 + $0x58] sm:$0xff]  ;;  %v740_v15 = vld [vmem:[%s1056_s1 + $0x10] sm:$0xff]  ;;  %v560_v17 = vld [vmem:[%s1055_s0 + $0x20] sm:$0xf] }
   0xd   :  { %v748_v16 = vld [vmem:[%s1056_s1 + $0x50] sm:$0xff]  ;;  %v719_v18 = vld [vmem:[%s1055_s0 + $0x28] sm:$0xf0]  ;;  %v738_v22 = vld [vmem:[%s1056_s1] sm:$0xff] }
   0xe   :  { %344 = vmatpush.bf16.msra.mxu0 %v742_v11  ;;  %v561_v19 = vor.u32 %v719_v18, %v560_v17  ;;  %v739_v20 = vld [vmem:[%s1056_s1 + $0x8] sm:$0xff]  ;;  %v746_v23 = vld [vmem:[%s1056_s1 + $0x40] sm:$0xff]  ;;  %v612_v26 = vld [vmem:[%s1055_s0 + $0x90] sm:$0xf] }
   0xf   :  { %759 = vmatpush.bf16.msra.mxu3 %v742_v11  ;;  %393 = vmatpush.bf16.msra.mxu1 %v750_v12  ;;  %v747_v21 = vld [vmem:[%s1056_s1 + $0x48] sm:$0xff]  ;;  %v540_v24 = vld [vmem:[%s1055_s0] sm:$0xf]  ;;  %v733_v27 = vld [vmem:[%s1055_s0 + $0x98] sm:$0xf0]  ;;  %s526_s1 = sshll.u32 %s1058_s3, 4  ;;  %s527_s1 = int_to_ptr.hbm [resolvable:$true] %s526_s1 }
  0x10   :  { %v715_v25 = vld [vmem:[%s1055_s0 + $0x8] sm:$0xf0]  ;;  %v714_v28 = vld [vmem:[%s1055_s0 + $0x4] sm:$0xf]  ;;  %v542_v29 = vld [vmem:[%s1055_s0 + $0xc] sm:$0xf0]  ;;  %v613_v31 = vor.u32 %v733_v27, %v612_v26 }
  0x11   :  { %v541_v30 = vor.u32 %v715_v25, %v540_v24  ;;  %v545_v32 = vor.u32 %v714_v28, %v542_v29  ;;  %v572_v33 = vld [vmem:[%s1055_s0 + $0x38] sm:$0xf]  ;;  %v722_v34 = vld [vmem:[%s1055_s0 + $0x40] sm:$0xf0]  ;;  %v624_v38 = vld [vmem:[%s1055_s0 + $0xa8] sm:$0xf] }
  0x12   :  { %345 = vmatpush.bf16.msra.mxu0 %v741_v13  ;;  %v573_v35 = vor.u32 %v722_v34, %v572_v33  ;;  %v552_v36 = vld [vmem:[%s1055_s0 + $0x18] sm:$0xf]  ;;  %v718_v37 = vld [vmem:[%s1055_s0 + $0x20] sm:$0xf0]  ;;  %v736_v39 = vld [vmem:[%s1055_s0 + $0xb0] sm:$0xf0] }
  0x13   :  { %760 = vmatpush.bf16.msra.mxu3 %v741_v13  ;;  %394 = vmatpush.bf16.msra.mxu1 %v749_v14  ;;  %v717_v40 = vld [vmem:[%s1055_s0 + $0x1c] sm:$0xf]  ;;  %v554_v41 = vld [vmem:[%s1055_s0 + $0x24] sm:$0xf0]  ;;  %v553_v42 = vor.u32 %v718_v37, %v552_v36  ;;  %v625_v43 = vor.u32 %v736_v39, %v624_v38  ;;  %v584_v45 = vld [vmem:[%s1055_s0 + $0x50] sm:$0xf] }
  0x14   :  { %v557_v44 = vor.u32 %v717_v40, %v554_v41  ;;  %v725_v46 = vld [vmem:[%s1055_s0 + $0x58] sm:$0xf0]  ;;  %v564_v48 = vld [vmem:[%s1055_s0 + $0x30] sm:$0xf]  ;;  %v732_v50 = vld [vmem:[%s1055_s0 + $0x94] sm:$0xf] }
  0x15   :  { %v585_v47 = vor.u32 %v725_v46, %v584_v45  ;;  %v721_v49 = vld [vmem:[%s1055_s0 + $0x38] sm:$0xf0]  ;;  %v614_v51 = vld [vmem:[%s1055_s0 + $0x9c] sm:$0xf0]  ;;  %v720_v52 = vld [vmem:[%s1055_s0 + $0x34] sm:$0xf] }
  0x16   :  { %346 = vmatpush.bf16.msra.mxu0 %v740_v15  ;;  %v566_v53 = vld [vmem:[%s1055_s0 + $0x3c] sm:$0xf0]  ;;  %v565_v54 = vor.u32 %v721_v49, %v564_v48  ;;  %v617_v55 = vor.u32 %v732_v50, %v614_v51  ;;  %v596_v57 = vld [vmem:[%s1055_s0 + $0x68] sm:$0xf]  ;;  %v728_v58 = vld [vmem:[%s1055_s0 + $0x70] sm:$0xf0] }
  0x17   :  { %761 = vmatpush.bf16.msra.mxu3 %v740_v15  ;;  %395 = vmatpush.bf16.msra.mxu1 %v748_v16  ;;  %v569_v56 = vor.u32 %v720_v52, %v566_v53  ;;  %v597_v59 = vor.u32 %v728_v58, %v596_v57  ;;  %v576_v60 = vld [vmem:[%s1055_s0 + $0x48] sm:$0xf]  ;;  %v724_v61 = vld [vmem:[%s1055_s0 + $0x50] sm:$0xf0]  ;;  %v735_v62 = vld [vmem:[%s1055_s0 + $0xac] sm:$0xf] }
  0x18   :  { %v626_v63 = vld [vmem:[%s1055_s0 + $0xb4] sm:$0xf0]  ;;  %v723_v0 = vld [vmem:[%s1055_s0 + $0x4c] sm:$0xf]  ;;  %v588_v8 = vld [vmem:[%s1055_s0 + $0x60] sm:$0xf] }
  0x19   :  { %v578_v1 = vld [vmem:[%s1055_s0 + $0x54] sm:$0xf0]  ;;  %v629_v3 = vor.u32 %v735_v62, %v626_v63  ;;  %v731_v6 = vld [vmem:[%s1055_s0 + $0x88] sm:$0xf0]  ;;  %v590_v11 = vld [vmem:[%s1055_s0 + $0x6c] sm:$0xf0] }
  0x1a   :  { %707 = vmatmul.msk.bf16.gmra.mxu2 %vm316_vm0, %v561_v19  ;;  %347 = vmatpush.bf16.msra.mxu0 %v739_v20  ;;  %v581_v4 = vor.u32 %v723_v0, %v578_v1  ;;  %v727_v9 = vld [vmem:[%s1055_s0 + $0x68] sm:$0xf0]  ;;  %v734_v15 = vld [vmem:[%s1055_s0 + $0xa0] sm:$0xf0]  ;;  %v600_v17 = vld [vmem:[%s1055_s0 + $0x78] sm:$0xf] }
  0x1b   :  { %762 = vmatpush.bf16.msra.mxu3 %v739_v20  ;;  %396 = vmatpush.bf16.msra.mxu1 %v747_v21  ;;  %v730_v18 = vld [vmem:[%s1055_s0 + $0x80] sm:$0xf0]  ;;  %v729_v19 = vld [vmem:[%s1055_s0 + $0x7c] sm:$0xf]  ;;  %v602_v20 = vld [vmem:[%s1055_s0 + $0x84] sm:$0xf0] }
  0x1c   :  { %v737_v24 = vld [vmem:[%s1055_s0 + $0xb8] sm:$0xf0]  ;;  %v1034_v28 = vld [vmem:[%s1057_s2] ss:$0 sm:$0xff] }
  0x1e   :  { %348 = vmatpush.bf16.msra.mxu0 %v738_v22 }
  0x1f   :  { %763 = vmatpush.bf16.msra.mxu3 %v738_v22  ;;  %397 = vmatpush.bf16.msra.mxu1 %v746_v23  ;;  %v605_v22 = vor.u32 %v729_v19, %v602_v20 }
  0x21   :  { %349 = vmatmul.bf16.vlgmr.msra.gmra.mxu0 %v541_v30 }
  0x22   :  { %379 = vmatmul.bf16.vlgmr.msra.gmra.mxu3 %v613_v31  ;;  %398 = vmatmul.bf16.vlgmr.msra.gmra.mxu1 %v545_v32 }
  0x23   :  { %764 = vmatpush.bf16.msrb.mxu3 %v753_v2  ;;  %v577_v2 = vor.u32 %v724_v61, %v576_v60 }
  0x27   :  { %765 = vmatpush.bf16.msrb.mxu3 %v752_v5  ;;  %v608_v5 = vld [vmem:[%s1055_s0 + $0x80] sm:$0xf] }
  0x28   :  { %v609_v7 = vor.u32 %v731_v6, %v608_v5 }
  0x2a   :  { %708 = vmatmul.msk.bf16.gmra.mxu2 %vm316_vm0, %v573_v35 }
  0x2b   :  { %766 = vmatpush.bf16.msrb.mxu3 %v751_v10  ;;  %v726_v10 = vld [vmem:[%s1055_s0 + $0x64] sm:$0xf] }
  0x2c   :  { %v593_v13 = vor.u32 %v726_v10, %v590_v11 }
  0x2f   :  { %767 = vmatpush.bf16.msrb.mxu3 %v750_v12  ;;  %v589_v12 = vor.u32 %v727_v9, %v588_v8 }
  0x31   :  { %354 = vmatmul.bf16.gmra.mxu0 %v553_v42 }
  0x32   :  { %384 = vmatmul.bf16.gmra.mxu3 %v625_v43  ;;  %403 = vmatmul.bf16.gmra.mxu1 %v557_v44 }
  0x33   :  { %768 = vmatpush.bf16.msrb.mxu3 %v749_v14  ;;  %v620_v14 = vld [vmem:[%s1055_s0 + $0x98] sm:$0xf] }
  0x37   :  { %769 = vmatpush.bf16.msrb.mxu3 %v748_v16  ;;  %v621_v16 = vor.u32 %v734_v15, %v620_v14 }
  0x3a   :  { %709 = vmatmul.msk.bf16.gmra.mxu2 %vm316_vm0, %v585_v47 }
  0x3b   :  { %770 = vmatpush.bf16.msrb.mxu3 %v747_v21  ;;  %v601_v21 = vor.u32 %v730_v18, %v600_v17 }
  0x3f   :  { %771 = vmatpush.bf16.msrb.mxu3 %v746_v23  ;;  %v632_v23 = vld [vmem:[%s1055_s0 + $0xb0] sm:$0xf]  ;;  %s802_s0 = smov [#allocation2]  }
  0x40   :  { %v633_v25 = vor.u32 %v737_v24, %v632_v23  ;;  %s524_s2 = sshll.u32 %s802_s0, 4  ;;  %s525_s2 = int_to_ptr.vmem [resolvable:$true] %s524_s2 }
  0x41   :  { %359 = vmatmul.bf16.gmra.mxu0 %v565_v54 }
  0x42   :  { %428 = vmatmul.bf16.vlgmr.msrb.gmra.mxu3 %v617_v55  ;;  %408 = vmatmul.bf16.gmra.mxu1 %v569_v56 }
  0x4a   :  { %710 = vmatmul.msk.bf16.gmra.mxu2 %vm316_vm0, %v597_v59 }
  0x51   :  { %364 = vmatmul.bf16.gmra.mxu0 %v577_v2 }
  0x52   :  { %433 = vmatmul.bf16.gmra.mxu3 %v629_v3  ;;  %413 = vmatmul.bf16.gmra.mxu1 %v581_v4 }
  0x5a   :  { %711 = vmatmul.msk.bf16.gmra.mxu2 %vm316_vm0, %v609_v7 }
  0x61   :  { %369 = vmatmul.bf16.gmra.mxu0 %v589_v12 }
  0x62   :  { %418 = vmatmul.bf16.gmra.mxu1 %v593_v13 }
  0x6a   :  { %712 = vmatmul.msk.bf16.gmra.mxu2 %vm316_vm0, %v621_v16 }
  0x71   :  { %374 = vmatmul.bf16.gmra.mxu0 %v601_v21 }
  0x72   :  { %423 = vmatmul.bf16.gmra.mxu1 %v605_v22 }
  0x7a   :  { %713 = vmatmul.msk.bf16.gmra.mxu2 %vm316_vm0, %v633_v25 }
  0x8d   :  { %v448_v26 = vpop.f32.mrf.mxu2 }
  0x95   :  { %v450_v27 = vpop.f32.mrf.mxu2 }
  0x9d   :  { %v453_v29 = vpop.f32.mrf.mxu2 }
  0x9e   :  { %v350_v30 = vpop.f32.mrf.mxu0 }
  0x9f   :  { %v351_v31 = vadd.f32 %v1034_v28, %v350_v30  ;;  %v399_v32 = vpop.f32.mrf.mxu1 }
  0xa1   :  { %v400_v33 = vadd.f32 %v399_v32, %v351_v31 }
  0xa3   :  { %v449_v34 = vadd.f32 %v448_v26, %v400_v33 }
  0xa5   :  { %v488_v35 = vmax.f32 %v449_v34, 0.0  ;;  %v455_v36 = vpop.f32.mrf.mxu2  ;;  %v380_v55 = vpop.f32.mrf.mxu3 }
  0xa6   :  { %v352_v37 = vpop.f32.mrf.mxu0 }
  0xa7   :  { %504 = vst [vmem:[#allocation2] sm:$0xff] %v488_v35  ;;  %v353_v38 = vadd.f32 %v1034_v28, %v352_v37  ;;  %v401_v39 = vpop.f32.mrf.mxu1 }
  0xa9   :  { %v402_v40 = vadd.f32 %v401_v39, %v353_v38  ;;  %v381_v38 = vadd.f32 %v1034_v28, %v380_v55 }
  0xab   :  { %v451_v41 = vadd.f32 %v450_v27, %v402_v40 }
  0xad   :  { %v489_v42 = vmax.f32 %v451_v41, 0.0  ;;  %v458_v43 = vpop.f32.mrf.mxu2  ;;  %v382_v0 = vpop.f32.mrf.mxu3 }
  0xae   :  { %v355_v44 = vpop.f32.mrf.mxu0 }
  0xaf   :  { %505 = vst [vmem:[#allocation2 + $0x8] sm:$0xff] %v489_v42  ;;  %v356_v45 = vadd.f32 %v1034_v28, %v355_v44  ;;  %v404_v46 = vpop.f32.mrf.mxu1 }
  0xb1   :  { %v405_v47 = vadd.f32 %v404_v46, %v356_v45 }
  0xb3   :  { %v454_v48 = vadd.f32 %v453_v29, %v405_v47 }
  0xb5   :  { %v490_v49 = vmax.f32 %v454_v48, 0.0  ;;  %v460_v50 = vpop.f32.mrf.mxu2  ;;  %v385_v11 = vpop.f32.mrf.mxu3 }
  0xb6   :  { %v357_v51 = vpop.f32.mrf.mxu0 }
  0xb7   :  { %506 = vst [vmem:[#allocation2 + $0x10] sm:$0xff] %v490_v49  ;;  %v358_v52 = vadd.f32 %v1034_v28, %v357_v51  ;;  %v406_v53 = vpop.f32.mrf.mxu1  ;;  %v383_v49 = vadd.f32 %v1034_v28, %v382_v0 }
  0xb9   :  { %v407_v54 = vadd.f32 %v406_v53, %v358_v52 }
  0xbb   :  { %v456_v56 = vadd.f32 %v455_v36, %v407_v54 }
  0xbd   :  { %v491_v57 = vmax.f32 %v456_v56, 0.0  ;;  %v463_v58 = vpop.f32.mrf.mxu2  ;;  %v387_v21 = vpop.f32.mrf.mxu3 }
  0xbe   :  { %v360_v59 = vpop.f32.mrf.mxu0 }
  0xbf   :  { %507 = vst [vmem:[#allocation2 + $0x18] sm:$0xff] %v491_v57  ;;  %v361_v60 = vadd.f32 %v1034_v28, %v360_v59  ;;  %v409_v61 = vpop.f32.mrf.mxu1 }
  0xc1   :  { %v410_v62 = vadd.f32 %v409_v61, %v361_v60  ;;  %v386_v61 = vadd.f32 %v1034_v28, %v385_v11 }
  0xc3   :  { %v459_v63 = vadd.f32 %v458_v43, %v410_v62 }
  0xc5   :  { %v492_v1 = vmax.f32 %v459_v63, 0.0  ;;  %v465_v2 = vpop.f32.mrf.mxu2  ;;  %v429_v31 = vpop.f32.mrf.mxu3 }
  0xc6   :  { %v362_v3 = vpop.f32.mrf.mxu0  ;;  %v430_v41 = vadd.f32 %v429_v31, %v381_v38 }
  0xc7   :  { %508 = vst [vmem:[#allocation2 + $0x20] sm:$0xff] %v492_v1  ;;  %v363_v4 = vadd.f32 %v1034_v28, %v362_v3  ;;  %v411_v5 = vpop.f32.mrf.mxu1 }
  0xc9   :  { %v412_v6 = vadd.f32 %v411_v5, %v363_v4  ;;  %v388_v5 = vadd.f32 %v1034_v28, %v387_v21 }
  0xcb   :  { %v461_v7 = vadd.f32 %v460_v50, %v412_v6 }
  0xcd   :  { %v493_v8 = vmax.f32 %v461_v7, 0.0  ;;  %v468_v9 = vpop.f32.mrf.mxu2  ;;  %v431_v42 = vpop.f32.mrf.mxu3 }
  0xce   :  { %v365_v10 = vpop.f32.mrf.mxu0  ;;  %v432_v53 = vadd.f32 %v431_v42, %v383_v49 }
  0xcf   :  { %509 = vst [vmem:[#allocation2 + $0x28] sm:$0xff] %v493_v8  ;;  %v366_v12 = vadd.f32 %v1034_v28, %v365_v10  ;;  %v414_v13 = vpop.f32.mrf.mxu1 }
  0xd1   :  { %v415_v14 = vadd.f32 %v414_v13, %v366_v12 }
  0xd3   :  { %v464_v15 = vadd.f32 %v463_v58, %v415_v14 }
  0xd5   :  { %v494_v16 = vmax.f32 %v464_v15, 0.0  ;;  %v470_v17 = vpop.f32.mrf.mxu2  ;;  %v434_v58 = vpop.f32.mrf.mxu3 }
  0xd6   :  { %v367_v18 = vpop.f32.mrf.mxu0  ;;  %v435_v1 = vadd.f32 %v434_v58, %v386_v61 }
  0xd7   :  { %510 = vst [vmem:[#allocation2 + $0x30] sm:$0xff] %v494_v16  ;;  %v368_v19 = vadd.f32 %v1034_v28, %v367_v18  ;;  %v416_v20 = vpop.f32.mrf.mxu1 }
  0xd9   :  { %v417_v22 = vadd.f32 %v416_v20, %v368_v19 }
  0xdb   :  { %v466_v23 = vadd.f32 %v465_v2, %v417_v22 }
  0xdd   :  { %v495_v24 = vmax.f32 %v466_v23, 0.0  ;;  %v473_v25 = vpop.f32.mrf.mxu2  ;;  %v436_v7 = vpop.f32.mrf.mxu3 }
  0xde   :  { %v370_v26 = vpop.f32.mrf.mxu0  ;;  %v437_v8 = vadd.f32 %v436_v7, %v388_v5 }
  0xdf   :  { %511 = vst [vmem:[#allocation2 + $0x38] sm:$0xff] %v495_v24  ;;  %v371_v27 = vadd.f32 %v1034_v28, %v370_v26  ;;  %v419_v29 = vpop.f32.mrf.mxu1 }
  0xe1   :  { %v420_v30 = vadd.f32 %v419_v29, %v371_v27 }
  0xe3   :  { %v469_v32 = vadd.f32 %v468_v9, %v420_v30 }
  0xe5   :  { %v496_v33 = vmax.f32 %v469_v32, 0.0  ;;  %v475_v34 = vpop.f32.mrf.mxu2 }
  0xe6   :  { %v372_v35 = vpop.f32.mrf.mxu0 }
  0xe7   :  { %512 = vst [vmem:[#allocation2 + $0x40] sm:$0xff] %v496_v33  ;;  %v373_v36 = vadd.f32 %v1034_v28, %v372_v35  ;;  %v421_v37 = vpop.f32.mrf.mxu1 }
  0xe9   :  { %v422_v39 = vadd.f32 %v421_v37, %v373_v36 }
  0xeb   :  { %v471_v40 = vadd.f32 %v470_v17, %v422_v39 }
  0xed   :  { %v497_v43 = vmax.f32 %v471_v40, 0.0  ;;  %v478_v44 = vpop.f32.mrf.mxu2 }
  0xee   :  { %v479_v45 = vadd.f32 %v478_v44, %v430_v41  ;;  %v375_v46 = vpop.f32.mrf.mxu0 }
  0xef   :  { %513 = vst [vmem:[#allocation2 + $0x48] sm:$0xff] %v497_v43  ;;  %v376_v47 = vadd.f32 %v1034_v28, %v375_v46  ;;  %v424_v48 = vpop.f32.mrf.mxu1 }
  0xf0   :  { %v500_v50 = vmax.f32 %v479_v45, 0.0 }
  0xf1   :  { %v425_v51 = vadd.f32 %v424_v48, %v376_v47 }
  0xf2   :  { %516 = vst [vmem:[#allocation2 + $0x60] sm:$0xff] %v500_v50 }
  0xf3   :  { %v474_v52 = vadd.f32 %v473_v25, %v425_v51 }
  0xf5   :  { %v498_v54 = vmax.f32 %v474_v52, 0.0  ;;  %v480_v55 = vpop.f32.mrf.mxu2 }
  0xf6   :  { %v481_v56 = vadd.f32 %v480_v55, %v432_v53  ;;  %v377_v57 = vpop.f32.mrf.mxu0 }
  0xf7   :  { %514 = vst [vmem:[#allocation2 + $0x50] sm:$0xff] %v498_v54  ;;  %v378_v59 = vadd.f32 %v1034_v28, %v377_v57  ;;  %v426_v60 = vpop.f32.mrf.mxu1 }
  0xf8   :  { %v501_v62 = vmax.f32 %v481_v56, 0.0 }
  0xf9   :  { %v427_v63 = vadd.f32 %v426_v60, %v378_v59 }
  0xfa   :  { %517 = vst [vmem:[#allocation2 + $0x68] sm:$0xff] %v501_v62 }
  0xfb   :  { %v476_v0 = vadd.f32 %v475_v34, %v427_v63 }
  0xfd   :  { %v499_v2 = vmax.f32 %v476_v0, 0.0  ;;  %v483_v3 = vpop.f32.mrf.mxu2 }
  0xfe   :  { %v484_v4 = vadd.f32 %v483_v3, %v435_v1 }
  0xff   :  { %515 = vst [vmem:[#allocation2 + $0x58] sm:$0xff] %v499_v2 }
 0x100   :  { %v502_v6 = vmax.f32 %v484_v4, 0.0 }
 0x102   :  { %518 = vst [vmem:[#allocation2 + $0x70] sm:$0xff] %v502_v6 }
 0x105   :  { %v485_v9 = vpop.f32.mrf.mxu2 }
 0x106   :  { %v486_v10 = vadd.f32 %v485_v9, %v437_v8 }
 0x108   :  { %v503_v11 = vmax.f32 %v486_v10, 0.0 }
 0x10a   :  { %519 = vst [vmem:[#allocation2 + $0x78] sm:$0xff] %v503_v11 }
 0x10b   :  { %532 = dma.vmem_to_hbm [thread:$0]  %s525_s2, 2048, %s527_s1, [#allocation3], %s803_s10, %s803_s10, %s804_s11  }
 0x10c   :  { %800 = dma.done.wait [#allocation3], 2048  }
 0x10d   :  { %801 = vsyncadd [#allocation3], 4294965248 }
 0x10e   :  { %537 = vsyncpa [#allocation3], 1 }

// kernel: context_path_forward.28
= control target key start
LH: loop header
LB: loop body
LE: loop exit
PB: predicated region body
PF: predicated region fallthrough
CT: control target
= control target key end

     0   :  { %s1745_s0 = inlined_call_operand.vmem [shape: bf16[32,1152], index: 0, kind: input, shape index: {}]   ;;  %s1746_s1 = inlined_call_operand.vmem [shape: bf16[1152,128], index: 1, kind: input, shape index: {}]   ;;  %s1747_s2 = inlined_call_operand.vmem [shape: f32[1,128], index: 2, kind: input, shape index: {}]   ;;  %s1748_s3 = inlined_call_operand.hbm [shape: f32[32,128], index: 3, kind: output, shape index: {}]  }
   0x1   :  { %v1289_v0 = vld [vmem:[%s1746_s1 + $0x38] sm:$0xff]  ;;  %v1288_v4 = vld [vmem:[%s1746_s1 + $0x30] sm:$0xff]  ;;  %v1287_v8 = vld [vmem:[%s1746_s1 + $0x28] sm:$0xff] }
   0x2   :  { %v1297_v1 = vld [vmem:[%s1746_s1 + $0x78] sm:$0xff]  ;;  %707 = vmatpush.bf16.msra.mxu0 %v1289_v0  ;;  %v1296_v5 = vld [vmem:[%s1746_s1 + $0x70] sm:$0xff]  ;;  %v1295_v9 = vld [vmem:[%s1746_s1 + $0x68] sm:$0xff] }
   0x3   :  { %v1305_v2 = vld [vmem:[%s1746_s1 + $0xb8] sm:$0xff]  ;;  %726 = vmatpush.bf16.msra.mxu1 %v1297_v1  ;;  %v1304_v6 = vld [vmem:[%s1746_s1 + $0xb0] sm:$0xff]  ;;  %v1303_v10 = vld [vmem:[%s1746_s1 + $0xa8] sm:$0xff] }
   0x4   :  { %v1313_v3 = vld [vmem:[%s1746_s1 + $0xf8] sm:$0xff]  ;;  %745 = vmatpush.bf16.msra.mxu2 %v1305_v2  ;;  %v1312_v7 = vld [vmem:[%s1746_s1 + $0xf0] sm:$0xff]  ;;  %v1311_v11 = vld [vmem:[%s1746_s1 + $0xe8] sm:$0xff] }
   0x5   :  { %764 = vmatpush.bf16.msra.mxu3 %v1313_v3  ;;  %v1286_v12 = vld [vmem:[%s1746_s1 + $0x20] sm:$0xff]  ;;  %v1285_v16 = vld [vmem:[%s1746_s1 + $0x18] sm:$0xff]  ;;  %v1284_v20 = vld [vmem:[%s1746_s1 + $0x10] sm:$0xff] }
   0x6   :  { %708 = vmatpush.bf16.msra.mxu0 %v1288_v4  ;;  %v1294_v13 = vld [vmem:[%s1746_s1 + $0x60] sm:$0xff]  ;;  %v1293_v17 = vld [vmem:[%s1746_s1 + $0x58] sm:$0xff]  ;;  %v1292_v21 = vld [vmem:[%s1746_s1 + $0x50] sm:$0xff] }
   0x7   :  { %727 = vmatpush.bf16.msra.mxu1 %v1296_v5  ;;  %v1302_v14 = vld [vmem:[%s1746_s1 + $0xa0] sm:$0xff]  ;;  %v1301_v18 = vld [vmem:[%s1746_s1 + $0x98] sm:$0xff]  ;;  %v1300_v22 = vld [vmem:[%s1746_s1 + $0x90] sm:$0xff] }
   0x8   :  { %746 = vmatpush.bf16.msra.mxu2 %v1304_v6  ;;  %v1310_v15 = vld [vmem:[%s1746_s1 + $0xe0] sm:$0xff]  ;;  %v1309_v19 = vld [vmem:[%s1746_s1 + $0xd8] sm:$0xff]  ;;  %v1308_v23 = vld [vmem:[%s1746_s1 + $0xd0] sm:$0xff] }
   0x9   :  { %765 = vmatpush.bf16.msra.mxu3 %v1312_v7  ;;  %v1283_v24 = vld [vmem:[%s1746_s1 + $0x8] sm:$0xff]  ;;  %v1282_v28 = vld [vmem:[%s1746_s1] sm:$0xff] }
   0xa   :  { %709 = vmatpush.bf16.msra.mxu0 %v1287_v8  ;;  %v1291_v25 = vld [vmem:[%s1746_s1 + $0x48] sm:$0xff]  ;;  %v1290_v29 = vld [vmem:[%s1746_s1 + $0x40] sm:$0xff] }
   0xb   :  { %728 = vmatpush.bf16.msra.mxu1 %v1295_v9  ;;  %v1299_v26 = vld [vmem:[%s1746_s1 + $0x88] sm:$0xff]  ;;  %v906_v30 = vld [vmem:[%s1745_s0] sm:$0xf]  ;;  %v1268_v33 = vld [vmem:[%s1745_s0 + $0x20] sm:$0xf0] }
   0xc   :  { %747 = vmatpush.bf16.msra.mxu2 %v1303_v10  ;;  %v1307_v27 = vld [vmem:[%s1746_s1 + $0xc8] sm:$0xff]  ;;  %v1298_v31 = vld [vmem:[%s1746_s1 + $0x80] sm:$0xff] }
   0xd   :  { %766 = vmatpush.bf16.msra.mxu3 %v1311_v11  ;;  %v1306_v32 = vld [vmem:[%s1746_s1 + $0xc0] sm:$0xff] }
   0xe   :  { %710 = vmatpush.bf16.msra.mxu0 %v1286_v12 }
   0xf   :  { %729 = vmatpush.bf16.msra.mxu1 %v1294_v13 }
  0x10   :  { %748 = vmatpush.bf16.msra.mxu2 %v1302_v14 }
  0x11   :  { %767 = vmatpush.bf16.msra.mxu3 %v1310_v15 }
  0x12   :  { %711 = vmatpush.bf16.msra.mxu0 %v1285_v16 }
  0x13   :  { %730 = vmatpush.bf16.msra.mxu1 %v1293_v17 }
  0x14   :  { %749 = vmatpush.bf16.msra.mxu2 %v1301_v18 }
  0x15   :  { %768 = vmatpush.bf16.msra.mxu3 %v1309_v19 }
  0x16   :  { %712 = vmatpush.bf16.msra.mxu0 %v1284_v20 }
  0x17   :  { %731 = vmatpush.bf16.msra.mxu1 %v1292_v21 }
  0x18   :  { %750 = vmatpush.bf16.msra.mxu2 %v1300_v22 }
  0x19   :  { %769 = vmatpush.bf16.msra.mxu3 %v1308_v23 }
  0x1a   :  { %8 = vsyncpa [#allocation3], 0  ;;  %713 = vmatpush.bf16.msra.mxu0 %v1283_v24  ;;  %v1264_v34 = vld [vmem:[%s1745_s0 + $0x4] sm:$0xf]  ;;  %v908_v35 = vld [vmem:[%s1745_s0 + $0x24] sm:$0xf0]  ;;  %v907_v42 = vor.u32 %v1268_v33, %v906_v30 }
  0x1b   :  { %732 = vmatpush.bf16.msra.mxu1 %v1291_v25  ;;  %v914_v36 = vld [vmem:[%s1745_s0 + $0x8] sm:$0xf]  ;;  %v1269_v37 = vld [vmem:[%s1745_s0 + $0x28] sm:$0xf0]  ;;  %v916_v39 = vld [vmem:[%s1745_s0 + $0x2c] sm:$0xf0]  ;;  %v911_v43 = vor.u32 %v1264_v34, %v908_v35 }
  0x1c   :  { %751 = vmatpush.bf16.msra.mxu2 %v1299_v26  ;;  %v1265_v38 = vld [vmem:[%s1745_s0 + $0xc] sm:$0xf]  ;;  %v1321_v40 = vld [vmem:[%s1746_s1 + $0x138] sm:$0xff]  ;;  %v915_v44 = vor.u32 %v1269_v37, %v914_v36  ;;  %v1320_v48 = vld [vmem:[%s1746_s1 + $0x130] sm:$0xff]  ;;  %s892_s15 = sshll.u32 %s1748_s3, 4  ;;  %s1393_s16 = smov 128   ;;  %s893_s15 = int_to_ptr.hbm [resolvable:$true] %s892_s15 }
  0x1d   :  { %770 = vmatpush.bf16.msra.mxu3 %v1307_v27  ;;  %v1329_v41 = vld [vmem:[%s1746_s1 + $0x178] sm:$0xff]  ;;  %v919_v45 = vor.u32 %v1265_v38, %v916_v39  ;;  %v1328_v49 = vld [vmem:[%s1746_s1 + $0x170] sm:$0xff]  ;;  %v1319_v52 = vld [vmem:[%s1746_s1 + $0x128] sm:$0xff]  ;;  %s1394_s17 = smov 8  }
  0x1e   :  { %714 = vmatpush.bf16.msra.mxu0 %v1282_v28  ;;  %v1337_v46 = vld [vmem:[%s1746_s1 + $0x1b8] sm:$0xff]  ;;  %v1336_v50 = vld [vmem:[%s1746_s1 + $0x1b0] sm:$0xff]  ;;  %v1327_v53 = vld [vmem:[%s1746_s1 + $0x168] sm:$0xff] }
  0x1f   :  { %733 = vmatpush.bf16.msra.mxu1 %v1290_v29  ;;  %v1345_v47 = vld [vmem:[%s1746_s1 + $0x1f8] sm:$0xff]  ;;  %v1344_v51 = vld [vmem:[%s1746_s1 + $0x1f0] sm:$0xff]  ;;  %v1335_v54 = vld [vmem:[%s1746_s1 + $0x1a8] sm:$0xff] }
  0x20   :  { %752 = vmatpush.bf16.msra.mxu2 %v1298_v31  ;;  %v1343_v55 = vld [vmem:[%s1746_s1 + $0x1e8] sm:$0xff]  ;;  %v1318_v56 = vld [vmem:[%s1746_s1 + $0x120] sm:$0xff]  ;;  %v944_v63 = vld [vmem:[%s1745_s0 + $0x6c] sm:$0xf0] }
  0x21   :  { %771 = vmatpush.bf16.msra.mxu3 %v1306_v32  ;;  %715 = vmatmul.bf16.vlgmr.msra.gmra.mxu0 %v907_v42  ;;  %v1326_v57 = vld [vmem:[%s1746_s1 + $0x160] sm:$0xff]  ;;  %v942_v60 = vld [vmem:[%s1745_s0 + $0x48] sm:$0xf]  ;;  %v1277_v61 = vld [vmem:[%s1745_s0 + $0x68] sm:$0xf0] }
  0x22   :  { %783 = vmatpush.bf16.msrb.mxu0 %v1321_v40  ;;  %734 = vmatmul.bf16.vlgmr.msra.gmra.mxu1 %v911_v43  ;;  %v1334_v58 = vld [vmem:[%s1746_s1 + $0x1a0] sm:$0xff]  ;;  %v1273_v62 = vld [vmem:[%s1745_s0 + $0x4c] sm:$0xf]  ;;  %v950_v0 = vld [vmem:[%s1745_s0 + $0x50] sm:$0xf]  ;;  %v943_v6 = vor.u32 %v1277_v61, %v942_v60 }
  0x23   :  { %802 = vmatpush.bf16.msrb.mxu1 %v1329_v41  ;;  %753 = vmatmul.bf16.vlgmr.msra.gmra.mxu2 %v915_v44  ;;  %v1342_v59 = vld [vmem:[%s1746_s1 + $0x1e0] sm:$0xff]  ;;  %v1278_v1 = vld [vmem:[%s1745_s0 + $0x70] sm:$0xf0]  ;;  %v952_v3 = vld [vmem:[%s1745_s0 + $0x74] sm:$0xf0]  ;;  %v947_v7 = vor.u32 %v1273_v62, %v944_v63 }
  0x24   :  { %772 = vmatmul.bf16.vlgmr.msra.gmra.mxu3 %v919_v45  ;;  %821 = vmatpush.bf16.msrb.mxu2 %v1337_v46  ;;  %v1274_v2 = vld [vmem:[%s1745_s0 + $0x54] sm:$0xf]  ;;  %v1317_v4 = vld [vmem:[%s1746_s1 + $0x118] sm:$0xff]  ;;  %v951_v8 = vor.u32 %v1278_v1, %v950_v0  ;;  %v1315_v16 = vld [vmem:[%s1746_s1 + $0x108] sm:$0xff] }
  0x25   :  { %840 = vmatpush.bf16.msrb.mxu3 %v1345_v47  ;;  %v1325_v5 = vld [vmem:[%s1746_s1 + $0x158] sm:$0xff]  ;;  %v955_v9 = vor.u32 %v1274_v2, %v952_v3  ;;  %v1316_v12 = vld [vmem:[%s1746_s1 + $0x110] sm:$0xff]  ;;  %v1323_v17 = vld [vmem:[%s1746_s1 + $0x148] sm:$0xff] }
  0x26   :  { %784 = vmatpush.bf16.msrb.mxu0 %v1320_v48  ;;  %v1333_v10 = vld [vmem:[%s1746_s1 + $0x198] sm:$0xff]  ;;  %v1324_v13 = vld [vmem:[%s1746_s1 + $0x150] sm:$0xff]  ;;  %v1331_v18 = vld [vmem:[%s1746_s1 + $0x188] sm:$0xff] }
  0x27   :  { %803 = vmatpush.bf16.msrb.mxu1 %v1328_v49  ;;  %v1341_v11 = vld [vmem:[%s1746_s1 + $0x1d8] sm:$0xff]  ;;  %v1332_v14 = vld [vmem:[%s1746_s1 + $0x190] sm:$0xff]  ;;  %v1339_v19 = vld [vmem:[%s1746_s1 + $0x1c8] sm:$0xff] }
  0x28   :  { %822 = vmatpush.bf16.msrb.mxu2 %v1336_v50  ;;  %v1340_v15 = vld [vmem:[%s1746_s1 + $0x1d0] sm:$0xff]  ;;  %v1314_v20 = vld [vmem:[%s1746_s1 + $0x100] sm:$0xff]  ;;  %v1353_v26 = vld [vmem:[%s1746_s1 + $0x238] sm:$0xff] }
  0x29   :  { %841 = vmatpush.bf16.msrb.mxu3 %v1344_v51  ;;  %v1322_v21 = vld [vmem:[%s1746_s1 + $0x140] sm:$0xff]  ;;  %v922_v24 = vld [vmem:[%s1745_s0 + $0x10] sm:$0xf]  ;;  %v1270_v25 = vld [vmem:[%s1745_s0 + $0x30] sm:$0xf0] }
  0x2a   :  { %785 = vmatpush.bf16.msrb.mxu0 %v1319_v52  ;;  %v1330_v22 = vld [vmem:[%s1746_s1 + $0x180] sm:$0xff]  ;;  %v1266_v27 = vld [vmem:[%s1745_s0 + $0x14] sm:$0xf]  ;;  %v924_v28 = vld [vmem:[%s1745_s0 + $0x34] sm:$0xf0]  ;;  %v923_v33 = vor.u32 %v1270_v25, %v922_v24 }
  0x2b   :  { %804 = vmatpush.bf16.msrb.mxu1 %v1327_v53  ;;  %v1338_v23 = vld [vmem:[%s1746_s1 + $0x1c0] sm:$0xff]  ;;  %v930_v29 = vld [vmem:[%s1745_s0 + $0x18] sm:$0xf]  ;;  %v1271_v30 = vld [vmem:[%s1745_s0 + $0x38] sm:$0xf0]  ;;  %v927_v34 = vor.u32 %v1266_v27, %v924_v28 }
  0x2c   :  { %823 = vmatpush.bf16.msrb.mxu2 %v1335_v54  ;;  %v1267_v31 = vld [vmem:[%s1745_s0 + $0x1c] sm:$0xf]  ;;  %v932_v32 = vld [vmem:[%s1745_s0 + $0x3c] sm:$0xf0]  ;;  %v931_v35 = vor.u32 %v1271_v30, %v930_v29  ;;  %v1352_v37 = vld [vmem:[%s1746_s1 + $0x230] sm:$0xff] }
  0x2d   :  { %842 = vmatpush.bf16.msrb.mxu3 %v1343_v55  ;;  %v935_v36 = vor.u32 %v1267_v31, %v932_v32  ;;  %v1351_v38 = vld [vmem:[%s1746_s1 + $0x228] sm:$0xff]  ;;  %v1350_v39 = vld [vmem:[%s1746_s1 + $0x220] sm:$0xff]  ;;  %v958_v40 = vld [vmem:[%s1745_s0 + $0x58] sm:$0xf] }
  0x2e   :  { %786 = vmatpush.bf16.msrb.mxu0 %v1318_v56  ;;  %v1279_v41 = vld [vmem:[%s1745_s0 + $0x78] sm:$0xf0]  ;;  %v960_v43 = vld [vmem:[%s1745_s0 + $0x7c] sm:$0xf0]  ;;  %v1280_v45 = vld [vmem:[%s1745_s0 + $0x80] sm:$0xf0] }
  0x2f   :  { %805 = vmatpush.bf16.msrb.mxu1 %v1326_v57  ;;  %v1275_v42 = vld [vmem:[%s1745_s0 + $0x5c] sm:$0xf]  ;;  %v966_v44 = vld [vmem:[%s1745_s0 + $0x60] sm:$0xf]  ;;  %v1276_v46 = vld [vmem:[%s1745_s0 + $0x64] sm:$0xf]  ;;  %v959_v49 = vor.u32 %v1279_v41, %v958_v40 }
  0x30   :  { %824 = vmatpush.bf16.msrb.mxu2 %v1334_v58  ;;  %v968_v47 = vld [vmem:[%s1745_s0 + $0x84] sm:$0xf0]  ;;  %v1349_v48 = vld [vmem:[%s1746_s1 + $0x218] sm:$0xff]  ;;  %v963_v50 = vor.u32 %v1275_v42, %v960_v43  ;;  %v967_v51 = vor.u32 %v1280_v45, %v966_v44  ;;  %v1348_v53 = vld [vmem:[%s1746_s1 + $0x210] sm:$0xff] }
  0x31   :  { %843 = vmatpush.bf16.msrb.mxu3 %v1342_v59  ;;  %720 = vmatmul.bf16.gmra.mxu0 %v943_v6  ;;  %v971_v52 = vor.u32 %v1276_v46, %v968_v47  ;;  %v1347_v54 = vld [vmem:[%s1746_s1 + $0x208] sm:$0xff]  ;;  %v1346_v55 = vld [vmem:[%s1746_s1 + $0x200] sm:$0xff] }
  0x32   :  { %787 = vmatpush.bf16.msrb.mxu0 %v1317_v4  ;;  %739 = vmatmul.bf16.gmra.mxu1 %v947_v7  ;;  %v938_v56 = vld [vmem:[%s1745_s0 + $0x20] sm:$0xf]  ;;  %v1272_v57 = vld [vmem:[%s1745_s0 + $0x40] sm:$0xf0]  ;;  %v974_v58 = vld [vmem:[%s1745_s0 + $0x68] sm:$0xf] }
  0x33   :  { %806 = vmatpush.bf16.msrb.mxu1 %v1325_v5  ;;  %758 = vmatmul.bf16.gmra.mxu2 %v951_v8  ;;  %v1281_v59 = vld [vmem:[%s1745_s0 + $0x88] sm:$0xf0]  ;;  %v939_v60 = vor.u32 %v1272_v57, %v938_v56 }
  0x34   :  { %777 = vmatmul.bf16.gmra.mxu3 %v955_v9  ;;  %825 = vmatpush.bf16.msrb.mxu2 %v1333_v10  ;;  %v975_v61 = vor.u32 %v1281_v59, %v974_v58 }
  0x35   :  { %844 = vmatpush.bf16.msrb.mxu3 %v1341_v11 }
  0x36   :  { %788 = vmatpush.bf16.msrb.mxu0 %v1316_v12 }
  0x37   :  { %807 = vmatpush.bf16.msrb.mxu1 %v1324_v13 }
  0x38   :  { %826 = vmatpush.bf16.msrb.mxu2 %v1332_v14 }
  0x39   :  { %845 = vmatpush.bf16.msrb.mxu3 %v1340_v15 }
  0x3a   :  { %789 = vmatpush.bf16.msrb.mxu0 %v1315_v16  ;;  %v1365_v16 = vld [vmem:[%s1747_s2] ss:$0 sm:$0xff]  ;;  %s1392_s2 = smov [#allocation2]  }
  0x3b   :  { %808 = vmatpush.bf16.msrb.mxu1 %v1323_v17  ;;  %s890_s12 = sshll.u32 %s1392_s2, 4  ;;  %s891_s12 = int_to_ptr.vmem [resolvable:$true] %s890_s12 }
  0x3c   :  { %827 = vmatpush.bf16.msrb.mxu2 %v1331_v18 }
  0x3d   :  { %846 = vmatpush.bf16.msrb.mxu3 %v1339_v19 }
  0x3e   :  { %790 = vmatpush.bf16.msrb.mxu0 %v1314_v20 }
  0x3f   :  { %809 = vmatpush.bf16.msrb.mxu1 %v1322_v21 }
  0x40   :  { %828 = vmatpush.bf16.msrb.mxu2 %v1330_v22 }
  0x41   :  { %847 = vmatpush.bf16.msrb.mxu3 %v1338_v23  ;;  %791 = vmatmul.bf16.vlgmr.msrb.gmra.mxu0 %v923_v33 }
  0x42   :  { %859 = vmatpush.bf16.msra.mxu0 %v1353_v26  ;;  %810 = vmatmul.bf16.vlgmr.msrb.gmra.mxu1 %v927_v34 }
  0x43   :  { %1354 = vmatpush.bf16.msra.mxu1 %v1353_v26  ;;  %829 = vmatmul.bf16.vlgmr.msrb.gmra.mxu2 %v931_v35 }
  0x44   :  { %848 = vmatmul.bf16.vlgmr.msrb.gmra.mxu3 %v935_v36 }
  0x46   :  { %860 = vmatpush.bf16.msra.mxu0 %v1352_v37 }
  0x47   :  { %1355 = vmatpush.bf16.msra.mxu1 %v1352_v37 }
  0x4a   :  { %861 = vmatpush.bf16.msra.mxu0 %v1351_v38 }
  0x4b   :  { %1356 = vmatpush.bf16.msra.mxu1 %v1351_v38 }
  0x4e   :  { %862 = vmatpush.bf16.msra.mxu0 %v1350_v39 }
  0x4f   :  { %1357 = vmatpush.bf16.msra.mxu1 %v1350_v39 }
  0x51   :  { %796 = vmatmul.bf16.gmra.mxu0 %v959_v49 }
  0x52   :  { %863 = vmatpush.bf16.msra.mxu0 %v1349_v48  ;;  %815 = vmatmul.bf16.gmra.mxu1 %v963_v50 }
  0x53   :  { %1358 = vmatpush.bf16.msra.mxu1 %v1349_v48  ;;  %834 = vmatmul.bf16.gmra.mxu2 %v967_v51 }
  0x54   :  { %853 = vmatmul.bf16.gmra.mxu3 %v971_v52 }
  0x56   :  { %864 = vmatpush.bf16.msra.mxu0 %v1348_v53 }
  0x57   :  { %1359 = vmatpush.bf16.msra.mxu1 %v1348_v53 }
  0x5a   :  { %865 = vmatpush.bf16.msra.mxu0 %v1347_v54 }
  0x5b   :  { %1360 = vmatpush.bf16.msra.mxu1 %v1347_v54 }
  0x5e   :  { %866 = vmatpush.bf16.msra.mxu0 %v1346_v55 }
  0x5f   :  { %1361 = vmatpush.bf16.msra.mxu1 %v1346_v55 }
  0x61   :  { %867 = vmatmul.bf16.vlgmr.msra.gmra.mxu0 %v939_v60 }
  0x62   :  { %872 = vmatmul.bf16.vlgmr.msra.gmra.mxu1 %v975_v61 }
  0x9e   :  { %v716_v62 = vpop.f32.mrf.mxu0 }
  0x9f   :  { %v735_v63 = vpop.f32.mrf.mxu1  ;;  %v717_v21 = vadd.f32 %v1365_v16, %v716_v62 }
  0xa1   :  { %v736_v23 = vadd.f32 %v735_v63, %v717_v21 }
  0xa6   :  { %v754_v0 = vpop.f32.mrf.mxu2  ;;  %v718_v2 = vpop.f32.mrf.mxu0 }
  0xa7   :  { %v773_v1 = vpop.f32.mrf.mxu3  ;;  %v737_v3 = vpop.f32.mrf.mxu1  ;;  %v755_v25 = vadd.f32 %v754_v0, %v736_v23  ;;  %v719_v30 = vadd.f32 %v1365_v16, %v718_v2 }
  0xa9   :  { %v774_v33 = vadd.f32 %v773_v1, %v755_v25  ;;  %v738_v35 = vadd.f32 %v737_v3, %v719_v30 }
  0xae   :  { %v756_v4 = vpop.f32.mrf.mxu2  ;;  %v721_v6 = vpop.f32.mrf.mxu0 }
  0xaf   :  { %v775_v5 = vpop.f32.mrf.mxu3  ;;  %v740_v7 = vpop.f32.mrf.mxu1  ;;  %v722_v22 = vadd.f32 %v1365_v16, %v721_v6  ;;  %v757_v39 = vadd.f32 %v756_v4, %v738_v35 }
  0xb1   :  { %v741_v24 = vadd.f32 %v740_v7, %v722_v22  ;;  %v776_v46 = vadd.f32 %v775_v5, %v757_v39 }
  0xb6   :  { %v759_v8 = vpop.f32.mrf.mxu2  ;;  %v723_v10 = vpop.f32.mrf.mxu0 }
  0xb7   :  { %v778_v9 = vpop.f32.mrf.mxu3  ;;  %v742_v11 = vpop.f32.mrf.mxu1  ;;  %v760_v26 = vadd.f32 %v759_v8, %v741_v24  ;;  %v724_v31 = vadd.f32 %v1365_v16, %v723_v10 }
  0xb9   :  { %v779_v34 = vadd.f32 %v778_v9, %v760_v26  ;;  %v743_v36 = vadd.f32 %v742_v11, %v724_v31 }
  0xbe   :  { %v761_v12 = vpop.f32.mrf.mxu2  ;;  %v792_v14 = vpop.f32.mrf.mxu0 }
  0xbf   :  { %v780_v13 = vpop.f32.mrf.mxu3  ;;  %v811_v15 = vpop.f32.mrf.mxu1  ;;  %v793_v37 = vadd.f32 %v792_v14, %v774_v33  ;;  %v762_v40 = vadd.f32 %v761_v12, %v743_v36 }
  0xc1   :  { %v812_v44 = vadd.f32 %v811_v15, %v793_v37  ;;  %v781_v47 = vadd.f32 %v780_v13, %v762_v40 }
  0xc6   :  { %v830_v17 = vpop.f32.mrf.mxu2  ;;  %v794_v19 = vpop.f32.mrf.mxu0 }
  0xc7   :  { %v849_v18 = vpop.f32.mrf.mxu3  ;;  %v813_v20 = vpop.f32.mrf.mxu1  ;;  %v831_v48 = vadd.f32 %v830_v17, %v812_v44  ;;  %v795_v51 = vadd.f32 %v794_v19, %v776_v46 }
  0xc9   :  { %v850_v53 = vadd.f32 %v849_v18, %v831_v48  ;;  %v814_v58 = vadd.f32 %v813_v20, %v795_v51 }
  0xce   :  { %v832_v27 = vpop.f32.mrf.mxu2  ;;  %v797_v28 = vpop.f32.mrf.mxu0 }
  0xcf   :  { %v816_v29 = vpop.f32.mrf.mxu1  ;;  %v851_v32 = vpop.f32.mrf.mxu3  ;;  %v798_v38 = vadd.f32 %v797_v28, %v779_v34  ;;  %v833_v62 = vadd.f32 %v832_v27, %v814_v58 }
  0xd1   :  { %v817_v45 = vadd.f32 %v816_v29, %v798_v38  ;;  %v852_v3 = vadd.f32 %v851_v32, %v833_v62 }
  0xd6   :  { %v835_v41 = vpop.f32.mrf.mxu2  ;;  %v799_v42 = vpop.f32.mrf.mxu0 }
  0xd7   :  { %v818_v43 = vpop.f32.mrf.mxu1  ;;  %v836_v49 = vadd.f32 %v835_v41, %v817_v45  ;;  %v854_v50 = vpop.f32.mrf.mxu3  ;;  %v800_v52 = vadd.f32 %v799_v42, %v781_v47 }
  0xd9   :  { %v855_v54 = vadd.f32 %v854_v50, %v836_v49  ;;  %v819_v59 = vadd.f32 %v818_v43, %v800_v52 }
  0xde   :  { %v837_v55 = vpop.f32.mrf.mxu2  ;;  %v868_v56 = vpop.f32.mrf.mxu0 }
  0xdf   :  { %v873_v57 = vpop.f32.mrf.mxu1  ;;  %v869_v60 = vadd.f32 %v868_v56, %v850_v53  ;;  %v838_v63 = vadd.f32 %v837_v55, %v819_v59  ;;  %v856_v2 = vpop.f32.mrf.mxu3 }
  0xe0   :  { %v874_v61 = vadd.f32 %v873_v57, %v855_v54 }
  0xe1   :  { %v878_v0 = vmax.f32 %v869_v60, 0.0  ;;  %v857_v4 = vadd.f32 %v856_v2, %v838_v63 }
  0xe2   :  { %v880_v1 = vmax.f32 %v874_v61, 0.0 }
  0xe3   :  { %882 = vst [vmem:[#allocation2] sm:$0xff] %v878_v0 }
  0xe4   :  { %884 = vst [vmem:[#allocation2 + $0x10] sm:$0xff] %v880_v1 }
  0xe6   :  { %v870_v5 = vpop.f32.mrf.mxu0 }
  0xe7   :  { %v875_v6 = vpop.f32.mrf.mxu1  ;;  %v871_v7 = vadd.f32 %v870_v5, %v852_v3 }
  0xe8   :  { %v876_v8 = vadd.f32 %v875_v6, %v857_v4 }
  0xe9   :  { %v879_v9 = vmax.f32 %v871_v7, 0.0 }
  0xea   :  { %v881_v10 = vmax.f32 %v876_v8, 0.0 }
  0xeb   :  { %883 = vst [vmem:[#allocation2 + $0x8] sm:$0xff] %v879_v9 }
  0xec   :  { %885 = vst [vmem:[#allocation2 + $0x18] sm:$0xff] %v881_v10 }
  0xed   :  { %898 = dma.vmem_to_hbm [thread:$0]  %s891_s12, 512, %s893_s15, [#allocation3], %s1393_s16, %s1393_s16, %s1394_s17  }
  0xee   :  { %1390 = dma.done.wait [#allocation3], 512  }
  0xef   :  { %1391 = vsyncadd [#allocation3], 4294966784 }
  0xf0   :  { %903 = vsyncpa [#allocation3], 1 }

</bundles_post_ra>
